<compile_context>
chip_gen: v7x
topology: tpu7x:2x2x1
jax: 0.10.0
libtpu: 0.0.40
codegen_flags: <defaults>
</compile_context>

<pallas_src>
import functools

import jax
import jax.numpy as jnp
from jax.experimental import pallas as pl
from jax.experimental.pallas import tpu as pltpu


# ----------------------------------------------------------------------------
# Fused Pallas kernel
# ----------------------------------------------------------------------------
def _make_fused_bilstm_kernel(num_layers, T, B, H):
    """Builds the fused kernel body for a static (num_layers, T, B, H) config."""
    n_dir = 2
    G = 4 * H

    def kernel(*refs):
        it = iter(refs)
        x_ref = next(it)                                    # [T, B, D]
        lstm = [tuple(next(it) for _ in range(5))           # (w_ih_T, w_hh_T, bias, h0, c0)
                for _ in range(num_layers * n_dir)]
        fc_w_ref = next(it)                                 # [2H, C]
        fc_b_ref = next(it)                                 # [1, C]
        out_ref = next(it)                                  # [B, C]
        out_scr = next(it)                                  # VMEM [2, T, B, H]

        # Lane mask / scale for the one-pass gate activation
        # (g gate uses tanh(x) = 2*sigmoid(2x) - 1).
        lane = jax.lax.broadcasted_iota(jnp.int32, (1, G), 1)
        is_g = jnp.logical_and(lane >= 2 * H, lane < 3 * H)
        gate_scale = jnp.where(is_g, 2.0, 1.0)

        x = x_ref[...].astype(jnp.float32)                  # [T, B, Din]
        for layer in range(num_layers):
            d_in = x.shape[-1]
            x_flat = x.reshape(T * B, d_in)
            for direction in range(n_dir):
                w_ih_ref, w_hh_ref, b_ref, h0_ref, c0_ref = (
                    lstm[layer * n_dir + direction])

                # Hoisted input projection: one MXU matmul for all timesteps.
                gx = (jnp.dot(x_flat, w_ih_ref[...],
                              preferred_element_type=jnp.float32)
                      + b_ref[...]).reshape(T, B, G)

                w_hh = w_hh_ref[...]                        # [H, 4H]
                h = h0_ref[...].astype(jnp.float32)         # [B, H]
                c = c0_ref[...].astype(jnp.float32)         # [B, H]

                # Sequential recurrence, fully unrolled (T small & static).
                for step in range(T):
                    t = step if direction == 0 else T - 1 - step
                    g = gx[t] + jnp.dot(h, w_hh,
                                        preferred_element_type=jnp.float32)
                    s = jax.nn.sigmoid(g * gate_scale)      # one EUP pass, full vreg
                    act = jnp.where(is_g, 2.0 * s - 1.0, s)
                    i_g = act[:, 0 * H:1 * H]
                    f_g = act[:, 1 * H:2 * H]
                    g_g = act[:, 2 * H:3 * H]
                    o_g = act[:, 3 * H:4 * H]
                    c = f_g * c + i_g * g_g
                    h = o_g * jnp.tanh(c)
                    out_scr[direction, t] = h               # stays in VMEM

            # Next layer input: concat of both directions (VMEM only).
            x = jnp.concatenate([out_scr[0], out_scr[1]], axis=-1)  # [T, B, 2H]

        last = x[T - 1]                                     # outputs[-1]: [B, 2H]
        out_ref[...] = (jnp.dot(last, fc_w_ref[...],
                                preferred_element_type=jnp.float32)
                        + fc_b_ref[...]).astype(out_ref.dtype)

    return kernel


# ----------------------------------------------------------------------------
# Wrapper
# ----------------------------------------------------------------------------
@functools.partial(jax.jit, static_argnames=("num_layers",))
def text_bilstm_forward(tokens, params, h0, c0, *, num_layers):
    """Mirrors TextBiLSTM.forward.

    tokens: [B, T] int32; h0, c0: [num_layers*2, B, H] initial states.
    Returns logits [B, num_classes].
    """
    B, T = tokens.shape
    H = h0.shape[-1]
    C = params["fc_w_T"].shape[1]

    # Embedding lookup kept as a single XLA gather (glue); all matmuls and the
    # whole recurrence live in the fused Pallas kernel below.
    # TODO(synk): fold the gather into the kernel (SMEM token ids + dynamic
    # VMEM row reads) if it ever shows up in profiles.
    emb = jnp.take(params["embedding"], tokens, axis=0)     # [B, T, D]
    x = jnp.transpose(emb, (1, 0, 2))                       # [T, B, D] time-major

    inputs = [x]
    for idx in range(num_layers * 2):
        inputs += [params[f"w_ih_T_{idx}"], params[f"w_hh_T_{idx}"],
                   params[f"bias_{idx}"], h0[idx], c0[idx]]
    inputs += [params["fc_w_T"], params["fc_b"].reshape(1, C)]

    kernel = _make_fused_bilstm_kernel(num_layers, T, B, H)
    return pl.pallas_call(
        kernel,
        out_shape=jax.ShapeDtypeStruct((B, C), jnp.float32),
        in_specs=[pl.BlockSpec(memory_space=pltpu.MemorySpace.VMEM)] * len(inputs),
        out_specs=pl.BlockSpec(memory_space=pltpu.MemorySpace.VMEM),
        scratch_shapes=[pltpu.VMEM((2, T, B, H), jnp.float32)],
    )(*inputs)


# ----------------------------------------------------------------------------
# Pure-JAX reference (correctness check)
# ----------------------------------------------------------------------------
def _ref_lstm_layer(x, w_ih_T, w_hh_T, bias, h0, c0):
    H = h0.shape[1]

    def step(carry, x_t):
        h, c = carry
        gates = x_t @ w_ih_T + h @ w_hh_T + bias[0]
        i = jax.nn.sigmoid(gates[:, 0 * H:1 * H])
        f = jax.nn.sigmoid(gates[:, 1 * H:2 * H])
        g = jnp.tanh(gates[:, 2 * H:3 * H])
        o = jax.nn.sigmoid(gates[:, 3 * H:4 * H])
        c = f * c + i * g
        h = o * jnp.tanh(c)
        return (h, c), h

    (_, _), outs = jax.lax.scan(step, (h0, c0), x)
    return outs


def _ref_forward(tokens, params, h0, c0, num_layers):
    emb = jnp.take(params["embedding"], tokens, axis=0)
    x = jnp.transpose(emb, (1, 0, 2))
    for layer in range(num_layers):
        outs = []
        for direction in range(2):
            idx = layer * 2 + direction
            xin = x if direction == 0 else x[::-1]
            o = _ref_lstm_layer(xin, params[f"w_ih_T_{idx}"],
                                params[f"w_hh_T_{idx}"], params[f"bias_{idx}"],
                                h0[idx], c0[idx])
            if direction == 1:
                o = o[::-1]
            outs.append(o)
        x = jnp.concatenate(outs, axis=-1)
    return x[-1] @ params["fc_w_T"] + params["fc_b"]


# ----------------------------------------------------------------------------
# Parameter construction (deterministic, synthetic)
# ----------------------------------------------------------------------------
def init_params(key, vocab_size, feature_size, hidden_size, num_layers,
                num_classes):
    params = {}
    # 1 (embedding) + 4 per (layer, direction) + 2 (fc_w, fc_b)
    n_keys = 3 + 4 * num_layers * 2
    keys = iter(jax.random.split(key, n_keys))

    params["embedding"] = jax.random.normal(
        next(keys), (vocab_size, feature_size), jnp.float32)

    scale = 1.0 / jnp.sqrt(hidden_size)
    for layer in range(num_layers):
        in_size = feature_size if layer == 0 else 2 * hidden_size
        for direction in range(2):
            idx = layer * 2 + direction
            # Stored pre-transposed (MXU-ready): [Din,4H] / [H,4H].
            params[f"w_ih_T_{idx}"] = jax.random.uniform(
                next(keys), (in_size, 4 * hidden_size), jnp.float32,
                -scale, scale)
            params[f"w_hh_T_{idx}"] = jax.random.uniform(
                next(keys), (hidden_size, 4 * hidden_size), jnp.float32,
                -scale, scale)
            b_ih = jax.random.uniform(next(keys), (4 * hidden_size,),
                                      jnp.float32, -scale, scale)
            b_hh = jax.random.uniform(next(keys), (4 * hidden_size,),
                                      jnp.float32, -scale, scale)
            params[f"bias_{idx}"] = (b_ih + b_hh).reshape(1, 4 * hidden_size)

    fscale = 1.0 / jnp.sqrt(2 * hidden_size)
    params["fc_w_T"] = jax.random.uniform(
        next(keys), (2 * hidden_size, num_classes), jnp.float32,
        -fscale, fscale)
    params["fc_b"] = jax.random.uniform(
        next(keys), (num_classes,), jnp.float32, -fscale, fscale)
    return params


if __name__ == "__main__":
    # Config (small, consistent with the module's forward)
    vocab_size, feature_size, hidden_size = 100, 32, 32
    num_layers, num_classes = 2, 5
    batch, seq_len = 2, 8

    root = jax.random.PRNGKey(0)
    k_tok, k_par, k_h, k_c = jax.random.split(root, 4)

    tokens = jax.random.randint(k_tok, (batch, seq_len), 0, vocab_size,
                                dtype=jnp.int32)
    params = init_params(k_par, vocab_size, feature_size, hidden_size,
                         num_layers, num_classes)

    # torch.randn initial hidden/cell states -> deterministic normal samples.
    h0 = jax.random.normal(k_h, (num_layers * 2, batch, hidden_size),
                           jnp.float32)
    c0 = jax.random.normal(k_c, (num_layers * 2, batch, hidden_size),
                           jnp.float32)

    logits = text_bilstm_forward(tokens, params, h0, c0,
                                 num_layers=num_layers)
    jax.block_until_ready(logits)

    ref = _ref_forward(tokens, params, h0, c0, num_layers)
    assert logits.shape == (batch, num_classes)
    assert jnp.allclose(logits, ref, atol=1e-4, rtol=1e-4), (
        "Pallas output mismatch vs. JAX reference")

    print("KERNEL_OK")
</pallas_src>

<mosaic_0001>
module attributes {stable_mosaic.version = 11 : i64} {
  func.func @kernel(%arg0: memref<8x2x32xf32, #tpu.memory_space<vmem>>, %arg1: memref<32x128xf32, #tpu.memory_space<vmem>>, %arg2: memref<32x128xf32, #tpu.memory_space<vmem>>, %arg3: memref<1x128xf32, #tpu.memory_space<vmem>>, %arg4: memref<2x32xf32, #tpu.memory_space<vmem>>, %arg5: memref<2x32xf32, #tpu.memory_space<vmem>>, %arg6: memref<32x128xf32, #tpu.memory_space<vmem>>, %arg7: memref<32x128xf32, #tpu.memory_space<vmem>>, %arg8: memref<1x128xf32, #tpu.memory_space<vmem>>, %arg9: memref<2x32xf32, #tpu.memory_space<vmem>>, %arg10: memref<2x32xf32, #tpu.memory_space<vmem>>, %arg11: memref<64x128xf32, #tpu.memory_space<vmem>>, %arg12: memref<32x128xf32, #tpu.memory_space<vmem>>, %arg13: memref<1x128xf32, #tpu.memory_space<vmem>>, %arg14: memref<2x32xf32, #tpu.memory_space<vmem>>, %arg15: memref<2x32xf32, #tpu.memory_space<vmem>>, %arg16: memref<64x128xf32, #tpu.memory_space<vmem>>, %arg17: memref<32x128xf32, #tpu.memory_space<vmem>>, %arg18: memref<1x128xf32, #tpu.memory_space<vmem>>, %arg19: memref<2x32xf32, #tpu.memory_space<vmem>>, %arg20: memref<2x32xf32, #tpu.memory_space<vmem>>, %arg21: memref<64x5xf32, #tpu.memory_space<vmem>>, %arg22: memref<1x5xf32, #tpu.memory_space<vmem>>, %arg23: memref<2x5xf32, #tpu.memory_space<vmem>>, %arg24: memref<2x8x2x32xf32, #tpu.memory_space<vmem>>) attributes {dimension_semantics = [], scalar_prefetch = 0 : i64, scratch_operands = 1 : i64, tpu.core_type = #tpu.core_type<tc>} {
    %0 = tpu.iota {dimensions = array<i32: 1>} : vector<1x128xi32>
    %c64_i32 = arith.constant 64 : i32
    %1 = vector.broadcast %c64_i32 : i32 to vector<1x128xi32>
    %2 = arith.cmpi sge, %0, %1 : vector<1x128xi32>
    %c96_i32 = arith.constant 96 : i32
    %3 = vector.broadcast %c96_i32 : i32 to vector<1x128xi32>
    %4 = arith.cmpi slt, %0, %3 : vector<1x128xi32>
    %5 = arith.andi %2, %4 : vector<1x128xi1>
    %cst = arith.constant 2.000000e+00 : f32
    %cst_0 = arith.constant 1.000000e+00 : f32
    %6 = vector.broadcast %cst : f32 to vector<1x128xf32>
    %7 = vector.broadcast %cst_0 : f32 to vector<1x128xf32>
    %8 = arith.select %5, %6, %7 : vector<1x128xi1>, vector<1x128xf32>
    %c0 = arith.constant 0 : index
    %c0_1 = arith.constant 0 : index
    %c0_2 = arith.constant 0 : index
    %9 = vector.load %arg0[%c0, %c0_1, %c0_2] : memref<8x2x32xf32, #tpu.memory_space<vmem>>, vector<8x2x32xf32>
    %10 = vector.shape_cast %9 : vector<8x2x32xf32> to vector<16x32xf32>
    %c0_3 = arith.constant 0 : index
    %c0_4 = arith.constant 0 : index
    %11 = vector.load %arg1[%c0_3, %c0_4] : memref<32x128xf32, #tpu.memory_space<vmem>>, vector<32x128xf32>
    %cst_5 = arith.constant dense<0.000000e+00> : vector<16x128xf32>
    %12 = tpu.matmul %10, %11, %cst_5 {dimension_numbers = #tpu.dot_dimension_numbers<[1], [0], [0], [1], [0, 0, 1, 1], [], []>} : vector<16x32xf32>, vector<32x128xf32>, vector<16x128xf32> -> vector<16x128xf32>
    %c0_6 = arith.constant 0 : index
    %c0_7 = arith.constant 0 : index
    %13 = vector.load %arg3[%c0_6, %c0_7] : memref<1x128xf32, #tpu.memory_space<vmem>>, vector<1x128xf32>
    %14 = vector.broadcast %13 : vector<1x128xf32> to vector<16x128xf32>
    %15 = arith.addf %12, %14 : vector<16x128xf32>
    %16 = vector.shape_cast %15 : vector<16x128xf32> to vector<8x2x128xf32>
    %c0_8 = arith.constant 0 : index
    %c0_9 = arith.constant 0 : index
    %17 = vector.load %arg2[%c0_8, %c0_9] : memref<32x128xf32, #tpu.memory_space<vmem>>, vector<32x128xf32>
    %c0_10 = arith.constant 0 : index
    %c0_11 = arith.constant 0 : index
    %18 = vector.load %arg4[%c0_10, %c0_11] : memref<2x32xf32, #tpu.memory_space<vmem>>, vector<2x32xf32>
    %c0_12 = arith.constant 0 : index
    %c0_13 = arith.constant 0 : index
    %19 = vector.load %arg5[%c0_12, %c0_13] : memref<2x32xf32, #tpu.memory_space<vmem>>, vector<2x32xf32>
    %20 = vector.extract_strided_slice %16 {offsets = [0, 0, 0], sizes = [1, 2, 128], strides = [1, 1, 1]} : vector<8x2x128xf32> to vector<1x2x128xf32>
    %21 = vector.shape_cast %20 : vector<1x2x128xf32> to vector<2x128xf32>
    %cst_14 = arith.constant dense<0.000000e+00> : vector<2x128xf32>
    %22 = tpu.matmul %18, %17, %cst_14 {dimension_numbers = #tpu.dot_dimension_numbers<[1], [0], [0], [1], [0, 0, 1, 1], [], []>} : vector<2x32xf32>, vector<32x128xf32>, vector<2x128xf32> -> vector<2x128xf32>
    %23 = arith.addf %21, %22 : vector<2x128xf32>
    %24 = vector.broadcast %8 : vector<1x128xf32> to vector<2x128xf32>
    %25 = arith.mulf %23, %24 : vector<2x128xf32>
    %26 = arith.negf %25 : vector<2x128xf32>
    %27 = math.exp %26 : vector<2x128xf32>
    %cst_15 = arith.constant 1.000000e+00 : f32
    %28 = vector.broadcast %cst_15 : f32 to vector<2x128xf32>
    %29 = arith.addf %28, %27 : vector<2x128xf32>
    %30 = arith.divf %28, %29 : vector<2x128xf32>
    %cst_16 = arith.constant 2.000000e+00 : f32
    %31 = vector.broadcast %cst_16 : f32 to vector<2x128xf32>
    %32 = arith.mulf %31, %30 : vector<2x128xf32>
    %cst_17 = arith.constant 1.000000e+00 : f32
    %33 = vector.broadcast %cst_17 : f32 to vector<2x128xf32>
    %34 = arith.subf %32, %33 : vector<2x128xf32>
    %35 = vector.shape_cast %5 : vector<1x128xi1> to vector<1x128xi1>
    %36 = vector.broadcast %35 : vector<1x128xi1> to vector<2x128xi1>
    %37 = arith.select %36, %34, %30 : vector<2x128xi1>, vector<2x128xf32>
    %38 = vector.extract_strided_slice %37 {offsets = [0, 0], sizes = [2, 32], strides = [1, 1]} : vector<2x128xf32> to vector<2x32xf32>
    %39 = vector.extract_strided_slice %37 {offsets = [0, 32], sizes = [2, 32], strides = [1, 1]} : vector<2x128xf32> to vector<2x32xf32>
    %40 = vector.extract_strided_slice %37 {offsets = [0, 64], sizes = [2, 32], strides = [1, 1]} : vector<2x128xf32> to vector<2x32xf32>
    %41 = vector.extract_strided_slice %37 {offsets = [0, 96], sizes = [2, 32], strides = [1, 1]} : vector<2x128xf32> to vector<2x32xf32>
    %42 = arith.mulf %39, %19 : vector<2x32xf32>
    %43 = arith.mulf %38, %40 : vector<2x32xf32>
    %44 = arith.addf %42, %43 : vector<2x32xf32>
    %45 = math.tanh %44 : vector<2x32xf32>
    %46 = arith.mulf %41, %45 : vector<2x32xf32>
    %c0_18 = arith.constant 0 : index
    %c0_19 = arith.constant 0 : index
    %c0_20 = arith.constant 0 : index
    %c0_21 = arith.constant 0 : index
    %47 = vector.load %arg24[%c0_18, %c0_19, %c0_20, %c0_21] : memref<2x8x2x32xf32, #tpu.memory_space<vmem>>, vector<1x1x2x32xf32>
    %48 = vector.shape_cast %47 : vector<1x1x2x32xf32> to vector<2x32xf32>
    %49 = vector.shape_cast %46 : vector<2x32xf32> to vector<1x1x2x32xf32>
    tpu.vector_store %arg24[%c0_18, %c0_19, %c0_20, %c0_21], %49 {strides = array<i32>} : memref<2x8x2x32xf32, #tpu.memory_space<vmem>>, vector<1x1x2x32xf32>,
    %50 = vector.extract_strided_slice %16 {offsets = [1, 0, 0], sizes = [1, 2, 128], strides = [1, 1, 1]} : vector<8x2x128xf32> to vector<1x2x128xf32>
    %51 = vector.shape_cast %50 : vector<1x2x128xf32> to vector<2x128xf32>
    %cst_22 = arith.constant dense<0.000000e+00> : vector<2x128xf32>
    %52 = tpu.matmul %46, %17, %cst_22 {dimension_numbers = #tpu.dot_dimension_numbers<[1], [0], [0], [1], [0, 0, 1, 1], [], []>} : vector<2x32xf32>, vector<32x128xf32>, vector<2x128xf32> -> vector<2x128xf32>
    %53 = arith.addf %51, %52 : vector<2x128xf32>
    %54 = vector.broadcast %8 : vector<1x128xf32> to vector<2x128xf32>
    %55 = arith.mulf %53, %54 : vector<2x128xf32>
    %56 = arith.negf %55 : vector<2x128xf32>
    %57 = math.exp %56 : vector<2x128xf32>
    %cst_23 = arith.constant 1.000000e+00 : f32
    %58 = vector.broadcast %cst_23 : f32 to vector<2x128xf32>
    %59 = arith.addf %58, %57 : vector<2x128xf32>
    %60 = arith.divf %58, %59 : vector<2x128xf32>
    %cst_24 = arith.constant 2.000000e+00 : f32
    %61 = vector.broadcast %cst_24 : f32 to vector<2x128xf32>
    %62 = arith.mulf %61, %60 : vector<2x128xf32>
    %cst_25 = arith.constant 1.000000e+00 : f32
    %63 = vector.broadcast %cst_25 : f32 to vector<2x128xf32>
    %64 = arith.subf %62, %63 : vector<2x128xf32>
    %65 = vector.shape_cast %5 : vector<1x128xi1> to vector<1x128xi1>
    %66 = vector.broadcast %65 : vector<1x128xi1> to vector<2x128xi1>
    %67 = arith.select %66, %64, %60 : vector<2x128xi1>, vector<2x128xf32>
    %68 = vector.extract_strided_slice %67 {offsets = [0, 0], sizes = [2, 32], strides = [1, 1]} : vector<2x128xf32> to vector<2x32xf32>
    %69 = vector.extract_strided_slice %67 {offsets = [0, 32], sizes = [2, 32], strides = [1, 1]} : vector<2x128xf32> to vector<2x32xf32>
    %70 = vector.extract_strided_slice %67 {offsets = [0, 64], sizes = [2, 32], strides = [1, 1]} : vector<2x128xf32> to vector<2x32xf32>
    %71 = vector.extract_strided_slice %67 {offsets = [0, 96], sizes = [2, 32], strides = [1, 1]} : vector<2x128xf32> to vector<2x32xf32>
    %72 = arith.mulf %69, %44 : vector<2x32xf32>
    %73 = arith.mulf %68, %70 : vector<2x32xf32>
    %74 = arith.addf %72, %73 : vector<2x32xf32>
    %75 = math.tanh %74 : vector<2x32xf32>
    %76 = arith.mulf %71, %75 : vector<2x32xf32>
    %c0_26 = arith.constant 0 : index
    %c1 = arith.constant 1 : index
    %c0_27 = arith.constant 0 : index
    %c0_28 = arith.constant 0 : index
    %77 = vector.load %arg24[%c0_26, %c1, %c0_27, %c0_28] : memref<2x8x2x32xf32, #tpu.memory_space<vmem>>, vector<1x1x2x32xf32>
    %78 = vector.shape_cast %77 : vector<1x1x2x32xf32> to vector<2x32xf32>
    %79 = vector.shape_cast %76 : vector<2x32xf32> to vector<1x1x2x32xf32>
    tpu.vector_store %arg24[%c0_26, %c1, %c0_27, %c0_28], %79 {strides = array<i32>} : memref<2x8x2x32xf32, #tpu.memory_space<vmem>>, vector<1x1x2x32xf32>,
    %80 = vector.extract_strided_slice %16 {offsets = [2, 0, 0], sizes = [1, 2, 128], strides = [1, 1, 1]} : vector<8x2x128xf32> to vector<1x2x128xf32>
    %81 = vector.shape_cast %80 : vector<1x2x128xf32> to vector<2x128xf32>
    %cst_29 = arith.constant dense<0.000000e+00> : vector<2x128xf32>
    %82 = tpu.matmul %76, %17, %cst_29 {dimension_numbers = #tpu.dot_dimension_numbers<[1], [0], [0], [1], [0, 0, 1, 1], [], []>} : vector<2x32xf32>, vector<32x128xf32>, vector<2x128xf32> -> vector<2x128xf32>
    %83 = arith.addf %81, %82 : vector<2x128xf32>
    %84 = vector.broadcast %8 : vector<1x128xf32> to vector<2x128xf32>
    %85 = arith.mulf %83, %84 : vector<2x128xf32>
    %86 = arith.negf %85 : vector<2x128xf32>
    %87 = math.exp %86 : vector<2x128xf32>
    %cst_30 = arith.constant 1.000000e+00 : f32
    %88 = vector.broadcast %cst_30 : f32 to vector<2x128xf32>
    %89 = arith.addf %88, %87 : vector<2x128xf32>
    %90 = arith.divf %88, %89 : vector<2x128xf32>
    %cst_31 = arith.constant 2.000000e+00 : f32
    %91 = vector.broadcast %cst_31 : f32 to vector<2x128xf32>
    %92 = arith.mulf %91, %90 : vector<2x128xf32>
    %cst_32 = arith.constant 1.000000e+00 : f32
    %93 = vector.broadcast %cst_32 : f32 to vector<2x128xf32>
    %94 = arith.subf %92, %93 : vector<2x128xf32>
    %95 = vector.shape_cast %5 : vector<1x128xi1> to vector<1x128xi1>
    %96 = vector.broadcast %95 : vector<1x128xi1> to vector<2x128xi1>
    %97 = arith.select %96, %94, %90 : vector<2x128xi1>, vector<2x128xf32>
    %98 = vector.extract_strided_slice %97 {offsets = [0, 0], sizes = [2, 32], strides = [1, 1]} : vector<2x128xf32> to vector<2x32xf32>
    %99 = vector.extract_strided_slice %97 {offsets = [0, 32], sizes = [2, 32], strides = [1, 1]} : vector<2x128xf32> to vector<2x32xf32>
    %100 = vector.extract_strided_slice %97 {offsets = [0, 64], sizes = [2, 32], strides = [1, 1]} : vector<2x128xf32> to vector<2x32xf32>
    %101 = vector.extract_strided_slice %97 {offsets = [0, 96], sizes = [2, 32], strides = [1, 1]} : vector<2x128xf32> to vector<2x32xf32>
    %102 = arith.mulf %99, %74 : vector<2x32xf32>
    %103 = arith.mulf %98, %100 : vector<2x32xf32>
    %104 = arith.addf %102, %103 : vector<2x32xf32>
    %105 = math.tanh %104 : vector<2x32xf32>
    %106 = arith.mulf %101, %105 : vector<2x32xf32>
    %c0_33 = arith.constant 0 : index
    %c2 = arith.constant 2 : index
    %c0_34 = arith.constant 0 : index
    %c0_35 = arith.constant 0 : index
    %107 = vector.load %arg24[%c0_33, %c2, %c0_34, %c0_35] : memref<2x8x2x32xf32, #tpu.memory_space<vmem>>, vector<1x1x2x32xf32>
    %108 = vector.shape_cast %107 : vector<1x1x2x32xf32> to vector<2x32xf32>
    %109 = vector.shape_cast %106 : vector<2x32xf32> to vector<1x1x2x32xf32>
    tpu.vector_store %arg24[%c0_33, %c2, %c0_34, %c0_35], %109 {strides = array<i32>} : memref<2x8x2x32xf32, #tpu.memory_space<vmem>>, vector<1x1x2x32xf32>,
    %110 = vector.extract_strided_slice %16 {offsets = [3, 0, 0], sizes = [1, 2, 128], strides = [1, 1, 1]} : vector<8x2x128xf32> to vector<1x2x128xf32>
    %111 = vector.shape_cast %110 : vector<1x2x128xf32> to vector<2x128xf32>
    %cst_36 = arith.constant dense<0.000000e+00> : vector<2x128xf32>
    %112 = tpu.matmul %106, %17, %cst_36 {dimension_numbers = #tpu.dot_dimension_numbers<[1], [0], [0], [1], [0, 0, 1, 1], [], []>} : vector<2x32xf32>, vector<32x128xf32>, vector<2x128xf32> -> vector<2x128xf32>
    %113 = arith.addf %111, %112 : vector<2x128xf32>
    %114 = vector.broadcast %8 : vector<1x128xf32> to vector<2x128xf32>
    %115 = arith.mulf %113, %114 : vector<2x128xf32>
    %116 = arith.negf %115 : vector<2x128xf32>
    %117 = math.exp %116 : vector<2x128xf32>
    %cst_37 = arith.constant 1.000000e+00 : f32
    %118 = vector.broadcast %cst_37 : f32 to vector<2x128xf32>
    %119 = arith.addf %118, %117 : vector<2x128xf32>
    %120 = arith.divf %118, %119 : vector<2x128xf32>
    %cst_38 = arith.constant 2.000000e+00 : f32
    %121 = vector.broadcast %cst_38 : f32 to vector<2x128xf32>
    %122 = arith.mulf %121, %120 : vector<2x128xf32>
    %cst_39 = arith.constant 1.000000e+00 : f32
    %123 = vector.broadcast %cst_39 : f32 to vector<2x128xf32>
    %124 = arith.subf %122, %123 : vector<2x128xf32>
    %125 = vector.shape_cast %5 : vector<1x128xi1> to vector<1x128xi1>
    %126 = vector.broadcast %125 : vector<1x128xi1> to vector<2x128xi1>
    %127 = arith.select %126, %124, %120 : vector<2x128xi1>, vector<2x128xf32>
    %128 = vector.extract_strided_slice %127 {offsets = [0, 0], sizes = [2, 32], strides = [1, 1]} : vector<2x128xf32> to vector<2x32xf32>
    %129 = vector.extract_strided_slice %127 {offsets = [0, 32], sizes = [2, 32], strides = [1, 1]} : vector<2x128xf32> to vector<2x32xf32>
    %130 = vector.extract_strided_slice %127 {offsets = [0, 64], sizes = [2, 32], strides = [1, 1]} : vector<2x128xf32> to vector<2x32xf32>
    %131 = vector.extract_strided_slice %127 {offsets = [0, 96], sizes = [2, 32], strides = [1, 1]} : vector<2x128xf32> to vector<2x32xf32>
    %132 = arith.mulf %129, %104 : vector<2x32xf32>
    %133 = arith.mulf %128, %130 : vector<2x32xf32>
    %134 = arith.addf %132, %133 : vector<2x32xf32>
    %135 = math.tanh %134 : vector<2x32xf32>
    %136 = arith.mulf %131, %135 : vector<2x32xf32>
    %c0_40 = arith.constant 0 : index
    %c3 = arith.constant 3 : index
    %c0_41 = arith.constant 0 : index
    %c0_42 = arith.constant 0 : index
    %137 = vector.load %arg24[%c0_40, %c3, %c0_41, %c0_42] : memref<2x8x2x32xf32, #tpu.memory_space<vmem>>, vector<1x1x2x32xf32>
    %138 = vector.shape_cast %137 : vector<1x1x2x32xf32> to vector<2x32xf32>
    %139 = vector.shape_cast %136 : vector<2x32xf32> to vector<1x1x2x32xf32>
    tpu.vector_store %arg24[%c0_40, %c3, %c0_41, %c0_42], %139 {strides = array<i32>} : memref<2x8x2x32xf32, #tpu.memory_space<vmem>>, vector<1x1x2x32xf32>,
    %140 = vector.extract_strided_slice %16 {offsets = [4, 0, 0], sizes = [1, 2, 128], strides = [1, 1, 1]} : vector<8x2x128xf32> to vector<1x2x128xf32>
    %141 = vector.shape_cast %140 : vector<1x2x128xf32> to vector<2x128xf32>
    %cst_43 = arith.constant dense<0.000000e+00> : vector<2x128xf32>
    %142 = tpu.matmul %136, %17, %cst_43 {dimension_numbers = #tpu.dot_dimension_numbers<[1], [0], [0], [1], [0, 0, 1, 1], [], []>} : vector<2x32xf32>, vector<32x128xf32>, vector<2x128xf32> -> vector<2x128xf32>
    %143 = arith.addf %141, %142 : vector<2x128xf32>
    %144 = vector.broadcast %8 : vector<1x128xf32> to vector<2x128xf32>
    %145 = arith.mulf %143, %144 : vector<2x128xf32>
    %146 = arith.negf %145 : vector<2x128xf32>
    %147 = math.exp %146 : vector<2x128xf32>
    %cst_44 = arith.constant 1.000000e+00 : f32
    %148 = vector.broadcast %cst_44 : f32 to vector<2x128xf32>
    %149 = arith.addf %148, %147 : vector<2x128xf32>
    %150 = arith.divf %148, %149 : vector<2x128xf32>
    %cst_45 = arith.constant 2.000000e+00 : f32
    %151 = vector.broadcast %cst_45 : f32 to vector<2x128xf32>
    %152 = arith.mulf %151, %150 : vector<2x128xf32>
    %cst_46 = arith.constant 1.000000e+00 : f32
    %153 = vector.broadcast %cst_46 : f32 to vector<2x128xf32>
    %154 = arith.subf %152, %153 : vector<2x128xf32>
    %155 = vector.shape_cast %5 : vector<1x128xi1> to vector<1x128xi1>
    %156 = vector.broadcast %155 : vector<1x128xi1> to vector<2x128xi1>
    %157 = arith.select %156, %154, %150 : vector<2x128xi1>, vector<2x128xf32>
    %158 = vector.extract_strided_slice %157 {offsets = [0, 0], sizes = [2, 32], strides = [1, 1]} : vector<2x128xf32> to vector<2x32xf32>
    %159 = vector.extract_strided_slice %157 {offsets = [0, 32], sizes = [2, 32], strides = [1, 1]} : vector<2x128xf32> to vector<2x32xf32>
    %160 = vector.extract_strided_slice %157 {offsets = [0, 64], sizes = [2, 32], strides = [1, 1]} : vector<2x128xf32> to vector<2x32xf32>
    %161 = vector.extract_strided_slice %157 {offsets = [0, 96], sizes = [2, 32], strides = [1, 1]} : vector<2x128xf32> to vector<2x32xf32>
    %162 = arith.mulf %159, %134 : vector<2x32xf32>
    %163 = arith.mulf %158, %160 : vector<2x32xf32>
    %164 = arith.addf %162, %163 : vector<2x32xf32>
    %165 = math.tanh %164 : vector<2x32xf32>
    %166 = arith.mulf %161, %165 : vector<2x32xf32>
    %c0_47 = arith.constant 0 : index
    %c4 = arith.constant 4 : index
    %c0_48 = arith.constant 0 : index
    %c0_49 = arith.constant 0 : index
    %167 = vector.load %arg24[%c0_47, %c4, %c0_48, %c0_49] : memref<2x8x2x32xf32, #tpu.memory_space<vmem>>, vector<1x1x2x32xf32>
    %168 = vector.shape_cast %167 : vector<1x1x2x32xf32> to vector<2x32xf32>
    %169 = vector.shape_cast %166 : vector<2x32xf32> to vector<1x1x2x32xf32>
    tpu.vector_store %arg24[%c0_47, %c4, %c0_48, %c0_49], %169 {strides = array<i32>} : memref<2x8x2x32xf32, #tpu.memory_space<vmem>>, vector<1x1x2x32xf32>,
    %170 = vector.extract_strided_slice %16 {offsets = [5, 0, 0], sizes = [1, 2, 128], strides = [1, 1, 1]} : vector<8x2x128xf32> to vector<1x2x128xf32>
    %171 = vector.shape_cast %170 : vector<1x2x128xf32> to vector<2x128xf32>
    %cst_50 = arith.constant dense<0.000000e+00> : vector<2x128xf32>
    %172 = tpu.matmul %166, %17, %cst_50 {dimension_numbers = #tpu.dot_dimension_numbers<[1], [0], [0], [1], [0, 0, 1, 1], [], []>} : vector<2x32xf32>, vector<32x128xf32>, vector<2x128xf32> -> vector<2x128xf32>
    %173 = arith.addf %171, %172 : vector<2x128xf32>
    %174 = vector.broadcast %8 : vector<1x128xf32> to vector<2x128xf32>
    %175 = arith.mulf %173, %174 : vector<2x128xf32>
    %176 = arith.negf %175 : vector<2x128xf32>
    %177 = math.exp %176 : vector<2x128xf32>
    %cst_51 = arith.constant 1.000000e+00 : f32
    %178 = vector.broadcast %cst_51 : f32 to vector<2x128xf32>
    %179 = arith.addf %178, %177 : vector<2x128xf32>
    %180 = arith.divf %178, %179 : vector<2x128xf32>
    %cst_52 = arith.constant 2.000000e+00 : f32
    %181 = vector.broadcast %cst_52 : f32 to vector<2x128xf32>
    %182 = arith.mulf %181, %180 : vector<2x128xf32>
    %cst_53 = arith.constant 1.000000e+00 : f32
    %183 = vector.broadcast %cst_53 : f32 to vector<2x128xf32>
    %184 = arith.subf %182, %183 : vector<2x128xf32>
    %185 = vector.shape_cast %5 : vector<1x128xi1> to vector<1x128xi1>
    %186 = vector.broadcast %185 : vector<1x128xi1> to vector<2x128xi1>
    %187 = arith.select %186, %184, %180 : vector<2x128xi1>, vector<2x128xf32>
    %188 = vector.extract_strided_slice %187 {offsets = [0, 0], sizes = [2, 32], strides = [1, 1]} : vector<2x128xf32> to vector<2x32xf32>
    %189 = vector.extract_strided_slice %187 {offsets = [0, 32], sizes = [2, 32], strides = [1, 1]} : vector<2x128xf32> to vector<2x32xf32>
    %190 = vector.extract_strided_slice %187 {offsets = [0, 64], sizes = [2, 32], strides = [1, 1]} : vector<2x128xf32> to vector<2x32xf32>
    %191 = vector.extract_strided_slice %187 {offsets = [0, 96], sizes = [2, 32], strides = [1, 1]} : vector<2x128xf32> to vector<2x32xf32>
    %192 = arith.mulf %189, %164 : vector<2x32xf32>
    %193 = arith.mulf %188, %190 : vector<2x32xf32>
    %194 = arith.addf %192, %193 : vector<2x32xf32>
    %195 = math.tanh %194 : vector<2x32xf32>
    %196 = arith.mulf %191, %195 : vector<2x32xf32>
    %c0_54 = arith.constant 0 : index
    %c5 = arith.constant 5 : index
    %c0_55 = arith.constant 0 : index
    %c0_56 = arith.constant 0 : index
    %197 = vector.load %arg24[%c0_54, %c5, %c0_55, %c0_56] : memref<2x8x2x32xf32, #tpu.memory_space<vmem>>, vector<1x1x2x32xf32>
    %198 = vector.shape_cast %197 : vector<1x1x2x32xf32> to vector<2x32xf32>
    %199 = vector.shape_cast %196 : vector<2x32xf32> to vector<1x1x2x32xf32>
    tpu.vector_store %arg24[%c0_54, %c5, %c0_55, %c0_56], %199 {strides = array<i32>} : memref<2x8x2x32xf32, #tpu.memory_space<vmem>>, vector<1x1x2x32xf32>,
    %200 = vector.extract_strided_slice %16 {offsets = [6, 0, 0], sizes = [1, 2, 128], strides = [1, 1, 1]} : vector<8x2x128xf32> to vector<1x2x128xf32>
    %201 = vector.shape_cast %200 : vector<1x2x128xf32> to vector<2x128xf32>
    %cst_57 = arith.constant dense<0.000000e+00> : vector<2x128xf32>
    %202 = tpu.matmul %196, %17, %cst_57 {dimension_numbers = #tpu.dot_dimension_numbers<[1], [0], [0], [1], [0, 0, 1, 1], [], []>} : vector<2x32xf32>, vector<32x128xf32>, vector<2x128xf32> -> vector<2x128xf32>
    %203 = arith.addf %201, %202 : vector<2x128xf32>
    %204 = vector.broadcast %8 : vector<1x128xf32> to vector<2x128xf32>
    %205 = arith.mulf %203, %204 : vector<2x128xf32>
    %206 = arith.negf %205 : vector<2x128xf32>
    %207 = math.exp %206 : vector<2x128xf32>
    %cst_58 = arith.constant 1.000000e+00 : f32
    %208 = vector.broadcast %cst_58 : f32 to vector<2x128xf32>
    %209 = arith.addf %208, %207 : vector<2x128xf32>
    %210 = arith.divf %208, %209 : vector<2x128xf32>
    %cst_59 = arith.constant 2.000000e+00 : f32
    %211 = vector.broadcast %cst_59 : f32 to vector<2x128xf32>
    %212 = arith.mulf %211, %210 : vector<2x128xf32>
    %cst_60 = arith.constant 1.000000e+00 : f32
    %213 = vector.broadcast %cst_60 : f32 to vector<2x128xf32>
    %214 = arith.subf %212, %213 : vector<2x128xf32>
    %215 = vector.shape_cast %5 : vector<1x128xi1> to vector<1x128xi1>
    %216 = vector.broadcast %215 : vector<1x128xi1> to vector<2x128xi1>
    %217 = arith.select %216, %214, %210 : vector<2x128xi1>, vector<2x128xf32>
    %218 = vector.extract_strided_slice %217 {offsets = [0, 0], sizes = [2, 32], strides = [1, 1]} : vector<2x128xf32> to vector<2x32xf32>
    %219 = vector.extract_strided_slice %217 {offsets = [0, 32], sizes = [2, 32], strides = [1, 1]} : vector<2x128xf32> to vector<2x32xf32>
    %220 = vector.extract_strided_slice %217 {offsets = [0, 64], sizes = [2, 32], strides = [1, 1]} : vector<2x128xf32> to vector<2x32xf32>
    %221 = vector.extract_strided_slice %217 {offsets = [0, 96], sizes = [2, 32], strides = [1, 1]} : vector<2x128xf32> to vector<2x32xf32>
    %222 = arith.mulf %219, %194 : vector<2x32xf32>
    %223 = arith.mulf %218, %220 : vector<2x32xf32>
    %224 = arith.addf %222, %223 : vector<2x32xf32>
    %225 = math.tanh %224 : vector<2x32xf32>
    %226 = arith.mulf %221, %225 : vector<2x32xf32>
    %c0_61 = arith.constant 0 : index
    %c6 = arith.constant 6 : index
    %c0_62 = arith.constant 0 : index
    %c0_63 = arith.constant 0 : index
    %227 = vector.load %arg24[%c0_61, %c6, %c0_62, %c0_63] : memref<2x8x2x32xf32, #tpu.memory_space<vmem>>, vector<1x1x2x32xf32>
    %228 = vector.shape_cast %227 : vector<1x1x2x32xf32> to vector<2x32xf32>
    %229 = vector.shape_cast %226 : vector<2x32xf32> to vector<1x1x2x32xf32>
    tpu.vector_store %arg24[%c0_61, %c6, %c0_62, %c0_63], %229 {strides = array<i32>} : memref<2x8x2x32xf32, #tpu.memory_space<vmem>>, vector<1x1x2x32xf32>,
    %230 = vector.extract_strided_slice %16 {offsets = [7, 0, 0], sizes = [1, 2, 128], strides = [1, 1, 1]} : vector<8x2x128xf32> to vector<1x2x128xf32>
    %231 = vector.shape_cast %230 : vector<1x2x128xf32> to vector<2x128xf32>
    %cst_64 = arith.constant dense<0.000000e+00> : vector<2x128xf32>
    %232 = tpu.matmul %226, %17, %cst_64 {dimension_numbers = #tpu.dot_dimension_numbers<[1], [0], [0], [1], [0, 0, 1, 1], [], []>} : vector<2x32xf32>, vector<32x128xf32>, vector<2x128xf32> -> vector<2x128xf32>
    %233 = arith.addf %231, %232 : vector<2x128xf32>
    %234 = vector.broadcast %8 : vector<1x128xf32> to vector<2x128xf32>
    %235 = arith.mulf %233, %234 : vector<2x128xf32>
    %236 = arith.negf %235 : vector<2x128xf32>
    %237 = math.exp %236 : vector<2x128xf32>
    %cst_65 = arith.constant 1.000000e+00 : f32
    %238 = vector.broadcast %cst_65 : f32 to vector<2x128xf32>
    %239 = arith.addf %238, %237 : vector<2x128xf32>
    %240 = arith.divf %238, %239 : vector<2x128xf32>
    %cst_66 = arith.constant 2.000000e+00 : f32
    %241 = vector.broadcast %cst_66 : f32 to vector<2x128xf32>
    %242 = arith.mulf %241, %240 : vector<2x128xf32>
    %cst_67 = arith.constant 1.000000e+00 : f32
    %243 = vector.broadcast %cst_67 : f32 to vector<2x128xf32>
    %244 = arith.subf %242, %243 : vector<2x128xf32>
    %245 = vector.shape_cast %5 : vector<1x128xi1> to vector<1x128xi1>
    %246 = vector.broadcast %245 : vector<1x128xi1> to vector<2x128xi1>
    %247 = arith.select %246, %244, %240 : vector<2x128xi1>, vector<2x128xf32>
    %248 = vector.extract_strided_slice %247 {offsets = [0, 0], sizes = [2, 32], strides = [1, 1]} : vector<2x128xf32> to vector<2x32xf32>
    %249 = vector.extract_strided_slice %247 {offsets = [0, 32], sizes = [2, 32], strides = [1, 1]} : vector<2x128xf32> to vector<2x32xf32>
    %250 = vector.extract_strided_slice %247 {offsets = [0, 64], sizes = [2, 32], strides = [1, 1]} : vector<2x128xf32> to vector<2x32xf32>
    %251 = vector.extract_strided_slice %247 {offsets = [0, 96], sizes = [2, 32], strides = [1, 1]} : vector<2x128xf32> to vector<2x32xf32>
    %252 = arith.mulf %249, %224 : vector<2x32xf32>
    %253 = arith.mulf %248, %250 : vector<2x32xf32>
    %254 = arith.addf %252, %253 : vector<2x32xf32>
    %255 = math.tanh %254 : vector<2x32xf32>
    %256 = arith.mulf %251, %255 : vector<2x32xf32>
    %c0_68 = arith.constant 0 : index
    %c7 = arith.constant 7 : index
    %c0_69 = arith.constant 0 : index
    %c0_70 = arith.constant 0 : index
    %257 = vector.load %arg24[%c0_68, %c7, %c0_69, %c0_70] : memref<2x8x2x32xf32, #tpu.memory_space<vmem>>, vector<1x1x2x32xf32>
    %258 = vector.shape_cast %257 : vector<1x1x2x32xf32> to vector<2x32xf32>
    %259 = vector.shape_cast %256 : vector<2x32xf32> to vector<1x1x2x32xf32>
    tpu.vector_store %arg24[%c0_68, %c7, %c0_69, %c0_70], %259 {strides = array<i32>} : memref<2x8x2x32xf32, #tpu.memory_space<vmem>>, vector<1x1x2x32xf32>,
    %c0_71 = arith.constant 0 : index
    %c0_72 = arith.constant 0 : index
    %260 = vector.load %arg6[%c0_71, %c0_72] : memref<32x128xf32, #tpu.memory_space<vmem>>, vector<32x128xf32>
    %cst_73 = arith.constant dense<0.000000e+00> : vector<16x128xf32>
    %261 = tpu.matmul %10, %260, %cst_73 {dimension_numbers = #tpu.dot_dimension_numbers<[1], [0], [0], [1], [0, 0, 1, 1], [], []>} : vector<16x32xf32>, vector<32x128xf32>, vector<16x128xf32> -> vector<16x128xf32>
    %c0_74 = arith.constant 0 : index
    %c0_75 = arith.constant 0 : index
    %262 = vector.load %arg8[%c0_74, %c0_75] : memref<1x128xf32, #tpu.memory_space<vmem>>, vector<1x128xf32>
    %263 = vector.broadcast %262 : vector<1x128xf32> to vector<16x128xf32>
    %264 = arith.addf %261, %263 : vector<16x128xf32>
    %265 = vector.shape_cast %264 : vector<16x128xf32> to vector<8x2x128xf32>
    %c0_76 = arith.constant 0 : index
    %c0_77 = arith.constant 0 : index
    %266 = vector.load %arg7[%c0_76, %c0_77] : memref<32x128xf32, #tpu.memory_space<vmem>>, vector<32x128xf32>
    %c0_78 = arith.constant 0 : index
    %c0_79 = arith.constant 0 : index
    %267 = vector.load %arg9[%c0_78, %c0_79] : memref<2x32xf32, #tpu.memory_space<vmem>>, vector<2x32xf32>
    %c0_80 = arith.constant 0 : index
    %c0_81 = arith.constant 0 : index
    %268 = vector.load %arg10[%c0_80, %c0_81] : memref<2x32xf32, #tpu.memory_space<vmem>>, vector<2x32xf32>
    %269 = vector.extract_strided_slice %265 {offsets = [7, 0, 0], sizes = [1, 2, 128], strides = [1, 1, 1]} : vector<8x2x128xf32> to vector<1x2x128xf32>
    %270 = vector.shape_cast %269 : vector<1x2x128xf32> to vector<2x128xf32>
    %cst_82 = arith.constant dense<0.000000e+00> : vector<2x128xf32>
    %271 = tpu.matmul %267, %266, %cst_82 {dimension_numbers = #tpu.dot_dimension_numbers<[1], [0], [0], [1], [0, 0, 1, 1], [], []>} : vector<2x32xf32>, vector<32x128xf32>, vector<2x128xf32> -> vector<2x128xf32>
    %272 = arith.addf %270, %271 : vector<2x128xf32>
    %273 = vector.broadcast %8 : vector<1x128xf32> to vector<2x128xf32>
    %274 = arith.mulf %272, %273 : vector<2x128xf32>
    %275 = arith.negf %274 : vector<2x128xf32>
    %276 = math.exp %275 : vector<2x128xf32>
    %cst_83 = arith.constant 1.000000e+00 : f32
    %277 = vector.broadcast %cst_83 : f32 to vector<2x128xf32>
    %278 = arith.addf %277, %276 : vector<2x128xf32>
    %279 = arith.divf %277, %278 : vector<2x128xf32>
    %cst_84 = arith.constant 2.000000e+00 : f32
    %280 = vector.broadcast %cst_84 : f32 to vector<2x128xf32>
    %281 = arith.mulf %280, %279 : vector<2x128xf32>
    %cst_85 = arith.constant 1.000000e+00 : f32
    %282 = vector.broadcast %cst_85 : f32 to vector<2x128xf32>
    %283 = arith.subf %281, %282 : vector<2x128xf32>
    %284 = vector.shape_cast %5 : vector<1x128xi1> to vector<1x128xi1>
    %285 = vector.broadcast %284 : vector<1x128xi1> to vector<2x128xi1>
    %286 = arith.select %285, %283, %279 : vector<2x128xi1>, vector<2x128xf32>
    %287 = vector.extract_strided_slice %286 {offsets = [0, 0], sizes = [2, 32], strides = [1, 1]} : vector<2x128xf32> to vector<2x32xf32>
    %288 = vector.extract_strided_slice %286 {offsets = [0, 32], sizes = [2, 32], strides = [1, 1]} : vector<2x128xf32> to vector<2x32xf32>
    %289 = vector.extract_strided_slice %286 {offsets = [0, 64], sizes = [2, 32], strides = [1, 1]} : vector<2x128xf32> to vector<2x32xf32>
    %290 = vector.extract_strided_slice %286 {offsets = [0, 96], sizes = [2, 32], strides = [1, 1]} : vector<2x128xf32> to vector<2x32xf32>
    %291 = arith.mulf %288, %268 : vector<2x32xf32>
    %292 = arith.mulf %287, %289 : vector<2x32xf32>
    %293 = arith.addf %291, %292 : vector<2x32xf32>
    %294 = math.tanh %293 : vector<2x32xf32>
    %295 = arith.mulf %290, %294 : vector<2x32xf32>
    %c1_86 = arith.constant 1 : index
    %c7_87 = arith.constant 7 : index
    %c0_88 = arith.constant 0 : index
    %c0_89 = arith.constant 0 : index
    %296 = vector.load %arg24[%c1_86, %c7_87, %c0_88, %c0_89] : memref<2x8x2x32xf32, #tpu.memory_space<vmem>>, vector<1x1x2x32xf32>
    %297 = vector.shape_cast %296 : vector<1x1x2x32xf32> to vector<2x32xf32>
    %298 = vector.shape_cast %295 : vector<2x32xf32> to vector<1x1x2x32xf32>
    tpu.vector_store %arg24[%c1_86, %c7_87, %c0_88, %c0_89], %298 {strides = array<i32>} : memref<2x8x2x32xf32, #tpu.memory_space<vmem>>, vector<1x1x2x32xf32>,
    %299 = vector.extract_strided_slice %265 {offsets = [6, 0, 0], sizes = [1, 2, 128], strides = [1, 1, 1]} : vector<8x2x128xf32> to vector<1x2x128xf32>
    %300 = vector.shape_cast %299 : vector<1x2x128xf32> to vector<2x128xf32>
    %cst_90 = arith.constant dense<0.000000e+00> : vector<2x128xf32>
    %301 = tpu.matmul %295, %266, %cst_90 {dimension_numbers = #tpu.dot_dimension_numbers<[1], [0], [0], [1], [0, 0, 1, 1], [], []>} : vector<2x32xf32>, vector<32x128xf32>, vector<2x128xf32> -> vector<2x128xf32>
    %302 = arith.addf %300, %301 : vector<2x128xf32>
    %303 = vector.broadcast %8 : vector<1x128xf32> to vector<2x128xf32>
    %304 = arith.mulf %302, %303 : vector<2x128xf32>
    %305 = arith.negf %304 : vector<2x128xf32>
    %306 = math.exp %305 : vector<2x128xf32>
    %cst_91 = arith.constant 1.000000e+00 : f32
    %307 = vector.broadcast %cst_91 : f32 to vector<2x128xf32>
    %308 = arith.addf %307, %306 : vector<2x128xf32>
    %309 = arith.divf %307, %308 : vector<2x128xf32>
    %cst_92 = arith.constant 2.000000e+00 : f32
    %310 = vector.broadcast %cst_92 : f32 to vector<2x128xf32>
    %311 = arith.mulf %310, %309 : vector<2x128xf32>
    %cst_93 = arith.constant 1.000000e+00 : f32
    %312 = vector.broadcast %cst_93 : f32 to vector<2x128xf32>
    %313 = arith.subf %311, %312 : vector<2x128xf32>
    %314 = vector.shape_cast %5 : vector<1x128xi1> to vector<1x128xi1>
    %315 = vector.broadcast %314 : vector<1x128xi1> to vector<2x128xi1>
    %316 = arith.select %315, %313, %309 : vector<2x128xi1>, vector<2x128xf32>
    %317 = vector.extract_strided_slice %316 {offsets = [0, 0], sizes = [2, 32], strides = [1, 1]} : vector<2x128xf32> to vector<2x32xf32>
    %318 = vector.extract_strided_slice %316 {offsets = [0, 32], sizes = [2, 32], strides = [1, 1]} : vector<2x128xf32> to vector<2x32xf32>
    %319 = vector.extract_strided_slice %316 {offsets = [0, 64], sizes = [2, 32], strides = [1, 1]} : vector<2x128xf32> to vector<2x32xf32>
    %320 = vector.extract_strided_slice %316 {offsets = [0, 96], sizes = [2, 32], strides = [1, 1]} : vector<2x128xf32> to vector<2x32xf32>
    %321 = arith.mulf %318, %293 : vector<2x32xf32>
    %322 = arith.mulf %317, %319 : vector<2x32xf32>
    %323 = arith.addf %321, %322 : vector<2x32xf32>
    %324 = math.tanh %323 : vector<2x32xf32>
    %325 = arith.mulf %320, %324 : vector<2x32xf32>
    %c1_94 = arith.constant 1 : index
    %c6_95 = arith.constant 6 : index
    %c0_96 = arith.constant 0 : index
    %c0_97 = arith.constant 0 : index
    %326 = vector.load %arg24[%c1_94, %c6_95, %c0_96, %c0_97] : memref<2x8x2x32xf32, #tpu.memory_space<vmem>>, vector<1x1x2x32xf32>
    %327 = vector.shape_cast %326 : vector<1x1x2x32xf32> to vector<2x32xf32>
    %328 = vector.shape_cast %325 : vector<2x32xf32> to vector<1x1x2x32xf32>
    tpu.vector_store %arg24[%c1_94, %c6_95, %c0_96, %c0_97], %328 {strides = array<i32>} : memref<2x8x2x32xf32, #tpu.memory_space<vmem>>, vector<1x1x2x32xf32>,
    %329 = vector.extract_strided_slice %265 {offsets = [5, 0, 0], sizes = [1, 2, 128], strides = [1, 1, 1]} : vector<8x2x128xf32> to vector<1x2x128xf32>
    %330 = vector.shape_cast %329 : vector<1x2x128xf32> to vector<2x128xf32>
    %cst_98 = arith.constant dense<0.000000e+00> : vector<2x128xf32>
    %331 = tpu.matmul %325, %266, %cst_98 {dimension_numbers = #tpu.dot_dimension_numbers<[1], [0], [0], [1], [0, 0, 1, 1], [], []>} : vector<2x32xf32>, vector<32x128xf32>, vector<2x128xf32> -> vector<2x128xf32>
    %332 = arith.addf %330, %331 : vector<2x128xf32>
    %333 = vector.broadcast %8 : vector<1x128xf32> to vector<2x128xf32>
    %334 = arith.mulf %332, %333 : vector<2x128xf32>
    %335 = arith.negf %334 : vector<2x128xf32>
    %336 = math.exp %335 : vector<2x128xf32>
    %cst_99 = arith.constant 1.000000e+00 : f32
    %337 = vector.broadcast %cst_99 : f32 to vector<2x128xf32>
    %338 = arith.addf %337, %336 : vector<2x128xf32>
    %339 = arith.divf %337, %338 : vector<2x128xf32>
    %cst_100 = arith.constant 2.000000e+00 : f32
    %340 = vector.broadcast %cst_100 : f32 to vector<2x128xf32>
    %341 = arith.mulf %340, %339 : vector<2x128xf32>
    %cst_101 = arith.constant 1.000000e+00 : f32
    %342 = vector.broadcast %cst_101 : f32 to vector<2x128xf32>
    %343 = arith.subf %341, %342 : vector<2x128xf32>
    %344 = vector.shape_cast %5 : vector<1x128xi1> to vector<1x128xi1>
    %345 = vector.broadcast %344 : vector<1x128xi1> to vector<2x128xi1>
    %346 = arith.select %345, %343, %339 : vector<2x128xi1>, vector<2x128xf32>
    %347 = vector.extract_strided_slice %346 {offsets = [0, 0], sizes = [2, 32], strides = [1, 1]} : vector<2x128xf32> to vector<2x32xf32>
    %348 = vector.extract_strided_slice %346 {offsets = [0, 32], sizes = [2, 32], strides = [1, 1]} : vector<2x128xf32> to vector<2x32xf32>
    %349 = vector.extract_strided_slice %346 {offsets = [0, 64], sizes = [2, 32], strides = [1, 1]} : vector<2x128xf32> to vector<2x32xf32>
    %350 = vector.extract_strided_slice %346 {offsets = [0, 96], sizes = [2, 32], strides = [1, 1]} : vector<2x128xf32> to vector<2x32xf32>
    %351 = arith.mulf %348, %323 : vector<2x32xf32>
    %352 = arith.mulf %347, %349 : vector<2x32xf32>
    %353 = arith.addf %351, %352 : vector<2x32xf32>
    %354 = math.tanh %353 : vector<2x32xf32>
    %355 = arith.mulf %350, %354 : vector<2x32xf32>
    %c1_102 = arith.constant 1 : index
    %c5_103 = arith.constant 5 : index
    %c0_104 = arith.constant 0 : index
    %c0_105 = arith.constant 0 : index
    %356 = vector.load %arg24[%c1_102, %c5_103, %c0_104, %c0_105] : memref<2x8x2x32xf32, #tpu.memory_space<vmem>>, vector<1x1x2x32xf32>
    %357 = vector.shape_cast %356 : vector<1x1x2x32xf32> to vector<2x32xf32>
    %358 = vector.shape_cast %355 : vector<2x32xf32> to vector<1x1x2x32xf32>
    tpu.vector_store %arg24[%c1_102, %c5_103, %c0_104, %c0_105], %358 {strides = array<i32>} : memref<2x8x2x32xf32, #tpu.memory_space<vmem>>, vector<1x1x2x32xf32>,
    %359 = vector.extract_strided_slice %265 {offsets = [4, 0, 0], sizes = [1, 2, 128], strides = [1, 1, 1]} : vector<8x2x128xf32> to vector<1x2x128xf32>
    %360 = vector.shape_cast %359 : vector<1x2x128xf32> to vector<2x128xf32>
    %cst_106 = arith.constant dense<0.000000e+00> : vector<2x128xf32>
    %361 = tpu.matmul %355, %266, %cst_106 {dimension_numbers = #tpu.dot_dimension_numbers<[1], [0], [0], [1], [0, 0, 1, 1], [], []>} : vector<2x32xf32>, vector<32x128xf32>, vector<2x128xf32> -> vector<2x128xf32>
    %362 = arith.addf %360, %361 : vector<2x128xf32>
    %363 = vector.broadcast %8 : vector<1x128xf32> to vector<2x128xf32>
    %364 = arith.mulf %362, %363 : vector<2x128xf32>
    %365 = arith.negf %364 : vector<2x128xf32>
    %366 = math.exp %365 : vector<2x128xf32>
    %cst_107 = arith.constant 1.000000e+00 : f32
    %367 = vector.broadcast %cst_107 : f32 to vector<2x128xf32>
    %368 = arith.addf %367, %366 : vector<2x128xf32>
    %369 = arith.divf %367, %368 : vector<2x128xf32>
    %cst_108 = arith.constant 2.000000e+00 : f32
    %370 = vector.broadcast %cst_108 : f32 to vector<2x128xf32>
    %371 = arith.mulf %370, %369 : vector<2x128xf32>
    %cst_109 = arith.constant 1.000000e+00 : f32
    %372 = vector.broadcast %cst_109 : f32 to vector<2x128xf32>
    %373 = arith.subf %371, %372 : vector<2x128xf32>
    %374 = vector.shape_cast %5 : vector<1x128xi1> to vector<1x128xi1>
    %375 = vector.broadcast %374 : vector<1x128xi1> to vector<2x128xi1>
    %376 = arith.select %375, %373, %369 : vector<2x128xi1>, vector<2x128xf32>
    %377 = vector.extract_strided_slice %376 {offsets = [0, 0], sizes = [2, 32], strides = [1, 1]} : vector<2x128xf32> to vector<2x32xf32>
    %378 = vector.extract_strided_slice %376 {offsets = [0, 32], sizes = [2, 32], strides = [1, 1]} : vector<2x128xf32> to vector<2x32xf32>
    %379 = vector.extract_strided_slice %376 {offsets = [0, 64], sizes = [2, 32], strides = [1, 1]} : vector<2x128xf32> to vector<2x32xf32>
    %380 = vector.extract_strided_slice %376 {offsets = [0, 96], sizes = [2, 32], strides = [1, 1]} : vector<2x128xf32> to vector<2x32xf32>
    %381 = arith.mulf %378, %353 : vector<2x32xf32>
    %382 = arith.mulf %377, %379 : vector<2x32xf32>
    %383 = arith.addf %381, %382 : vector<2x32xf32>
    %384 = math.tanh %383 : vector<2x32xf32>
    %385 = arith.mulf %380, %384 : vector<2x32xf32>
    %c1_110 = arith.constant 1 : index
    %c4_111 = arith.constant 4 : index
    %c0_112 = arith.constant 0 : index
    %c0_113 = arith.constant 0 : index
    %386 = vector.load %arg24[%c1_110, %c4_111, %c0_112, %c0_113] : memref<2x8x2x32xf32, #tpu.memory_space<vmem>>, vector<1x1x2x32xf32>
    %387 = vector.shape_cast %386 : vector<1x1x2x32xf32> to vector<2x32xf32>
    %388 = vector.shape_cast %385 : vector<2x32xf32> to vector<1x1x2x32xf32>
    tpu.vector_store %arg24[%c1_110, %c4_111, %c0_112, %c0_113], %388 {strides = array<i32>} : memref<2x8x2x32xf32, #tpu.memory_space<vmem>>, vector<1x1x2x32xf32>,
    %389 = vector.extract_strided_slice %265 {offsets = [3, 0, 0], sizes = [1, 2, 128], strides = [1, 1, 1]} : vector<8x2x128xf32> to vector<1x2x128xf32>
    %390 = vector.shape_cast %389 : vector<1x2x128xf32> to vector<2x128xf32>
    %cst_114 = arith.constant dense<0.000000e+00> : vector<2x128xf32>
    %391 = tpu.matmul %385, %266, %cst_114 {dimension_numbers = #tpu.dot_dimension_numbers<[1], [0], [0], [1], [0, 0, 1, 1], [], []>} : vector<2x32xf32>, vector<32x128xf32>, vector<2x128xf32> -> vector<2x128xf32>
    %392 = arith.addf %390, %391 : vector<2x128xf32>
    %393 = vector.broadcast %8 : vector<1x128xf32> to vector<2x128xf32>
    %394 = arith.mulf %392, %393 : vector<2x128xf32>
    %395 = arith.negf %394 : vector<2x128xf32>
    %396 = math.exp %395 : vector<2x128xf32>
    %cst_115 = arith.constant 1.000000e+00 : f32
    %397 = vector.broadcast %cst_115 : f32 to vector<2x128xf32>
    %398 = arith.addf %397, %396 : vector<2x128xf32>
    %399 = arith.divf %397, %398 : vector<2x128xf32>
    %cst_116 = arith.constant 2.000000e+00 : f32
    %400 = vector.broadcast %cst_116 : f32 to vector<2x128xf32>
    %401 = arith.mulf %400, %399 : vector<2x128xf32>
    %cst_117 = arith.constant 1.000000e+00 : f32
    %402 = vector.broadcast %cst_117 : f32 to vector<2x128xf32>
    %403 = arith.subf %401, %402 : vector<2x128xf32>
    %404 = vector.shape_cast %5 : vector<1x128xi1> to vector<1x128xi1>
    %405 = vector.broadcast %404 : vector<1x128xi1> to vector<2x128xi1>
    %406 = arith.select %405, %403, %399 : vector<2x128xi1>, vector<2x128xf32>
    %407 = vector.extract_strided_slice %406 {offsets = [0, 0], sizes = [2, 32], strides = [1, 1]} : vector<2x128xf32> to vector<2x32xf32>
    %408 = vector.extract_strided_slice %406 {offsets = [0, 32], sizes = [2, 32], strides = [1, 1]} : vector<2x128xf32> to vector<2x32xf32>
    %409 = vector.extract_strided_slice %406 {offsets = [0, 64], sizes = [2, 32], strides = [1, 1]} : vector<2x128xf32> to vector<2x32xf32>
    %410 = vector.extract_strided_slice %406 {offsets = [0, 96], sizes = [2, 32], strides = [1, 1]} : vector<2x128xf32> to vector<2x32xf32>
    %411 = arith.mulf %408, %383 : vector<2x32xf32>
    %412 = arith.mulf %407, %409 : vector<2x32xf32>
    %413 = arith.addf %411, %412 : vector<2x32xf32>
    %414 = math.tanh %413 : vector<2x32xf32>
    %415 = arith.mulf %410, %414 : vector<2x32xf32>
    %c1_118 = arith.constant 1 : index
    %c3_119 = arith.constant 3 : index
    %c0_120 = arith.constant 0 : index
    %c0_121 = arith.constant 0 : index
    %416 = vector.load %arg24[%c1_118, %c3_119, %c0_120, %c0_121] : memref<2x8x2x32xf32, #tpu.memory_space<vmem>>, vector<1x1x2x32xf32>
    %417 = vector.shape_cast %416 : vector<1x1x2x32xf32> to vector<2x32xf32>
    %418 = vector.shape_cast %415 : vector<2x32xf32> to vector<1x1x2x32xf32>
    tpu.vector_store %arg24[%c1_118, %c3_119, %c0_120, %c0_121], %418 {strides = array<i32>} : memref<2x8x2x32xf32, #tpu.memory_space<vmem>>, vector<1x1x2x32xf32>,
    %419 = vector.extract_strided_slice %265 {offsets = [2, 0, 0], sizes = [1, 2, 128], strides = [1, 1, 1]} : vector<8x2x128xf32> to vector<1x2x128xf32>
    %420 = vector.shape_cast %419 : vector<1x2x128xf32> to vector<2x128xf32>
    %cst_122 = arith.constant dense<0.000000e+00> : vector<2x128xf32>
    %421 = tpu.matmul %415, %266, %cst_122 {dimension_numbers = #tpu.dot_dimension_numbers<[1], [0], [0], [1], [0, 0, 1, 1], [], []>} : vector<2x32xf32>, vector<32x128xf32>, vector<2x128xf32> -> vector<2x128xf32>
    %422 = arith.addf %420, %421 : vector<2x128xf32>
    %423 = vector.broadcast %8 : vector<1x128xf32> to vector<2x128xf32>
    %424 = arith.mulf %422, %423 : vector<2x128xf32>
    %425 = arith.negf %424 : vector<2x128xf32>
    %426 = math.exp %425 : vector<2x128xf32>
    %cst_123 = arith.constant 1.000000e+00 : f32
    %427 = vector.broadcast %cst_123 : f32 to vector<2x128xf32>
    %428 = arith.addf %427, %426 : vector<2x128xf32>
    %429 = arith.divf %427, %428 : vector<2x128xf32>
    %cst_124 = arith.constant 2.000000e+00 : f32
    %430 = vector.broadcast %cst_124 : f32 to vector<2x128xf32>
    %431 = arith.mulf %430, %429 : vector<2x128xf32>
    %cst_125 = arith.constant 1.000000e+00 : f32
    %432 = vector.broadcast %cst_125 : f32 to vector<2x128xf32>
    %433 = arith.subf %431, %432 : vector<2x128xf32>
    %434 = vector.shape_cast %5 : vector<1x128xi1> to vector<1x128xi1>
    %435 = vector.broadcast %434 : vector<1x128xi1> to vector<2x128xi1>
    %436 = arith.select %435, %433, %429 : vector<2x128xi1>, vector<2x128xf32>
    %437 = vector.extract_strided_slice %436 {offsets = [0, 0], sizes = [2, 32], strides = [1, 1]} : vector<2x128xf32> to vector<2x32xf32>
    %438 = vector.extract_strided_slice %436 {offsets = [0, 32], sizes = [2, 32], strides = [1, 1]} : vector<2x128xf32> to vector<2x32xf32>
    %439 = vector.extract_strided_slice %436 {offsets = [0, 64], sizes = [2, 32], strides = [1, 1]} : vector<2x128xf32> to vector<2x32xf32>
    %440 = vector.extract_strided_slice %436 {offsets = [0, 96], sizes = [2, 32], strides = [1, 1]} : vector<2x128xf32> to vector<2x32xf32>
    %441 = arith.mulf %438, %413 : vector<2x32xf32>
    %442 = arith.mulf %437, %439 : vector<2x32xf32>
    %443 = arith.addf %441, %442 : vector<2x32xf32>
    %444 = math.tanh %443 : vector<2x32xf32>
    %445 = arith.mulf %440, %444 : vector<2x32xf32>
    %c1_126 = arith.constant 1 : index
    %c2_127 = arith.constant 2 : index
    %c0_128 = arith.constant 0 : index
    %c0_129 = arith.constant 0 : index
    %446 = vector.load %arg24[%c1_126, %c2_127, %c0_128, %c0_129] : memref<2x8x2x32xf32, #tpu.memory_space<vmem>>, vector<1x1x2x32xf32>
    %447 = vector.shape_cast %446 : vector<1x1x2x32xf32> to vector<2x32xf32>
    %448 = vector.shape_cast %445 : vector<2x32xf32> to vector<1x1x2x32xf32>
    tpu.vector_store %arg24[%c1_126, %c2_127, %c0_128, %c0_129], %448 {strides = array<i32>} : memref<2x8x2x32xf32, #tpu.memory_space<vmem>>, vector<1x1x2x32xf32>,
    %449 = vector.extract_strided_slice %265 {offsets = [1, 0, 0], sizes = [1, 2, 128], strides = [1, 1, 1]} : vector<8x2x128xf32> to vector<1x2x128xf32>
    %450 = vector.shape_cast %449 : vector<1x2x128xf32> to vector<2x128xf32>
    %cst_130 = arith.constant dense<0.000000e+00> : vector<2x128xf32>
    %451 = tpu.matmul %445, %266, %cst_130 {dimension_numbers = #tpu.dot_dimension_numbers<[1], [0], [0], [1], [0, 0, 1, 1], [], []>} : vector<2x32xf32>, vector<32x128xf32>, vector<2x128xf32> -> vector<2x128xf32>
    %452 = arith.addf %450, %451 : vector<2x128xf32>
    %453 = vector.broadcast %8 : vector<1x128xf32> to vector<2x128xf32>
    %454 = arith.mulf %452, %453 : vector<2x128xf32>
    %455 = arith.negf %454 : vector<2x128xf32>
    %456 = math.exp %455 : vector<2x128xf32>
    %cst_131 = arith.constant 1.000000e+00 : f32
    %457 = vector.broadcast %cst_131 : f32 to vector<2x128xf32>
    %458 = arith.addf %457, %456 : vector<2x128xf32>
    %459 = arith.divf %457, %458 : vector<2x128xf32>
    %cst_132 = arith.constant 2.000000e+00 : f32
    %460 = vector.broadcast %cst_132 : f32 to vector<2x128xf32>
    %461 = arith.mulf %460, %459 : vector<2x128xf32>
    %cst_133 = arith.constant 1.000000e+00 : f32
    %462 = vector.broadcast %cst_133 : f32 to vector<2x128xf32>
    %463 = arith.subf %461, %462 : vector<2x128xf32>
    %464 = vector.shape_cast %5 : vector<1x128xi1> to vector<1x128xi1>
    %465 = vector.broadcast %464 : vector<1x128xi1> to vector<2x128xi1>
    %466 = arith.select %465, %463, %459 : vector<2x128xi1>, vector<2x128xf32>
    %467 = vector.extract_strided_slice %466 {offsets = [0, 0], sizes = [2, 32], strides = [1, 1]} : vector<2x128xf32> to vector<2x32xf32>
    %468 = vector.extract_strided_slice %466 {offsets = [0, 32], sizes = [2, 32], strides = [1, 1]} : vector<2x128xf32> to vector<2x32xf32>
    %469 = vector.extract_strided_slice %466 {offsets = [0, 64], sizes = [2, 32], strides = [1, 1]} : vector<2x128xf32> to vector<2x32xf32>
    %470 = vector.extract_strided_slice %466 {offsets = [0, 96], sizes = [2, 32], strides = [1, 1]} : vector<2x128xf32> to vector<2x32xf32>
    %471 = arith.mulf %468, %443 : vector<2x32xf32>
    %472 = arith.mulf %467, %469 : vector<2x32xf32>
    %473 = arith.addf %471, %472 : vector<2x32xf32>
    %474 = math.tanh %473 : vector<2x32xf32>
    %475 = arith.mulf %470, %474 : vector<2x32xf32>
    %c1_134 = arith.constant 1 : index
    %c1_135 = arith.constant 1 : index
    %c0_136 = arith.constant 0 : index
    %c0_137 = arith.constant 0 : index
    %476 = vector.load %arg24[%c1_134, %c1_135, %c0_136, %c0_137] : memref<2x8x2x32xf32, #tpu.memory_space<vmem>>, vector<1x1x2x32xf32>
    %477 = vector.shape_cast %476 : vector<1x1x2x32xf32> to vector<2x32xf32>
    %478 = vector.shape_cast %475 : vector<2x32xf32> to vector<1x1x2x32xf32>
    tpu.vector_store %arg24[%c1_134, %c1_135, %c0_136, %c0_137], %478 {strides = array<i32>} : memref<2x8x2x32xf32, #tpu.memory_space<vmem>>, vector<1x1x2x32xf32>,
    %479 = vector.extract_strided_slice %265 {offsets = [0, 0, 0], sizes = [1, 2, 128], strides = [1, 1, 1]} : vector<8x2x128xf32> to vector<1x2x128xf32>
    %480 = vector.shape_cast %479 : vector<1x2x128xf32> to vector<2x128xf32>
    %cst_138 = arith.constant dense<0.000000e+00> : vector<2x128xf32>
    %481 = tpu.matmul %475, %266, %cst_138 {dimension_numbers = #tpu.dot_dimension_numbers<[1], [0], [0], [1], [0, 0, 1, 1], [], []>} : vector<2x32xf32>, vector<32x128xf32>, vector<2x128xf32> -> vector<2x128xf32>
    %482 = arith.addf %480, %481 : vector<2x128xf32>
    %483 = vector.broadcast %8 : vector<1x128xf32> to vector<2x128xf32>
    %484 = arith.mulf %482, %483 : vector<2x128xf32>
    %485 = arith.negf %484 : vector<2x128xf32>
    %486 = math.exp %485 : vector<2x128xf32>
    %cst_139 = arith.constant 1.000000e+00 : f32
    %487 = vector.broadcast %cst_139 : f32 to vector<2x128xf32>
    %488 = arith.addf %487, %486 : vector<2x128xf32>
    %489 = arith.divf %487, %488 : vector<2x128xf32>
    %cst_140 = arith.constant 2.000000e+00 : f32
    %490 = vector.broadcast %cst_140 : f32 to vector<2x128xf32>
    %491 = arith.mulf %490, %489 : vector<2x128xf32>
    %cst_141 = arith.constant 1.000000e+00 : f32
    %492 = vector.broadcast %cst_141 : f32 to vector<2x128xf32>
    %493 = arith.subf %491, %492 : vector<2x128xf32>
    %494 = vector.shape_cast %5 : vector<1x128xi1> to vector<1x128xi1>
    %495 = vector.broadcast %494 : vector<1x128xi1> to vector<2x128xi1>
    %496 = arith.select %495, %493, %489 : vector<2x128xi1>, vector<2x128xf32>
    %497 = vector.extract_strided_slice %496 {offsets = [0, 0], sizes = [2, 32], strides = [1, 1]} : vector<2x128xf32> to vector<2x32xf32>
    %498 = vector.extract_strided_slice %496 {offsets = [0, 32], sizes = [2, 32], strides = [1, 1]} : vector<2x128xf32> to vector<2x32xf32>
    %499 = vector.extract_strided_slice %496 {offsets = [0, 64], sizes = [2, 32], strides = [1, 1]} : vector<2x128xf32> to vector<2x32xf32>
    %500 = vector.extract_strided_slice %496 {offsets = [0, 96], sizes = [2, 32], strides = [1, 1]} : vector<2x128xf32> to vector<2x32xf32>
    %501 = arith.mulf %498, %473 : vector<2x32xf32>
    %502 = arith.mulf %497, %499 : vector<2x32xf32>
    %503 = arith.addf %501, %502 : vector<2x32xf32>
    %504 = math.tanh %503 : vector<2x32xf32>
    %505 = arith.mulf %500, %504 : vector<2x32xf32>
    %c1_142 = arith.constant 1 : index
    %c0_143 = arith.constant 0 : index
    %c0_144 = arith.constant 0 : index
    %c0_145 = arith.constant 0 : index
    %506 = vector.load %arg24[%c1_142, %c0_143, %c0_144, %c0_145] : memref<2x8x2x32xf32, #tpu.memory_space<vmem>>, vector<1x1x2x32xf32>
    %507 = vector.shape_cast %506 : vector<1x1x2x32xf32> to vector<2x32xf32>
    %508 = vector.shape_cast %505 : vector<2x32xf32> to vector<1x1x2x32xf32>
    tpu.vector_store %arg24[%c1_142, %c0_143, %c0_144, %c0_145], %508 {strides = array<i32>} : memref<2x8x2x32xf32, #tpu.memory_space<vmem>>, vector<1x1x2x32xf32>,
    %c0_146 = arith.constant 0 : index
    %c0_147 = arith.constant 0 : index
    %c0_148 = arith.constant 0 : index
    %c0_149 = arith.constant 0 : index
    %509 = vector.load %arg24[%c0_146, %c0_147, %c0_148, %c0_149] : memref<2x8x2x32xf32, #tpu.memory_space<vmem>>, vector<1x8x2x32xf32>
    %510 = vector.shape_cast %509 : vector<1x8x2x32xf32> to vector<8x2x32xf32>
    %c1_150 = arith.constant 1 : index
    %c0_151 = arith.constant 0 : index
    %c0_152 = arith.constant 0 : index
    %c0_153 = arith.constant 0 : index
    %511 = vector.load %arg24[%c1_150, %c0_151, %c0_152, %c0_153] : memref<2x8x2x32xf32, #tpu.memory_space<vmem>>, vector<1x8x2x32xf32>
    %512 = vector.shape_cast %511 : vector<1x8x2x32xf32> to vector<8x2x32xf32>
    %513 = tpu.concatenate %510, %512 in 2 : vector<8x2x32xf32>, vector<8x2x32xf32> -> vector<8x2x64xf32>
    %514 = vector.shape_cast %513 : vector<8x2x64xf32> to vector<16x64xf32>
    %c0_154 = arith.constant 0 : index
    %c0_155 = arith.constant 0 : index
    %515 = vector.load %arg11[%c0_154, %c0_155] : memref<64x128xf32, #tpu.memory_space<vmem>>, vector<64x128xf32>
    %cst_156 = arith.constant dense<0.000000e+00> : vector<16x128xf32>
    %516 = tpu.matmul %514, %515, %cst_156 {dimension_numbers = #tpu.dot_dimension_numbers<[1], [0], [0], [1], [0, 0, 1, 1], [], []>} : vector<16x64xf32>, vector<64x128xf32>, vector<16x128xf32> -> vector<16x128xf32>
    %c0_157 = arith.constant 0 : index
    %c0_158 = arith.constant 0 : index
    %517 = vector.load %arg13[%c0_157, %c0_158] : memref<1x128xf32, #tpu.memory_space<vmem>>, vector<1x128xf32>
    %518 = vector.broadcast %517 : vector<1x128xf32> to vector<16x128xf32>
    %519 = arith.addf %516, %518 : vector<16x128xf32>
    %520 = vector.shape_cast %519 : vector<16x128xf32> to vector<8x2x128xf32>
    %c0_159 = arith.constant 0 : index
    %c0_160 = arith.constant 0 : index
    %521 = vector.load %arg12[%c0_159, %c0_160] : memref<32x128xf32, #tpu.memory_space<vmem>>, vector<32x128xf32>
    %c0_161 = arith.constant 0 : index
    %c0_162 = arith.constant 0 : index
    %522 = vector.load %arg14[%c0_161, %c0_162] : memref<2x32xf32, #tpu.memory_space<vmem>>, vector<2x32xf32>
    %c0_163 = arith.constant 0 : index
    %c0_164 = arith.constant 0 : index
    %523 = vector.load %arg15[%c0_163, %c0_164] : memref<2x32xf32, #tpu.memory_space<vmem>>, vector<2x32xf32>
    %524 = vector.extract_strided_slice %520 {offsets = [0, 0, 0], sizes = [1, 2, 128], strides = [1, 1, 1]} : vector<8x2x128xf32> to vector<1x2x128xf32>
    %525 = vector.shape_cast %524 : vector<1x2x128xf32> to vector<2x128xf32>
    %cst_165 = arith.constant dense<0.000000e+00> : vector<2x128xf32>
    %526 = tpu.matmul %522, %521, %cst_165 {dimension_numbers = #tpu.dot_dimension_numbers<[1], [0], [0], [1], [0, 0, 1, 1], [], []>} : vector<2x32xf32>, vector<32x128xf32>, vector<2x128xf32> -> vector<2x128xf32>
    %527 = arith.addf %525, %526 : vector<2x128xf32>
    %528 = vector.broadcast %8 : vector<1x128xf32> to vector<2x128xf32>
    %529 = arith.mulf %527, %528 : vector<2x128xf32>
    %530 = arith.negf %529 : vector<2x128xf32>
    %531 = math.exp %530 : vector<2x128xf32>
    %cst_166 = arith.constant 1.000000e+00 : f32
    %532 = vector.broadcast %cst_166 : f32 to vector<2x128xf32>
    %533 = arith.addf %532, %531 : vector<2x128xf32>
    %534 = arith.divf %532, %533 : vector<2x128xf32>
    %cst_167 = arith.constant 2.000000e+00 : f32
    %535 = vector.broadcast %cst_167 : f32 to vector<2x128xf32>
    %536 = arith.mulf %535, %534 : vector<2x128xf32>
    %cst_168 = arith.constant 1.000000e+00 : f32
    %537 = vector.broadcast %cst_168 : f32 to vector<2x128xf32>
    %538 = arith.subf %536, %537 : vector<2x128xf32>
    %539 = vector.shape_cast %5 : vector<1x128xi1> to vector<1x128xi1>
    %540 = vector.broadcast %539 : vector<1x128xi1> to vector<2x128xi1>
    %541 = arith.select %540, %538, %534 : vector<2x128xi1>, vector<2x128xf32>
    %542 = vector.extract_strided_slice %541 {offsets = [0, 0], sizes = [2, 32], strides = [1, 1]} : vector<2x128xf32> to vector<2x32xf32>
    %543 = vector.extract_strided_slice %541 {offsets = [0, 32], sizes = [2, 32], strides = [1, 1]} : vector<2x128xf32> to vector<2x32xf32>
    %544 = vector.extract_strided_slice %541 {offsets = [0, 64], sizes = [2, 32], strides = [1, 1]} : vector<2x128xf32> to vector<2x32xf32>
    %545 = vector.extract_strided_slice %541 {offsets = [0, 96], sizes = [2, 32], strides = [1, 1]} : vector<2x128xf32> to vector<2x32xf32>
    %546 = arith.mulf %543, %523 : vector<2x32xf32>
    %547 = arith.mulf %542, %544 : vector<2x32xf32>
    %548 = arith.addf %546, %547 : vector<2x32xf32>
    %549 = math.tanh %548 : vector<2x32xf32>
    %550 = arith.mulf %545, %549 : vector<2x32xf32>
    %c0_169 = arith.constant 0 : index
    %c0_170 = arith.constant 0 : index
    %c0_171 = arith.constant 0 : index
    %c0_172 = arith.constant 0 : index
    %551 = vector.load %arg24[%c0_169, %c0_170, %c0_171, %c0_172] : memref<2x8x2x32xf32, #tpu.memory_space<vmem>>, vector<1x1x2x32xf32>
    %552 = vector.shape_cast %551 : vector<1x1x2x32xf32> to vector<2x32xf32>
    %553 = vector.shape_cast %550 : vector<2x32xf32> to vector<1x1x2x32xf32>
    tpu.vector_store %arg24[%c0_169, %c0_170, %c0_171, %c0_172], %553 {strides = array<i32>} : memref<2x8x2x32xf32, #tpu.memory_space<vmem>>, vector<1x1x2x32xf32>,
    %554 = vector.extract_strided_slice %520 {offsets = [1, 0, 0], sizes = [1, 2, 128], strides = [1, 1, 1]} : vector<8x2x128xf32> to vector<1x2x128xf32>
    %555 = vector.shape_cast %554 : vector<1x2x128xf32> to vector<2x128xf32>
    %cst_173 = arith.constant dense<0.000000e+00> : vector<2x128xf32>
    %556 = tpu.matmul %550, %521, %cst_173 {dimension_numbers = #tpu.dot_dimension_numbers<[1], [0], [0], [1], [0, 0, 1, 1], [], []>} : vector<2x32xf32>, vector<32x128xf32>, vector<2x128xf32> -> vector<2x128xf32>
    %557 = arith.addf %555, %556 : vector<2x128xf32>
    %558 = vector.broadcast %8 : vector<1x128xf32> to vector<2x128xf32>
    %559 = arith.mulf %557, %558 : vector<2x128xf32>
    %560 = arith.negf %559 : vector<2x128xf32>
    %561 = math.exp %560 : vector<2x128xf32>
    %cst_174 = arith.constant 1.000000e+00 : f32
    %562 = vector.broadcast %cst_174 : f32 to vector<2x128xf32>
    %563 = arith.addf %562, %561 : vector<2x128xf32>
    %564 = arith.divf %562, %563 : vector<2x128xf32>
    %cst_175 = arith.constant 2.000000e+00 : f32
    %565 = vector.broadcast %cst_175 : f32 to vector<2x128xf32>
    %566 = arith.mulf %565, %564 : vector<2x128xf32>
    %cst_176 = arith.constant 1.000000e+00 : f32
    %567 = vector.broadcast %cst_176 : f32 to vector<2x128xf32>
    %568 = arith.subf %566, %567 : vector<2x128xf32>
    %569 = vector.shape_cast %5 : vector<1x128xi1> to vector<1x128xi1>
    %570 = vector.broadcast %569 : vector<1x128xi1> to vector<2x128xi1>
    %571 = arith.select %570, %568, %564 : vector<2x128xi1>, vector<2x128xf32>
    %572 = vector.extract_strided_slice %571 {offsets = [0, 0], sizes = [2, 32], strides = [1, 1]} : vector<2x128xf32> to vector<2x32xf32>
    %573 = vector.extract_strided_slice %571 {offsets = [0, 32], sizes = [2, 32], strides = [1, 1]} : vector<2x128xf32> to vector<2x32xf32>
    %574 = vector.extract_strided_slice %571 {offsets = [0, 64], sizes = [2, 32], strides = [1, 1]} : vector<2x128xf32> to vector<2x32xf32>
    %575 = vector.extract_strided_slice %571 {offsets = [0, 96], sizes = [2, 32], strides = [1, 1]} : vector<2x128xf32> to vector<2x32xf32>
    %576 = arith.mulf %573, %548 : vector<2x32xf32>
    %577 = arith.mulf %572, %574 : vector<2x32xf32>
    %578 = arith.addf %576, %577 : vector<2x32xf32>
    %579 = math.tanh %578 : vector<2x32xf32>
    %580 = arith.mulf %575, %579 : vector<2x32xf32>
    %c0_177 = arith.constant 0 : index
    %c1_178 = arith.constant 1 : index
    %c0_179 = arith.constant 0 : index
    %c0_180 = arith.constant 0 : index
    %581 = vector.load %arg24[%c0_177, %c1_178, %c0_179, %c0_180] : memref<2x8x2x32xf32, #tpu.memory_space<vmem>>, vector<1x1x2x32xf32>
    %582 = vector.shape_cast %581 : vector<1x1x2x32xf32> to vector<2x32xf32>
    %583 = vector.shape_cast %580 : vector<2x32xf32> to vector<1x1x2x32xf32>
    tpu.vector_store %arg24[%c0_177, %c1_178, %c0_179, %c0_180], %583 {strides = array<i32>} : memref<2x8x2x32xf32, #tpu.memory_space<vmem>>, vector<1x1x2x32xf32>,
    %584 = vector.extract_strided_slice %520 {offsets = [2, 0, 0], sizes = [1, 2, 128], strides = [1, 1, 1]} : vector<8x2x128xf32> to vector<1x2x128xf32>
    %585 = vector.shape_cast %584 : vector<1x2x128xf32> to vector<2x128xf32>
    %cst_181 = arith.constant dense<0.000000e+00> : vector<2x128xf32>
    %586 = tpu.matmul %580, %521, %cst_181 {dimension_numbers = #tpu.dot_dimension_numbers<[1], [0], [0], [1], [0, 0, 1, 1], [], []>} : vector<2x32xf32>, vector<32x128xf32>, vector<2x128xf32> -> vector<2x128xf32>
    %587 = arith.addf %585, %586 : vector<2x128xf32>
    %588 = vector.broadcast %8 : vector<1x128xf32> to vector<2x128xf32>
    %589 = arith.mulf %587, %588 : vector<2x128xf32>
    %590 = arith.negf %589 : vector<2x128xf32>
    %591 = math.exp %590 : vector<2x128xf32>
    %cst_182 = arith.constant 1.000000e+00 : f32
    %592 = vector.broadcast %cst_182 : f32 to vector<2x128xf32>
    %593 = arith.addf %592, %591 : vector<2x128xf32>
    %594 = arith.divf %592, %593 : vector<2x128xf32>
    %cst_183 = arith.constant 2.000000e+00 : f32
    %595 = vector.broadcast %cst_183 : f32 to vector<2x128xf32>
    %596 = arith.mulf %595, %594 : vector<2x128xf32>
    %cst_184 = arith.constant 1.000000e+00 : f32
    %597 = vector.broadcast %cst_184 : f32 to vector<2x128xf32>
    %598 = arith.subf %596, %597 : vector<2x128xf32>
    %599 = vector.shape_cast %5 : vector<1x128xi1> to vector<1x128xi1>
    %600 = vector.broadcast %599 : vector<1x128xi1> to vector<2x128xi1>
    %601 = arith.select %600, %598, %594 : vector<2x128xi1>, vector<2x128xf32>
    %602 = vector.extract_strided_slice %601 {offsets = [0, 0], sizes = [2, 32], strides = [1, 1]} : vector<2x128xf32> to vector<2x32xf32>
    %603 = vector.extract_strided_slice %601 {offsets = [0, 32], sizes = [2, 32], strides = [1, 1]} : vector<2x128xf32> to vector<2x32xf32>
    %604 = vector.extract_strided_slice %601 {offsets = [0, 64], sizes = [2, 32], strides = [1, 1]} : vector<2x128xf32> to vector<2x32xf32>
    %605 = vector.extract_strided_slice %601 {offsets = [0, 96], sizes = [2, 32], strides = [1, 1]} : vector<2x128xf32> to vector<2x32xf32>
    %606 = arith.mulf %603, %578 : vector<2x32xf32>
    %607 = arith.mulf %602, %604 : vector<2x32xf32>
    %608 = arith.addf %606, %607 : vector<2x32xf32>
    %609 = math.tanh %608 : vector<2x32xf32>
    %610 = arith.mulf %605, %609 : vector<2x32xf32>
    %c0_185 = arith.constant 0 : index
    %c2_186 = arith.constant 2 : index
    %c0_187 = arith.constant 0 : index
    %c0_188 = arith.constant 0 : index
    %611 = vector.load %arg24[%c0_185, %c2_186, %c0_187, %c0_188] : memref<2x8x2x32xf32, #tpu.memory_space<vmem>>, vector<1x1x2x32xf32>
    %612 = vector.shape_cast %611 : vector<1x1x2x32xf32> to vector<2x32xf32>
    %613 = vector.shape_cast %610 : vector<2x32xf32> to vector<1x1x2x32xf32>
    tpu.vector_store %arg24[%c0_185, %c2_186, %c0_187, %c0_188], %613 {strides = array<i32>} : memref<2x8x2x32xf32, #tpu.memory_space<vmem>>, vector<1x1x2x32xf32>,
    %614 = vector.extract_strided_slice %520 {offsets = [3, 0, 0], sizes = [1, 2, 128], strides = [1, 1, 1]} : vector<8x2x128xf32> to vector<1x2x128xf32>
    %615 = vector.shape_cast %614 : vector<1x2x128xf32> to vector<2x128xf32>
    %cst_189 = arith.constant dense<0.000000e+00> : vector<2x128xf32>
    %616 = tpu.matmul %610, %521, %cst_189 {dimension_numbers = #tpu.dot_dimension_numbers<[1], [0], [0], [1], [0, 0, 1, 1], [], []>} : vector<2x32xf32>, vector<32x128xf32>, vector<2x128xf32> -> vector<2x128xf32>
    %617 = arith.addf %615, %616 : vector<2x128xf32>
    %618 = vector.broadcast %8 : vector<1x128xf32> to vector<2x128xf32>
    %619 = arith.mulf %617, %618 : vector<2x128xf32>
    %620 = arith.negf %619 : vector<2x128xf32>
    %621 = math.exp %620 : vector<2x128xf32>
    %cst_190 = arith.constant 1.000000e+00 : f32
    %622 = vector.broadcast %cst_190 : f32 to vector<2x128xf32>
    %623 = arith.addf %622, %621 : vector<2x128xf32>
    %624 = arith.divf %622, %623 : vector<2x128xf32>
    %cst_191 = arith.constant 2.000000e+00 : f32
    %625 = vector.broadcast %cst_191 : f32 to vector<2x128xf32>
    %626 = arith.mulf %625, %624 : vector<2x128xf32>
    %cst_192 = arith.constant 1.000000e+00 : f32
    %627 = vector.broadcast %cst_192 : f32 to vector<2x128xf32>
    %628 = arith.subf %626, %627 : vector<2x128xf32>
    %629 = vector.shape_cast %5 : vector<1x128xi1> to vector<1x128xi1>
    %630 = vector.broadcast %629 : vector<1x128xi1> to vector<2x128xi1>
    %631 = arith.select %630, %628, %624 : vector<2x128xi1>, vector<2x128xf32>
    %632 = vector.extract_strided_slice %631 {offsets = [0, 0], sizes = [2, 32], strides = [1, 1]} : vector<2x128xf32> to vector<2x32xf32>
    %633 = vector.extract_strided_slice %631 {offsets = [0, 32], sizes = [2, 32], strides = [1, 1]} : vector<2x128xf32> to vector<2x32xf32>
    %634 = vector.extract_strided_slice %631 {offsets = [0, 64], sizes = [2, 32], strides = [1, 1]} : vector<2x128xf32> to vector<2x32xf32>
    %635 = vector.extract_strided_slice %631 {offsets = [0, 96], sizes = [2, 32], strides = [1, 1]} : vector<2x128xf32> to vector<2x32xf32>
    %636 = arith.mulf %633, %608 : vector<2x32xf32>
    %637 = arith.mulf %632, %634 : vector<2x32xf32>
    %638 = arith.addf %636, %637 : vector<2x32xf32>
    %639 = math.tanh %638 : vector<2x32xf32>
    %640 = arith.mulf %635, %639 : vector<2x32xf32>
    %c0_193 = arith.constant 0 : index
    %c3_194 = arith.constant 3 : index
    %c0_195 = arith.constant 0 : index
    %c0_196 = arith.constant 0 : index
    %641 = vector.load %arg24[%c0_193, %c3_194, %c0_195, %c0_196] : memref<2x8x2x32xf32, #tpu.memory_space<vmem>>, vector<1x1x2x32xf32>
    %642 = vector.shape_cast %641 : vector<1x1x2x32xf32> to vector<2x32xf32>
    %643 = vector.shape_cast %640 : vector<2x32xf32> to vector<1x1x2x32xf32>
    tpu.vector_store %arg24[%c0_193, %c3_194, %c0_195, %c0_196], %643 {strides = array<i32>} : memref<2x8x2x32xf32, #tpu.memory_space<vmem>>, vector<1x1x2x32xf32>,
    %644 = vector.extract_strided_slice %520 {offsets = [4, 0, 0], sizes = [1, 2, 128], strides = [1, 1, 1]} : vector<8x2x128xf32> to vector<1x2x128xf32>
    %645 = vector.shape_cast %644 : vector<1x2x128xf32> to vector<2x128xf32>
    %cst_197 = arith.constant dense<0.000000e+00> : vector<2x128xf32>
    %646 = tpu.matmul %640, %521, %cst_197 {dimension_numbers = #tpu.dot_dimension_numbers<[1], [0], [0], [1], [0, 0, 1, 1], [], []>} : vector<2x32xf32>, vector<32x128xf32>, vector<2x128xf32> -> vector<2x128xf32>
    %647 = arith.addf %645, %646 : vector<2x128xf32>
    %648 = vector.broadcast %8 : vector<1x128xf32> to vector<2x128xf32>
    %649 = arith.mulf %647, %648 : vector<2x128xf32>
    %650 = arith.negf %649 : vector<2x128xf32>
    %651 = math.exp %650 : vector<2x128xf32>
    %cst_198 = arith.constant 1.000000e+00 : f32
    %652 = vector.broadcast %cst_198 : f32 to vector<2x128xf32>
    %653 = arith.addf %652, %651 : vector<2x128xf32>
    %654 = arith.divf %652, %653 : vector<2x128xf32>
    %cst_199 = arith.constant 2.000000e+00 : f32
    %655 = vector.broadcast %cst_199 : f32 to vector<2x128xf32>
    %656 = arith.mulf %655, %654 : vector<2x128xf32>
    %cst_200 = arith.constant 1.000000e+00 : f32
    %657 = vector.broadcast %cst_200 : f32 to vector<2x128xf32>
    %658 = arith.subf %656, %657 : vector<2x128xf32>
    %659 = vector.shape_cast %5 : vector<1x128xi1> to vector<1x128xi1>
    %660 = vector.broadcast %659 : vector<1x128xi1> to vector<2x128xi1>
    %661 = arith.select %660, %658, %654 : vector<2x128xi1>, vector<2x128xf32>
    %662 = vector.extract_strided_slice %661 {offsets = [0, 0], sizes = [2, 32], strides = [1, 1]} : vector<2x128xf32> to vector<2x32xf32>
    %663 = vector.extract_strided_slice %661 {offsets = [0, 32], sizes = [2, 32], strides = [1, 1]} : vector<2x128xf32> to vector<2x32xf32>
    %664 = vector.extract_strided_slice %661 {offsets = [0, 64], sizes = [2, 32], strides = [1, 1]} : vector<2x128xf32> to vector<2x32xf32>
    %665 = vector.extract_strided_slice %661 {offsets = [0, 96], sizes = [2, 32], strides = [1, 1]} : vector<2x128xf32> to vector<2x32xf32>
    %666 = arith.mulf %663, %638 : vector<2x32xf32>
    %667 = arith.mulf %662, %664 : vector<2x32xf32>
    %668 = arith.addf %666, %667 : vector<2x32xf32>
    %669 = math.tanh %668 : vector<2x32xf32>
    %670 = arith.mulf %665, %669 : vector<2x32xf32>
    %c0_201 = arith.constant 0 : index
    %c4_202 = arith.constant 4 : index
    %c0_203 = arith.constant 0 : index
    %c0_204 = arith.constant 0 : index
    %671 = vector.load %arg24[%c0_201, %c4_202, %c0_203, %c0_204] : memref<2x8x2x32xf32, #tpu.memory_space<vmem>>, vector<1x1x2x32xf32>
    %672 = vector.shape_cast %671 : vector<1x1x2x32xf32> to vector<2x32xf32>
    %673 = vector.shape_cast %670 : vector<2x32xf32> to vector<1x1x2x32xf32>
    tpu.vector_store %arg24[%c0_201, %c4_202, %c0_203, %c0_204], %673 {strides = array<i32>} : memref<2x8x2x32xf32, #tpu.memory_space<vmem>>, vector<1x1x2x32xf32>,
    %674 = vector.extract_strided_slice %520 {offsets = [5, 0, 0], sizes = [1, 2, 128], strides = [1, 1, 1]} : vector<8x2x128xf32> to vector<1x2x128xf32>
    %675 = vector.shape_cast %674 : vector<1x2x128xf32> to vector<2x128xf32>
    %cst_205 = arith.constant dense<0.000000e+00> : vector<2x128xf32>
    %676 = tpu.matmul %670, %521, %cst_205 {dimension_numbers = #tpu.dot_dimension_numbers<[1], [0], [0], [1], [0, 0, 1, 1], [], []>} : vector<2x32xf32>, vector<32x128xf32>, vector<2x128xf32> -> vector<2x128xf32>
    %677 = arith.addf %675, %676 : vector<2x128xf32>
    %678 = vector.broadcast %8 : vector<1x128xf32> to vector<2x128xf32>
    %679 = arith.mulf %677, %678 : vector<2x128xf32>
    %680 = arith.negf %679 : vector<2x128xf32>
    %681 = math.exp %680 : vector<2x128xf32>
    %cst_206 = arith.constant 1.000000e+00 : f32
    %682 = vector.broadcast %cst_206 : f32 to vector<2x128xf32>
    %683 = arith.addf %682, %681 : vector<2x128xf32>
    %684 = arith.divf %682, %683 : vector<2x128xf32>
    %cst_207 = arith.constant 2.000000e+00 : f32
    %685 = vector.broadcast %cst_207 : f32 to vector<2x128xf32>
    %686 = arith.mulf %685, %684 : vector<2x128xf32>
    %cst_208 = arith.constant 1.000000e+00 : f32
    %687 = vector.broadcast %cst_208 : f32 to vector<2x128xf32>
    %688 = arith.subf %686, %687 : vector<2x128xf32>
    %689 = vector.shape_cast %5 : vector<1x128xi1> to vector<1x128xi1>
    %690 = vector.broadcast %689 : vector<1x128xi1> to vector<2x128xi1>
    %691 = arith.select %690, %688, %684 : vector<2x128xi1>, vector<2x128xf32>
    %692 = vector.extract_strided_slice %691 {offsets = [0, 0], sizes = [2, 32], strides = [1, 1]} : vector<2x128xf32> to vector<2x32xf32>
    %693 = vector.extract_strided_slice %691 {offsets = [0, 32], sizes = [2, 32], strides = [1, 1]} : vector<2x128xf32> to vector<2x32xf32>
    %694 = vector.extract_strided_slice %691 {offsets = [0, 64], sizes = [2, 32], strides = [1, 1]} : vector<2x128xf32> to vector<2x32xf32>
    %695 = vector.extract_strided_slice %691 {offsets = [0, 96], sizes = [2, 32], strides = [1, 1]} : vector<2x128xf32> to vector<2x32xf32>
    %696 = arith.mulf %693, %668 : vector<2x32xf32>
    %697 = arith.mulf %692, %694 : vector<2x32xf32>
    %698 = arith.addf %696, %697 : vector<2x32xf32>
    %699 = math.tanh %698 : vector<2x32xf32>
    %700 = arith.mulf %695, %699 : vector<2x32xf32>
    %c0_209 = arith.constant 0 : index
    %c5_210 = arith.constant 5 : index
    %c0_211 = arith.constant 0 : index
    %c0_212 = arith.constant 0 : index
    %701 = vector.load %arg24[%c0_209, %c5_210, %c0_211, %c0_212] : memref<2x8x2x32xf32, #tpu.memory_space<vmem>>, vector<1x1x2x32xf32>
    %702 = vector.shape_cast %701 : vector<1x1x2x32xf32> to vector<2x32xf32>
    %703 = vector.shape_cast %700 : vector<2x32xf32> to vector<1x1x2x32xf32>
    tpu.vector_store %arg24[%c0_209, %c5_210, %c0_211, %c0_212], %703 {strides = array<i32>} : memref<2x8x2x32xf32, #tpu.memory_space<vmem>>, vector<1x1x2x32xf32>,
    %704 = vector.extract_strided_slice %520 {offsets = [6, 0, 0], sizes = [1, 2, 128], strides = [1, 1, 1]} : vector<8x2x128xf32> to vector<1x2x128xf32>
    %705 = vector.shape_cast %704 : vector<1x2x128xf32> to vector<2x128xf32>
    %cst_213 = arith.constant dense<0.000000e+00> : vector<2x128xf32>
    %706 = tpu.matmul %700, %521, %cst_213 {dimension_numbers = #tpu.dot_dimension_numbers<[1], [0], [0], [1], [0, 0, 1, 1], [], []>} : vector<2x32xf32>, vector<32x128xf32>, vector<2x128xf32> -> vector<2x128xf32>
    %707 = arith.addf %705, %706 : vector<2x128xf32>
    %708 = vector.broadcast %8 : vector<1x128xf32> to vector<2x128xf32>
    %709 = arith.mulf %707, %708 : vector<2x128xf32>
    %710 = arith.negf %709 : vector<2x128xf32>
    %711 = math.exp %710 : vector<2x128xf32>
    %cst_214 = arith.constant 1.000000e+00 : f32
    %712 = vector.broadcast %cst_214 : f32 to vector<2x128xf32>
    %713 = arith.addf %712, %711 : vector<2x128xf32>
    %714 = arith.divf %712, %713 : vector<2x128xf32>
    %cst_215 = arith.constant 2.000000e+00 : f32
    %715 = vector.broadcast %cst_215 : f32 to vector<2x128xf32>
    %716 = arith.mulf %715, %714 : vector<2x128xf32>
    %cst_216 = arith.constant 1.000000e+00 : f32
    %717 = vector.broadcast %cst_216 : f32 to vector<2x128xf32>
    %718 = arith.subf %716, %717 : vector<2x128xf32>
    %719 = vector.shape_cast %5 : vector<1x128xi1> to vector<1x128xi1>
    %720 = vector.broadcast %719 : vector<1x128xi1> to vector<2x128xi1>
    %721 = arith.select %720, %718, %714 : vector<2x128xi1>, vector<2x128xf32>
    %722 = vector.extract_strided_slice %721 {offsets = [0, 0], sizes = [2, 32], strides = [1, 1]} : vector<2x128xf32> to vector<2x32xf32>
    %723 = vector.extract_strided_slice %721 {offsets = [0, 32], sizes = [2, 32], strides = [1, 1]} : vector<2x128xf32> to vector<2x32xf32>
    %724 = vector.extract_strided_slice %721 {offsets = [0, 64], sizes = [2, 32], strides = [1, 1]} : vector<2x128xf32> to vector<2x32xf32>
    %725 = vector.extract_strided_slice %721 {offsets = [0, 96], sizes = [2, 32], strides = [1, 1]} : vector<2x128xf32> to vector<2x32xf32>
    %726 = arith.mulf %723, %698 : vector<2x32xf32>
    %727 = arith.mulf %722, %724 : vector<2x32xf32>
    %728 = arith.addf %726, %727 : vector<2x32xf32>
    %729 = math.tanh %728 : vector<2x32xf32>
    %730 = arith.mulf %725, %729 : vector<2x32xf32>
    %c0_217 = arith.constant 0 : index
    %c6_218 = arith.constant 6 : index
    %c0_219 = arith.constant 0 : index
    %c0_220 = arith.constant 0 : index
    %731 = vector.load %arg24[%c0_217, %c6_218, %c0_219, %c0_220] : memref<2x8x2x32xf32, #tpu.memory_space<vmem>>, vector<1x1x2x32xf32>
    %732 = vector.shape_cast %731 : vector<1x1x2x32xf32> to vector<2x32xf32>
    %733 = vector.shape_cast %730 : vector<2x32xf32> to vector<1x1x2x32xf32>
    tpu.vector_store %arg24[%c0_217, %c6_218, %c0_219, %c0_220], %733 {strides = array<i32>} : memref<2x8x2x32xf32, #tpu.memory_space<vmem>>, vector<1x1x2x32xf32>,
    %734 = vector.extract_strided_slice %520 {offsets = [7, 0, 0], sizes = [1, 2, 128], strides = [1, 1, 1]} : vector<8x2x128xf32> to vector<1x2x128xf32>
    %735 = vector.shape_cast %734 : vector<1x2x128xf32> to vector<2x128xf32>
    %cst_221 = arith.constant dense<0.000000e+00> : vector<2x128xf32>
    %736 = tpu.matmul %730, %521, %cst_221 {dimension_numbers = #tpu.dot_dimension_numbers<[1], [0], [0], [1], [0, 0, 1, 1], [], []>} : vector<2x32xf32>, vector<32x128xf32>, vector<2x128xf32> -> vector<2x128xf32>
    %737 = arith.addf %735, %736 : vector<2x128xf32>
    %738 = vector.broadcast %8 : vector<1x128xf32> to vector<2x128xf32>
    %739 = arith.mulf %737, %738 : vector<2x128xf32>
    %740 = arith.negf %739 : vector<2x128xf32>
    %741 = math.exp %740 : vector<2x128xf32>
    %cst_222 = arith.constant 1.000000e+00 : f32
    %742 = vector.broadcast %cst_222 : f32 to vector<2x128xf32>
    %743 = arith.addf %742, %741 : vector<2x128xf32>
    %744 = arith.divf %742, %743 : vector<2x128xf32>
    %cst_223 = arith.constant 2.000000e+00 : f32
    %745 = vector.broadcast %cst_223 : f32 to vector<2x128xf32>
    %746 = arith.mulf %745, %744 : vector<2x128xf32>
    %cst_224 = arith.constant 1.000000e+00 : f32
    %747 = vector.broadcast %cst_224 : f32 to vector<2x128xf32>
    %748 = arith.subf %746, %747 : vector<2x128xf32>
    %749 = vector.shape_cast %5 : vector<1x128xi1> to vector<1x128xi1>
    %750 = vector.broadcast %749 : vector<1x128xi1> to vector<2x128xi1>
    %751 = arith.select %750, %748, %744 : vector<2x128xi1>, vector<2x128xf32>
    %752 = vector.extract_strided_slice %751 {offsets = [0, 0], sizes = [2, 32], strides = [1, 1]} : vector<2x128xf32> to vector<2x32xf32>
    %753 = vector.extract_strided_slice %751 {offsets = [0, 32], sizes = [2, 32], strides = [1, 1]} : vector<2x128xf32> to vector<2x32xf32>
    %754 = vector.extract_strided_slice %751 {offsets = [0, 64], sizes = [2, 32], strides = [1, 1]} : vector<2x128xf32> to vector<2x32xf32>
    %755 = vector.extract_strided_slice %751 {offsets = [0, 96], sizes = [2, 32], strides = [1, 1]} : vector<2x128xf32> to vector<2x32xf32>
    %756 = arith.mulf %753, %728 : vector<2x32xf32>
    %757 = arith.mulf %752, %754 : vector<2x32xf32>
    %758 = arith.addf %756, %757 : vector<2x32xf32>
    %759 = math.tanh %758 : vector<2x32xf32>
    %760 = arith.mulf %755, %759 : vector<2x32xf32>
    %c0_225 = arith.constant 0 : index
    %c7_226 = arith.constant 7 : index
    %c0_227 = arith.constant 0 : index
    %c0_228 = arith.constant 0 : index
    %761 = vector.load %arg24[%c0_225, %c7_226, %c0_227, %c0_228] : memref<2x8x2x32xf32, #tpu.memory_space<vmem>>, vector<1x1x2x32xf32>
    %762 = vector.shape_cast %761 : vector<1x1x2x32xf32> to vector<2x32xf32>
    %763 = vector.shape_cast %760 : vector<2x32xf32> to vector<1x1x2x32xf32>
    tpu.vector_store %arg24[%c0_225, %c7_226, %c0_227, %c0_228], %763 {strides = array<i32>} : memref<2x8x2x32xf32, #tpu.memory_space<vmem>>, vector<1x1x2x32xf32>,
    %c0_229 = arith.constant 0 : index
    %c0_230 = arith.constant 0 : index
    %764 = vector.load %arg16[%c0_229, %c0_230] : memref<64x128xf32, #tpu.memory_space<vmem>>, vector<64x128xf32>
    %cst_231 = arith.constant dense<0.000000e+00> : vector<16x128xf32>
    %765 = tpu.matmul %514, %764, %cst_231 {dimension_numbers = #tpu.dot_dimension_numbers<[1], [0], [0], [1], [0, 0, 1, 1], [], []>} : vector<16x64xf32>, vector<64x128xf32>, vector<16x128xf32> -> vector<16x128xf32>
    %c0_232 = arith.constant 0 : index
    %c0_233 = arith.constant 0 : index
    %766 = vector.load %arg18[%c0_232, %c0_233] : memref<1x128xf32, #tpu.memory_space<vmem>>, vector<1x128xf32>
    %767 = vector.broadcast %766 : vector<1x128xf32> to vector<16x128xf32>
    %768 = arith.addf %765, %767 : vector<16x128xf32>
    %769 = vector.shape_cast %768 : vector<16x128xf32> to vector<8x2x128xf32>
    %c0_234 = arith.constant 0 : index
    %c0_235 = arith.constant 0 : index
    %770 = vector.load %arg17[%c0_234, %c0_235] : memref<32x128xf32, #tpu.memory_space<vmem>>, vector<32x128xf32>
    %c0_236 = arith.constant 0 : index
    %c0_237 = arith.constant 0 : index
    %771 = vector.load %arg19[%c0_236, %c0_237] : memref<2x32xf32, #tpu.memory_space<vmem>>, vector<2x32xf32>
    %c0_238 = arith.constant 0 : index
    %c0_239 = arith.constant 0 : index
    %772 = vector.load %arg20[%c0_238, %c0_239] : memref<2x32xf32, #tpu.memory_space<vmem>>, vector<2x32xf32>
    %773 = vector.extract_strided_slice %769 {offsets = [7, 0, 0], sizes = [1, 2, 128], strides = [1, 1, 1]} : vector<8x2x128xf32> to vector<1x2x128xf32>
    %774 = vector.shape_cast %773 : vector<1x2x128xf32> to vector<2x128xf32>
    %cst_240 = arith.constant dense<0.000000e+00> : vector<2x128xf32>
    %775 = tpu.matmul %771, %770, %cst_240 {dimension_numbers = #tpu.dot_dimension_numbers<[1], [0], [0], [1], [0, 0, 1, 1], [], []>} : vector<2x32xf32>, vector<32x128xf32>, vector<2x128xf32> -> vector<2x128xf32>
    %776 = arith.addf %774, %775 : vector<2x128xf32>
    %777 = vector.broadcast %8 : vector<1x128xf32> to vector<2x128xf32>
    %778 = arith.mulf %776, %777 : vector<2x128xf32>
    %779 = arith.negf %778 : vector<2x128xf32>
    %780 = math.exp %779 : vector<2x128xf32>
    %cst_241 = arith.constant 1.000000e+00 : f32
    %781 = vector.broadcast %cst_241 : f32 to vector<2x128xf32>
    %782 = arith.addf %781, %780 : vector<2x128xf32>
    %783 = arith.divf %781, %782 : vector<2x128xf32>
    %cst_242 = arith.constant 2.000000e+00 : f32
    %784 = vector.broadcast %cst_242 : f32 to vector<2x128xf32>
    %785 = arith.mulf %784, %783 : vector<2x128xf32>
    %cst_243 = arith.constant 1.000000e+00 : f32
    %786 = vector.broadcast %cst_243 : f32 to vector<2x128xf32>
    %787 = arith.subf %785, %786 : vector<2x128xf32>
    %788 = vector.shape_cast %5 : vector<1x128xi1> to vector<1x128xi1>
    %789 = vector.broadcast %788 : vector<1x128xi1> to vector<2x128xi1>
    %790 = arith.select %789, %787, %783 : vector<2x128xi1>, vector<2x128xf32>
    %791 = vector.extract_strided_slice %790 {offsets = [0, 0], sizes = [2, 32], strides = [1, 1]} : vector<2x128xf32> to vector<2x32xf32>
    %792 = vector.extract_strided_slice %790 {offsets = [0, 32], sizes = [2, 32], strides = [1, 1]} : vector<2x128xf32> to vector<2x32xf32>
    %793 = vector.extract_strided_slice %790 {offsets = [0, 64], sizes = [2, 32], strides = [1, 1]} : vector<2x128xf32> to vector<2x32xf32>
    %794 = vector.extract_strided_slice %790 {offsets = [0, 96], sizes = [2, 32], strides = [1, 1]} : vector<2x128xf32> to vector<2x32xf32>
    %795 = arith.mulf %792, %772 : vector<2x32xf32>
    %796 = arith.mulf %791, %793 : vector<2x32xf32>
    %797 = arith.addf %795, %796 : vector<2x32xf32>
    %798 = math.tanh %797 : vector<2x32xf32>
    %799 = arith.mulf %794, %798 : vector<2x32xf32>
    %c1_244 = arith.constant 1 : index
    %c7_245 = arith.constant 7 : index
    %c0_246 = arith.constant 0 : index
    %c0_247 = arith.constant 0 : index
    %800 = vector.load %arg24[%c1_244, %c7_245, %c0_246, %c0_247] : memref<2x8x2x32xf32, #tpu.memory_space<vmem>>, vector<1x1x2x32xf32>
    %801 = vector.shape_cast %800 : vector<1x1x2x32xf32> to vector<2x32xf32>
    %802 = vector.shape_cast %799 : vector<2x32xf32> to vector<1x1x2x32xf32>
    tpu.vector_store %arg24[%c1_244, %c7_245, %c0_246, %c0_247], %802 {strides = array<i32>} : memref<2x8x2x32xf32, #tpu.memory_space<vmem>>, vector<1x1x2x32xf32>,
    %803 = vector.extract_strided_slice %769 {offsets = [6, 0, 0], sizes = [1, 2, 128], strides = [1, 1, 1]} : vector<8x2x128xf32> to vector<1x2x128xf32>
    %804 = vector.shape_cast %803 : vector<1x2x128xf32> to vector<2x128xf32>
    %cst_248 = arith.constant dense<0.000000e+00> : vector<2x128xf32>
    %805 = tpu.matmul %799, %770, %cst_248 {dimension_numbers = #tpu.dot_dimension_numbers<[1], [0], [0], [1], [0, 0, 1, 1], [], []>} : vector<2x32xf32>, vector<32x128xf32>, vector<2x128xf32> -> vector<2x128xf32>
    %806 = arith.addf %804, %805 : vector<2x128xf32>
    %807 = vector.broadcast %8 : vector<1x128xf32> to vector<2x128xf32>
    %808 = arith.mulf %806, %807 : vector<2x128xf32>
    %809 = arith.negf %808 : vector<2x128xf32>
    %810 = math.exp %809 : vector<2x128xf32>
    %cst_249 = arith.constant 1.000000e+00 : f32
    %811 = vector.broadcast %cst_249 : f32 to vector<2x128xf32>
    %812 = arith.addf %811, %810 : vector<2x128xf32>
    %813 = arith.divf %811, %812 : vector<2x128xf32>
    %cst_250 = arith.constant 2.000000e+00 : f32
    %814 = vector.broadcast %cst_250 : f32 to vector<2x128xf32>
    %815 = arith.mulf %814, %813 : vector<2x128xf32>
    %cst_251 = arith.constant 1.000000e+00 : f32
    %816 = vector.broadcast %cst_251 : f32 to vector<2x128xf32>
    %817 = arith.subf %815, %816 : vector<2x128xf32>
    %818 = vector.shape_cast %5 : vector<1x128xi1> to vector<1x128xi1>
    %819 = vector.broadcast %818 : vector<1x128xi1> to vector<2x128xi1>
    %820 = arith.select %819, %817, %813 : vector<2x128xi1>, vector<2x128xf32>
    %821 = vector.extract_strided_slice %820 {offsets = [0, 0], sizes = [2, 32], strides = [1, 1]} : vector<2x128xf32> to vector<2x32xf32>
    %822 = vector.extract_strided_slice %820 {offsets = [0, 32], sizes = [2, 32], strides = [1, 1]} : vector<2x128xf32> to vector<2x32xf32>
    %823 = vector.extract_strided_slice %820 {offsets = [0, 64], sizes = [2, 32], strides = [1, 1]} : vector<2x128xf32> to vector<2x32xf32>
    %824 = vector.extract_strided_slice %820 {offsets = [0, 96], sizes = [2, 32], strides = [1, 1]} : vector<2x128xf32> to vector<2x32xf32>
    %825 = arith.mulf %822, %797 : vector<2x32xf32>
    %826 = arith.mulf %821, %823 : vector<2x32xf32>
    %827 = arith.addf %825, %826 : vector<2x32xf32>
    %828 = math.tanh %827 : vector<2x32xf32>
    %829 = arith.mulf %824, %828 : vector<2x32xf32>
    %c1_252 = arith.constant 1 : index
    %c6_253 = arith.constant 6 : index
    %c0_254 = arith.constant 0 : index
    %c0_255 = arith.constant 0 : index
    %830 = vector.load %arg24[%c1_252, %c6_253, %c0_254, %c0_255] : memref<2x8x2x32xf32, #tpu.memory_space<vmem>>, vector<1x1x2x32xf32>
    %831 = vector.shape_cast %830 : vector<1x1x2x32xf32> to vector<2x32xf32>
    %832 = vector.shape_cast %829 : vector<2x32xf32> to vector<1x1x2x32xf32>
    tpu.vector_store %arg24[%c1_252, %c6_253, %c0_254, %c0_255], %832 {strides = array<i32>} : memref<2x8x2x32xf32, #tpu.memory_space<vmem>>, vector<1x1x2x32xf32>,
    %833 = vector.extract_strided_slice %769 {offsets = [5, 0, 0], sizes = [1, 2, 128], strides = [1, 1, 1]} : vector<8x2x128xf32> to vector<1x2x128xf32>
    %834 = vector.shape_cast %833 : vector<1x2x128xf32> to vector<2x128xf32>
    %cst_256 = arith.constant dense<0.000000e+00> : vector<2x128xf32>
    %835 = tpu.matmul %829, %770, %cst_256 {dimension_numbers = #tpu.dot_dimension_numbers<[1], [0], [0], [1], [0, 0, 1, 1], [], []>} : vector<2x32xf32>, vector<32x128xf32>, vector<2x128xf32> -> vector<2x128xf32>
    %836 = arith.addf %834, %835 : vector<2x128xf32>
    %837 = vector.broadcast %8 : vector<1x128xf32> to vector<2x128xf32>
    %838 = arith.mulf %836, %837 : vector<2x128xf32>
    %839 = arith.negf %838 : vector<2x128xf32>
    %840 = math.exp %839 : vector<2x128xf32>
    %cst_257 = arith.constant 1.000000e+00 : f32
    %841 = vector.broadcast %cst_257 : f32 to vector<2x128xf32>
    %842 = arith.addf %841, %840 : vector<2x128xf32>
    %843 = arith.divf %841, %842 : vector<2x128xf32>
    %cst_258 = arith.constant 2.000000e+00 : f32
    %844 = vector.broadcast %cst_258 : f32 to vector<2x128xf32>
    %845 = arith.mulf %844, %843 : vector<2x128xf32>
    %cst_259 = arith.constant 1.000000e+00 : f32
    %846 = vector.broadcast %cst_259 : f32 to vector<2x128xf32>
    %847 = arith.subf %845, %846 : vector<2x128xf32>
    %848 = vector.shape_cast %5 : vector<1x128xi1> to vector<1x128xi1>
    %849 = vector.broadcast %848 : vector<1x128xi1> to vector<2x128xi1>
    %850 = arith.select %849, %847, %843 : vector<2x128xi1>, vector<2x128xf32>
    %851 = vector.extract_strided_slice %850 {offsets = [0, 0], sizes = [2, 32], strides = [1, 1]} : vector<2x128xf32> to vector<2x32xf32>
    %852 = vector.extract_strided_slice %850 {offsets = [0, 32], sizes = [2, 32], strides = [1, 1]} : vector<2x128xf32> to vector<2x32xf32>
    %853 = vector.extract_strided_slice %850 {offsets = [0, 64], sizes = [2, 32], strides = [1, 1]} : vector<2x128xf32> to vector<2x32xf32>
    %854 = vector.extract_strided_slice %850 {offsets = [0, 96], sizes = [2, 32], strides = [1, 1]} : vector<2x128xf32> to vector<2x32xf32>
    %855 = arith.mulf %852, %827 : vector<2x32xf32>
    %856 = arith.mulf %851, %853 : vector<2x32xf32>
    %857 = arith.addf %855, %856 : vector<2x32xf32>
    %858 = math.tanh %857 : vector<2x32xf32>
    %859 = arith.mulf %854, %858 : vector<2x32xf32>
    %c1_260 = arith.constant 1 : index
    %c5_261 = arith.constant 5 : index
    %c0_262 = arith.constant 0 : index
    %c0_263 = arith.constant 0 : index
    %860 = vector.load %arg24[%c1_260, %c5_261, %c0_262, %c0_263] : memref<2x8x2x32xf32, #tpu.memory_space<vmem>>, vector<1x1x2x32xf32>
    %861 = vector.shape_cast %860 : vector<1x1x2x32xf32> to vector<2x32xf32>
    %862 = vector.shape_cast %859 : vector<2x32xf32> to vector<1x1x2x32xf32>
    tpu.vector_store %arg24[%c1_260, %c5_261, %c0_262, %c0_263], %862 {strides = array<i32>} : memref<2x8x2x32xf32, #tpu.memory_space<vmem>>, vector<1x1x2x32xf32>,
    %863 = vector.extract_strided_slice %769 {offsets = [4, 0, 0], sizes = [1, 2, 128], strides = [1, 1, 1]} : vector<8x2x128xf32> to vector<1x2x128xf32>
    %864 = vector.shape_cast %863 : vector<1x2x128xf32> to vector<2x128xf32>
    %cst_264 = arith.constant dense<0.000000e+00> : vector<2x128xf32>
    %865 = tpu.matmul %859, %770, %cst_264 {dimension_numbers = #tpu.dot_dimension_numbers<[1], [0], [0], [1], [0, 0, 1, 1], [], []>} : vector<2x32xf32>, vector<32x128xf32>, vector<2x128xf32> -> vector<2x128xf32>
    %866 = arith.addf %864, %865 : vector<2x128xf32>
    %867 = vector.broadcast %8 : vector<1x128xf32> to vector<2x128xf32>
    %868 = arith.mulf %866, %867 : vector<2x128xf32>
    %869 = arith.negf %868 : vector<2x128xf32>
    %870 = math.exp %869 : vector<2x128xf32>
    %cst_265 = arith.constant 1.000000e+00 : f32
    %871 = vector.broadcast %cst_265 : f32 to vector<2x128xf32>
    %872 = arith.addf %871, %870 : vector<2x128xf32>
    %873 = arith.divf %871, %872 : vector<2x128xf32>
    %cst_266 = arith.constant 2.000000e+00 : f32
    %874 = vector.broadcast %cst_266 : f32 to vector<2x128xf32>
    %875 = arith.mulf %874, %873 : vector<2x128xf32>
    %cst_267 = arith.constant 1.000000e+00 : f32
    %876 = vector.broadcast %cst_267 : f32 to vector<2x128xf32>
    %877 = arith.subf %875, %876 : vector<2x128xf32>
    %878 = vector.shape_cast %5 : vector<1x128xi1> to vector<1x128xi1>
    %879 = vector.broadcast %878 : vector<1x128xi1> to vector<2x128xi1>
    %880 = arith.select %879, %877, %873 : vector<2x128xi1>, vector<2x128xf32>
    %881 = vector.extract_strided_slice %880 {offsets = [0, 0], sizes = [2, 32], strides = [1, 1]} : vector<2x128xf32> to vector<2x32xf32>
    %882 = vector.extract_strided_slice %880 {offsets = [0, 32], sizes = [2, 32], strides = [1, 1]} : vector<2x128xf32> to vector<2x32xf32>
    %883 = vector.extract_strided_slice %880 {offsets = [0, 64], sizes = [2, 32], strides = [1, 1]} : vector<2x128xf32> to vector<2x32xf32>
    %884 = vector.extract_strided_slice %880 {offsets = [0, 96], sizes = [2, 32], strides = [1, 1]} : vector<2x128xf32> to vector<2x32xf32>
    %885 = arith.mulf %882, %857 : vector<2x32xf32>
    %886 = arith.mulf %881, %883 : vector<2x32xf32>
    %887 = arith.addf %885, %886 : vector<2x32xf32>
    %888 = math.tanh %887 : vector<2x32xf32>
    %889 = arith.mulf %884, %888 : vector<2x32xf32>
    %c1_268 = arith.constant 1 : index
    %c4_269 = arith.constant 4 : index
    %c0_270 = arith.constant 0 : index
    %c0_271 = arith.constant 0 : index
    %890 = vector.load %arg24[%c1_268, %c4_269, %c0_270, %c0_271] : memref<2x8x2x32xf32, #tpu.memory_space<vmem>>, vector<1x1x2x32xf32>
    %891 = vector.shape_cast %890 : vector<1x1x2x32xf32> to vector<2x32xf32>
    %892 = vector.shape_cast %889 : vector<2x32xf32> to vector<1x1x2x32xf32>
    tpu.vector_store %arg24[%c1_268, %c4_269, %c0_270, %c0_271], %892 {strides = array<i32>} : memref<2x8x2x32xf32, #tpu.memory_space<vmem>>, vector<1x1x2x32xf32>,
    %893 = vector.extract_strided_slice %769 {offsets = [3, 0, 0], sizes = [1, 2, 128], strides = [1, 1, 1]} : vector<8x2x128xf32> to vector<1x2x128xf32>
    %894 = vector.shape_cast %893 : vector<1x2x128xf32> to vector<2x128xf32>
    %cst_272 = arith.constant dense<0.000000e+00> : vector<2x128xf32>
    %895 = tpu.matmul %889, %770, %cst_272 {dimension_numbers = #tpu.dot_dimension_numbers<[1], [0], [0], [1], [0, 0, 1, 1], [], []>} : vector<2x32xf32>, vector<32x128xf32>, vector<2x128xf32> -> vector<2x128xf32>
    %896 = arith.addf %894, %895 : vector<2x128xf32>
    %897 = vector.broadcast %8 : vector<1x128xf32> to vector<2x128xf32>
    %898 = arith.mulf %896, %897 : vector<2x128xf32>
    %899 = arith.negf %898 : vector<2x128xf32>
    %900 = math.exp %899 : vector<2x128xf32>
    %cst_273 = arith.constant 1.000000e+00 : f32
    %901 = vector.broadcast %cst_273 : f32 to vector<2x128xf32>
    %902 = arith.addf %901, %900 : vector<2x128xf32>
    %903 = arith.divf %901, %902 : vector<2x128xf32>
    %cst_274 = arith.constant 2.000000e+00 : f32
    %904 = vector.broadcast %cst_274 : f32 to vector<2x128xf32>
    %905 = arith.mulf %904, %903 : vector<2x128xf32>
    %cst_275 = arith.constant 1.000000e+00 : f32
    %906 = vector.broadcast %cst_275 : f32 to vector<2x128xf32>
    %907 = arith.subf %905, %906 : vector<2x128xf32>
    %908 = vector.shape_cast %5 : vector<1x128xi1> to vector<1x128xi1>
    %909 = vector.broadcast %908 : vector<1x128xi1> to vector<2x128xi1>
    %910 = arith.select %909, %907, %903 : vector<2x128xi1>, vector<2x128xf32>
    %911 = vector.extract_strided_slice %910 {offsets = [0, 0], sizes = [2, 32], strides = [1, 1]} : vector<2x128xf32> to vector<2x32xf32>
    %912 = vector.extract_strided_slice %910 {offsets = [0, 32], sizes = [2, 32], strides = [1, 1]} : vector<2x128xf32> to vector<2x32xf32>
    %913 = vector.extract_strided_slice %910 {offsets = [0, 64], sizes = [2, 32], strides = [1, 1]} : vector<2x128xf32> to vector<2x32xf32>
    %914 = vector.extract_strided_slice %910 {offsets = [0, 96], sizes = [2, 32], strides = [1, 1]} : vector<2x128xf32> to vector<2x32xf32>
    %915 = arith.mulf %912, %887 : vector<2x32xf32>
    %916 = arith.mulf %911, %913 : vector<2x32xf32>
    %917 = arith.addf %915, %916 : vector<2x32xf32>
    %918 = math.tanh %917 : vector<2x32xf32>
    %919 = arith.mulf %914, %918 : vector<2x32xf32>
    %c1_276 = arith.constant 1 : index
    %c3_277 = arith.constant 3 : index
    %c0_278 = arith.constant 0 : index
    %c0_279 = arith.constant 0 : index
    %920 = vector.load %arg24[%c1_276, %c3_277, %c0_278, %c0_279] : memref<2x8x2x32xf32, #tpu.memory_space<vmem>>, vector<1x1x2x32xf32>
    %921 = vector.shape_cast %920 : vector<1x1x2x32xf32> to vector<2x32xf32>
    %922 = vector.shape_cast %919 : vector<2x32xf32> to vector<1x1x2x32xf32>
    tpu.vector_store %arg24[%c1_276, %c3_277, %c0_278, %c0_279], %922 {strides = array<i32>} : memref<2x8x2x32xf32, #tpu.memory_space<vmem>>, vector<1x1x2x32xf32>,
    %923 = vector.extract_strided_slice %769 {offsets = [2, 0, 0], sizes = [1, 2, 128], strides = [1, 1, 1]} : vector<8x2x128xf32> to vector<1x2x128xf32>
    %924 = vector.shape_cast %923 : vector<1x2x128xf32> to vector<2x128xf32>
    %cst_280 = arith.constant dense<0.000000e+00> : vector<2x128xf32>
    %925 = tpu.matmul %919, %770, %cst_280 {dimension_numbers = #tpu.dot_dimension_numbers<[1], [0], [0], [1], [0, 0, 1, 1], [], []>} : vector<2x32xf32>, vector<32x128xf32>, vector<2x128xf32> -> vector<2x128xf32>
    %926 = arith.addf %924, %925 : vector<2x128xf32>
    %927 = vector.broadcast %8 : vector<1x128xf32> to vector<2x128xf32>
    %928 = arith.mulf %926, %927 : vector<2x128xf32>
    %929 = arith.negf %928 : vector<2x128xf32>
    %930 = math.exp %929 : vector<2x128xf32>
    %cst_281 = arith.constant 1.000000e+00 : f32
    %931 = vector.broadcast %cst_281 : f32 to vector<2x128xf32>
    %932 = arith.addf %931, %930 : vector<2x128xf32>
    %933 = arith.divf %931, %932 : vector<2x128xf32>
    %cst_282 = arith.constant 2.000000e+00 : f32
    %934 = vector.broadcast %cst_282 : f32 to vector<2x128xf32>
    %935 = arith.mulf %934, %933 : vector<2x128xf32>
    %cst_283 = arith.constant 1.000000e+00 : f32
    %936 = vector.broadcast %cst_283 : f32 to vector<2x128xf32>
    %937 = arith.subf %935, %936 : vector<2x128xf32>
    %938 = vector.shape_cast %5 : vector<1x128xi1> to vector<1x128xi1>
    %939 = vector.broadcast %938 : vector<1x128xi1> to vector<2x128xi1>
    %940 = arith.select %939, %937, %933 : vector<2x128xi1>, vector<2x128xf32>
    %941 = vector.extract_strided_slice %940 {offsets = [0, 0], sizes = [2, 32], strides = [1, 1]} : vector<2x128xf32> to vector<2x32xf32>
    %942 = vector.extract_strided_slice %940 {offsets = [0, 32], sizes = [2, 32], strides = [1, 1]} : vector<2x128xf32> to vector<2x32xf32>
    %943 = vector.extract_strided_slice %940 {offsets = [0, 64], sizes = [2, 32], strides = [1, 1]} : vector<2x128xf32> to vector<2x32xf32>
    %944 = vector.extract_strided_slice %940 {offsets = [0, 96], sizes = [2, 32], strides = [1, 1]} : vector<2x128xf32> to vector<2x32xf32>
    %945 = arith.mulf %942, %917 : vector<2x32xf32>
    %946 = arith.mulf %941, %943 : vector<2x32xf32>
    %947 = arith.addf %945, %946 : vector<2x32xf32>
    %948 = math.tanh %947 : vector<2x32xf32>
    %949 = arith.mulf %944, %948 : vector<2x32xf32>
    %c1_284 = arith.constant 1 : index
    %c2_285 = arith.constant 2 : index
    %c0_286 = arith.constant 0 : index
    %c0_287 = arith.constant 0 : index
    %950 = vector.load %arg24[%c1_284, %c2_285, %c0_286, %c0_287] : memref<2x8x2x32xf32, #tpu.memory_space<vmem>>, vector<1x1x2x32xf32>
    %951 = vector.shape_cast %950 : vector<1x1x2x32xf32> to vector<2x32xf32>
    %952 = vector.shape_cast %949 : vector<2x32xf32> to vector<1x1x2x32xf32>
    tpu.vector_store %arg24[%c1_284, %c2_285, %c0_286, %c0_287], %952 {strides = array<i32>} : memref<2x8x2x32xf32, #tpu.memory_space<vmem>>, vector<1x1x2x32xf32>,
    %953 = vector.extract_strided_slice %769 {offsets = [1, 0, 0], sizes = [1, 2, 128], strides = [1, 1, 1]} : vector<8x2x128xf32> to vector<1x2x128xf32>
    %954 = vector.shape_cast %953 : vector<1x2x128xf32> to vector<2x128xf32>
    %cst_288 = arith.constant dense<0.000000e+00> : vector<2x128xf32>
    %955 = tpu.matmul %949, %770, %cst_288 {dimension_numbers = #tpu.dot_dimension_numbers<[1], [0], [0], [1], [0, 0, 1, 1], [], []>} : vector<2x32xf32>, vector<32x128xf32>, vector<2x128xf32> -> vector<2x128xf32>
    %956 = arith.addf %954, %955 : vector<2x128xf32>
    %957 = vector.broadcast %8 : vector<1x128xf32> to vector<2x128xf32>
    %958 = arith.mulf %956, %957 : vector<2x128xf32>
    %959 = arith.negf %958 : vector<2x128xf32>
    %960 = math.exp %959 : vector<2x128xf32>
    %cst_289 = arith.constant 1.000000e+00 : f32
    %961 = vector.broadcast %cst_289 : f32 to vector<2x128xf32>
    %962 = arith.addf %961, %960 : vector<2x128xf32>
    %963 = arith.divf %961, %962 : vector<2x128xf32>
    %cst_290 = arith.constant 2.000000e+00 : f32
    %964 = vector.broadcast %cst_290 : f32 to vector<2x128xf32>
    %965 = arith.mulf %964, %963 : vector<2x128xf32>
    %cst_291 = arith.constant 1.000000e+00 : f32
    %966 = vector.broadcast %cst_291 : f32 to vector<2x128xf32>
    %967 = arith.subf %965, %966 : vector<2x128xf32>
    %968 = vector.shape_cast %5 : vector<1x128xi1> to vector<1x128xi1>
    %969 = vector.broadcast %968 : vector<1x128xi1> to vector<2x128xi1>
    %970 = arith.select %969, %967, %963 : vector<2x128xi1>, vector<2x128xf32>
    %971 = vector.extract_strided_slice %970 {offsets = [0, 0], sizes = [2, 32], strides = [1, 1]} : vector<2x128xf32> to vector<2x32xf32>
    %972 = vector.extract_strided_slice %970 {offsets = [0, 32], sizes = [2, 32], strides = [1, 1]} : vector<2x128xf32> to vector<2x32xf32>
    %973 = vector.extract_strided_slice %970 {offsets = [0, 64], sizes = [2, 32], strides = [1, 1]} : vector<2x128xf32> to vector<2x32xf32>
    %974 = vector.extract_strided_slice %970 {offsets = [0, 96], sizes = [2, 32], strides = [1, 1]} : vector<2x128xf32> to vector<2x32xf32>
    %975 = arith.mulf %972, %947 : vector<2x32xf32>
    %976 = arith.mulf %971, %973 : vector<2x32xf32>
    %977 = arith.addf %975, %976 : vector<2x32xf32>
    %978 = math.tanh %977 : vector<2x32xf32>
    %979 = arith.mulf %974, %978 : vector<2x32xf32>
    %c1_292 = arith.constant 1 : index
    %c1_293 = arith.constant 1 : index
    %c0_294 = arith.constant 0 : index
    %c0_295 = arith.constant 0 : index
    %980 = vector.load %arg24[%c1_292, %c1_293, %c0_294, %c0_295] : memref<2x8x2x32xf32, #tpu.memory_space<vmem>>, vector<1x1x2x32xf32>
    %981 = vector.shape_cast %980 : vector<1x1x2x32xf32> to vector<2x32xf32>
    %982 = vector.shape_cast %979 : vector<2x32xf32> to vector<1x1x2x32xf32>
    tpu.vector_store %arg24[%c1_292, %c1_293, %c0_294, %c0_295], %982 {strides = array<i32>} : memref<2x8x2x32xf32, #tpu.memory_space<vmem>>, vector<1x1x2x32xf32>,
    %983 = vector.extract_strided_slice %769 {offsets = [0, 0, 0], sizes = [1, 2, 128], strides = [1, 1, 1]} : vector<8x2x128xf32> to vector<1x2x128xf32>
    %984 = vector.shape_cast %983 : vector<1x2x128xf32> to vector<2x128xf32>
    %cst_296 = arith.constant dense<0.000000e+00> : vector<2x128xf32>
    %985 = tpu.matmul %979, %770, %cst_296 {dimension_numbers = #tpu.dot_dimension_numbers<[1], [0], [0], [1], [0, 0, 1, 1], [], []>} : vector<2x32xf32>, vector<32x128xf32>, vector<2x128xf32> -> vector<2x128xf32>
    %986 = arith.addf %984, %985 : vector<2x128xf32>
    %987 = vector.broadcast %8 : vector<1x128xf32> to vector<2x128xf32>
    %988 = arith.mulf %986, %987 : vector<2x128xf32>
    %989 = arith.negf %988 : vector<2x128xf32>
    %990 = math.exp %989 : vector<2x128xf32>
    %cst_297 = arith.constant 1.000000e+00 : f32
    %991 = vector.broadcast %cst_297 : f32 to vector<2x128xf32>
    %992 = arith.addf %991, %990 : vector<2x128xf32>
    %993 = arith.divf %991, %992 : vector<2x128xf32>
    %cst_298 = arith.constant 2.000000e+00 : f32
    %994 = vector.broadcast %cst_298 : f32 to vector<2x128xf32>
    %995 = arith.mulf %994, %993 : vector<2x128xf32>
    %cst_299 = arith.constant 1.000000e+00 : f32
    %996 = vector.broadcast %cst_299 : f32 to vector<2x128xf32>
    %997 = arith.subf %995, %996 : vector<2x128xf32>
    %998 = vector.shape_cast %5 : vector<1x128xi1> to vector<1x128xi1>
    %999 = vector.broadcast %998 : vector<1x128xi1> to vector<2x128xi1>
    %1000 = arith.select %999, %997, %993 : vector<2x128xi1>, vector<2x128xf32>
    %1001 = vector.extract_strided_slice %1000 {offsets = [0, 0], sizes = [2, 32], strides = [1, 1]} : vector<2x128xf32> to vector<2x32xf32>
    %1002 = vector.extract_strided_slice %1000 {offsets = [0, 32], sizes = [2, 32], strides = [1, 1]} : vector<2x128xf32> to vector<2x32xf32>
    %1003 = vector.extract_strided_slice %1000 {offsets = [0, 64], sizes = [2, 32], strides = [1, 1]} : vector<2x128xf32> to vector<2x32xf32>
    %1004 = vector.extract_strided_slice %1000 {offsets = [0, 96], sizes = [2, 32], strides = [1, 1]} : vector<2x128xf32> to vector<2x32xf32>
    %1005 = arith.mulf %1002, %977 : vector<2x32xf32>
    %1006 = arith.mulf %1001, %1003 : vector<2x32xf32>
    %1007 = arith.addf %1005, %1006 : vector<2x32xf32>
    %1008 = math.tanh %1007 : vector<2x32xf32>
    %1009 = arith.mulf %1004, %1008 : vector<2x32xf32>
    %c1_300 = arith.constant 1 : index
    %c0_301 = arith.constant 0 : index
    %c0_302 = arith.constant 0 : index
    %c0_303 = arith.constant 0 : index
    %1010 = vector.load %arg24[%c1_300, %c0_301, %c0_302, %c0_303] : memref<2x8x2x32xf32, #tpu.memory_space<vmem>>, vector<1x1x2x32xf32>
    %1011 = vector.shape_cast %1010 : vector<1x1x2x32xf32> to vector<2x32xf32>
    %1012 = vector.shape_cast %1009 : vector<2x32xf32> to vector<1x1x2x32xf32>
    tpu.vector_store %arg24[%c1_300, %c0_301, %c0_302, %c0_303], %1012 {strides = array<i32>} : memref<2x8x2x32xf32, #tpu.memory_space<vmem>>, vector<1x1x2x32xf32>,
    %c0_304 = arith.constant 0 : index
    %c0_305 = arith.constant 0 : index
    %c0_306 = arith.constant 0 : index
    %c0_307 = arith.constant 0 : index
    %1013 = vector.load %arg24[%c0_304, %c0_305, %c0_306, %c0_307] : memref<2x8x2x32xf32, #tpu.memory_space<vmem>>, vector<1x8x2x32xf32>
    %1014 = vector.shape_cast %1013 : vector<1x8x2x32xf32> to vector<8x2x32xf32>
    %c1_308 = arith.constant 1 : index
    %c0_309 = arith.constant 0 : index
    %c0_310 = arith.constant 0 : index
    %c0_311 = arith.constant 0 : index
    %1015 = vector.load %arg24[%c1_308, %c0_309, %c0_310, %c0_311] : memref<2x8x2x32xf32, #tpu.memory_space<vmem>>, vector<1x8x2x32xf32>
    %1016 = vector.shape_cast %1015 : vector<1x8x2x32xf32> to vector<8x2x32xf32>
    %1017 = tpu.concatenate %1014, %1016 in 2 : vector<8x2x32xf32>, vector<8x2x32xf32> -> vector<8x2x64xf32>
    %1018 = vector.extract_strided_slice %1017 {offsets = [7, 0, 0], sizes = [1, 2, 64], strides = [1, 1, 1]} : vector<8x2x64xf32> to vector<1x2x64xf32>
    %1019 = vector.shape_cast %1018 : vector<1x2x64xf32> to vector<2x64xf32>
    %c0_312 = arith.constant 0 : index
    %c0_313 = arith.constant 0 : index
    %1020 = vector.load %arg21[%c0_312, %c0_313] : memref<64x5xf32, #tpu.memory_space<vmem>>, vector<64x5xf32>
    %cst_314 = arith.constant dense<0.000000e+00> : vector<2x5xf32>
    %1021 = tpu.matmul %1019, %1020, %cst_314 {dimension_numbers = #tpu.dot_dimension_numbers<[1], [0], [0], [1], [0, 0, 1, 1], [], []>} : vector<2x64xf32>, vector<64x5xf32>, vector<2x5xf32> -> vector<2x5xf32>
    %c0_315 = arith.constant 0 : index
    %c0_316 = arith.constant 0 : index
    %1022 = vector.load %arg22[%c0_315, %c0_316] : memref<1x5xf32, #tpu.memory_space<vmem>>, vector<1x5xf32>
    %1023 = vector.broadcast %1022 : vector<1x5xf32> to vector<2x5xf32>
    %1024 = arith.addf %1021, %1023 : vector<2x5xf32>
    %c0_317 = arith.constant 0 : index
    %c0_318 = arith.constant 0 : index
    %1025 = vector.load %arg23[%c0_317, %c0_318] : memref<2x5xf32, #tpu.memory_space<vmem>>, vector<2x5xf32>
    tpu.vector_store %arg23[%c0_317, %c0_318], %1024 {strides = array<i32>} : memref<2x5xf32, #tpu.memory_space<vmem>>, vector<2x5xf32>,
    return
  }
}

</mosaic_0001>

<bundles_post_ra>
// kernel: text_bilstm_forward.1
= control target key start
LH: loop header
LB: loop body
LE: loop exit
PB: predicated region body
PF: predicated region fallthrough
CT: control target
= control target key end

     0   :  { %s6527_s0 = inlined_call_operand.vmem [shape: f32[8,2,32], index: 0, kind: input, shape index: {}]   ;;  %s6528_s1 = inlined_call_operand.vmem [shape: f32[32,128], index: 1, kind: input, shape index: {}]   ;;  %s6529_s2 = inlined_call_operand.vmem [shape: f32[32,128], index: 2, kind: input, shape index: {}]   ;;  %s6530_s3 = inlined_call_operand.vmem [shape: f32[1,128], index: 3, kind: input, shape index: {}]   ;;  %s6531_s4 = inlined_call_operand.vmem [shape: f32[2,32], index: 4, kind: input, shape index: {}]   ;;  %s6532_s5 = inlined_call_operand.vmem [shape: f32[2,32], index: 5, kind: input, shape index: {}]   ;;  %s6533_s6 = inlined_call_operand.vmem [shape: f32[32,128], index: 6, kind: input, shape index: {}]   ;;  %s6534_s7 = inlined_call_operand.vmem [shape: f32[32,128], index: 7, kind: input, shape index: {}]   ;;  %s6535_s8 = inlined_call_operand.vmem [shape: f32[1,128], index: 8, kind: input, shape index: {}]   ;;  %s6536_s9 = inlined_call_operand.vmem [shape: f32[2,32], index: 9, kind: input, shape index: {}]   ;;  %s6537_s10 = inlined_call_operand.vmem [shape: f32[2,32], index: 10, kind: input, shape index: {}]   ;;  %s6538_s11 = inlined_call_operand.vmem [shape: f32[64,128], index: 11, kind: input, shape index: {}]   ;;  %s6539_s12 = inlined_call_operand.vmem [shape: f32[32,128], index: 12, kind: input, shape index: {}]   ;;  %s6540_s13 = inlined_call_operand.vmem [shape: f32[1,128], index: 13, kind: input, shape index: {}]   ;;  %s6541_s14 = inlined_call_operand.vmem [shape: f32[2,32], index: 14, kind: input, shape index: {}]   ;;  %s6542_s15 = inlined_call_operand.vmem [shape: f32[2,32], index: 15, kind: input, shape index: {}]   ;;  %s6543_s16 = inlined_call_operand.vmem [shape: f32[64,128], index: 16, kind: input, shape index: {}]   ;;  %s6544_s17 = inlined_call_operand.vmem [shape: f32[32,128], index: 17, kind: input, shape index: {}]   ;;  %s6545_s18 = inlined_call_operand.vmem [shape: f32[1,128], index: 18, kind: input, shape index: {}]   ;;  %s6546_s19 = inlined_call_operand.vmem [shape: f32[2,32], index: 19, kind: input, shape index: {}]   ;;  %s6547_s20 = inlined_call_operand.vmem [shape: f32[2,32], index: 20, kind: input, shape index: {}]   ;;  %s6548_s21 = inlined_call_operand.vmem [shape: f32[64,5], index: 21, kind: input, shape index: {}]   ;;  %s6549_s22 = inlined_call_operand.vmem [shape: f32[1,5], index: 22, kind: input, shape index: {}]   ;;  %s6550_s23 = inlined_call_operand.hbm [shape: f32[2,5], index: 23, kind: output, shape index: {}]  }
   0x1   :  { %6556 = sst [smem:[#allocation6_spill]] %s6527_s0 }
   0x2   :  { %6557 = sst [smem:[#allocation7_spill]] %s6528_s1 }
   0x3   :  { %6558 = sst [smem:[#allocation8_spill]] %s6529_s2 }
   0x4   :  { %6559 = sst [smem:[#allocation9_spill]] %s6530_s3 }
   0x5   :  { %6560 = sst [smem:[#allocation10_spill]] %s6531_s4 }
   0x6   :  { %6561 = sst [smem:[#allocation11_spill]] %s6532_s5 }
   0x7   :  { %6562 = sst [smem:[#allocation12_spill]] %s6533_s6 }
   0x8   :  { %6563 = sst [smem:[#allocation13_spill]] %s6534_s7 }
   0x9   :  { %s6564_s24 = sld [smem:[#allocation7_spill]]  ;;  %v75_v3 = vlaneseq  ;;  %s6565_s28 = sld [smem:[#allocation6_spill]]  ;;  %v5518_v8 = vmov 1983009808   ;;  %v5519_v15 = vmov 0.0|0.0   ;;  %vm5520_vm0 = vmmov 0  }
   0xa   :  { %v111_v9 = vunpack.c.l.s4 %v5518_v8  ;;  %s6566_s1 = sld [smem:[#allocation8_spill]]  ;;  %5056 = vmatprep.subr.bf16.mxu0 %v5519_v15  ;;  %v5521_v28 = vmov 0.0  }
   0xb   :  { %v114_v13 = vshrl.u32 %v75_v3, 7  ;;  %4641 = vmatprep.mubr.msk.f32.mxu0 %vm5520_vm0, %v5521_v28 }
   0xc   :  { %v112_v18 = vunpack.c.0.s8 %v111_v9 }
   0xe   :  { %v5690_v25 = vsub.s32 %v112_v18, %v114_v13 }
   0xf   :  { %v89_v0 = vld [vmem:[%s6564_s24] sm:$0xff]  ;;  %v90_v1 = vld [vmem:[%s6564_s24 + $0x8] sm:$0xff]  ;;  %v91_v2 = vld [vmem:[%s6564_s24 + $0x10] sm:$0xff] }
  0x10   :  { %v5042_v4 = vpack.c.bf16 %v90_v1, %v89_v0  ;;  %v92_v5 = vld [vmem:[%s6564_s24 + $0x18] sm:$0xff]  ;;  %v81_v6 = vld [vmem:[%s6565_s28] sm:$0x3]  ;;  %v82_v7 = vld [vmem:[%s6565_s28 + $0x2] sm:$0x3] }
  0x11   :  { %v5046_v10 = vpack.c.bf16 %v92_v5, %v91_v2  ;;  %v83_v11 = vld [vmem:[%s6565_s28 + $0x4] sm:$0x3]  ;;  %v84_v12 = vld [vmem:[%s6565_s28 + $0x6] sm:$0x3]  ;;  %v108_v16 = vcombine.low %v81_v6, %v82_v7  ;;  %v85_v19 = vld [vmem:[%s6565_s28 + $0x8] sm:$0x3] }
  0x12   :  { %v266_v14 = vld [vmem:[%s6566_s1] sm:$0xff]  ;;  %5043 = vmatprep.subr.bf16.mxu1 %v5042_v4  ;;  %v109_v17 = vcombine.low %v83_v11, %v84_v12  ;;  %v86_v20 = vld [vmem:[%s6565_s28 + $0xa] sm:$0x3]  ;;  %v87_v21 = vld [vmem:[%s6565_s28 + $0xc] sm:$0x3] }
  0x13   :  { %5045 = vmatpush3.bf16.msra.mxu1 %v5042_v4  ;;  %v88_v22 = vld [vmem:[%s6565_s28 + $0xe] sm:$0x3]  ;;  %v125_v23 = vcombine.low %v85_v19, %v86_v20 }
  0x14   :  { %v267_v24 = vld [vmem:[%s6566_s1 + $0x8] sm:$0xff]  ;;  %5047 = vmatprep.subr.bf16.mxu1 %v5046_v10  ;;  %v126_v26 = vcombine.low %v87_v21, %v88_v22 }
  0x15   :  { %v5692_v27 = vpack.c.bf16 %v267_v24, %v266_v14 }
  0x16   :  { %28 = vsyncpa [#allocation4], 0  ;;  %v268_v29 = vld [vmem:[%s6566_s1 + $0x10] sm:$0xff]  ;;  %v269_v30 = vld [vmem:[%s6566_s1 + $0x18] sm:$0xff]  ;;  %v116_v31 = vrot.slane %v108_v16, %v5690_v25  ;;  %v123_v32 = vrot.slane %v109_v17, %v5690_v25  ;;  %v133_v33 = vrot.slane %v125_v23, %v5690_v25  ;;  %v140_v34 = vrot.slane %v126_v26, %v5690_v25  ;;  %s6567_s2 = sld [smem:[#allocation10_spill]]  ;;  %s6568_s7 = sld [smem:[#allocation9_spill]] }
  0x17   :  { %5058 = vmatpush3.bf16.msra.mxu0 %v5692_v27  ;;  %5049 = vmatpush3.bf16.msra.mxu1 %v5046_v10  ;;  %vm142_vm1 = vcmask 261120   ;;  %v5713_v37 = vpack.c.bf16 %v269_v30, %v268_v29  ;;  %v76_v40 = vand.u32 127, %v75_v3  ;;  %v5522_v47 = vmov 1.0   ;;  %s5523_s29 = smov 64   ;;  %s6571_s4 = sld [smem:[#allocation11_spill]] }
  0x18   :  { %5059 = vmatprep.subr.bf16.mxu0 %v5519_v15  ;;  %v5708_v35 = vcombine.low %v116_v31, %v123_v32  ;;  %5050 = vmatprep.subr.bf16.mxu1 %v5519_v15  ;;  %v5711_v36 = vcombine.low %v133_v33, %v140_v34  ;;  %s5524_s30 = smov 32   ;;  %vm383_vm5 = vcmask 254976   ;;  %s6572_s28 = sld [smem:[#allocation12_spill]]  ;;  %vm2229_vm6 = vcmask 523264   ;;  %v4408_v45 = vld [vmem:[%s6549_s22] ss:$0 sm:$0xff] }
  0x19   :  { %vm77_vm2 = vcmp.ge.s32.totalorder %v76_v40, 64  ;;  %vm78_vm3 = vcmp.lt.s32.totalorder %v76_v40, 96  ;;  %s6573_s0 = sld [smem:[#allocation13_spill]]  ;;  %vm4284_vm7 = vcmask 33792  }
  0x1a   :  { %4619 = vmatprep.mubr.msk.f32.mxu1 %vm142_vm1, %v5708_v35  ;;  %vm5745_vm4 = vmand %vm77_vm2, %vm78_vm3 }
  0x1b   :  { %5061 = vmatpush3.bf16.msra.mxu0 %v5713_v37  ;;  %4620 = vmatmul.mubr.msk.f32.vlgmr.msra.gmra.mrb[0].mxu1 %vm142_vm1, %v5711_v36  ;;  %v5753_v48 = vsel %vm5745_vm4, 2.0, %v5522_v47 }
  0x1c   :  { %5068 = vmatprep.subr.bf16.mxu0 %v5519_v15  ;;  %5052 = vmatpush3.bf16.msra.mxu1 %v5692_v27  ;;  %v270_v38 = vld [vmem:[%s6567_s2] sm:$0x3] }
  0x1d   :  { %4630 = vmatprep.mubr.msk.f32.mxu1 %vm5520_vm0, %v5521_v28  ;;  %5053 = vmatprep.subr.bf16.mxu1 %v5519_v15  ;;  %v4300_v39 = vld [vmem:[%s6568_s7] ss:$0 sm:$0xff] }
  0x1e   :  { %v271_v60 = vld [vmem:[%s6571_s4] sm:$0x3] }
  0x20   :  { %5055 = vmatpush3.bf16.msra.mxu1 %v5713_v37 }
  0x21   :  { %5062 = vmatprep.subr.bf16.mxu1 %v5519_v15 }
  0x23   :  { %4631 = vmatmul.mubr.msk.f32.vlgmr.msra.gmra.mrb[2].mxu1 %vm142_vm1, %v270_v38 }
  0x24   :  { %5064 = vmatpush3.bf16.msra.mxu1 %v5692_v27  ;;  %4652 = vmatprep.mubr.msk.f32.mxu1 %vm5520_vm0, %v5521_v28 }
  0x25   :  { %5065 = vmatprep.subr.bf16.mxu1 %v5519_v15 }
  0x28   :  { %5067 = vmatpush3.bf16.msra.mxu1 %v5713_v37 }
  0x29   :  { %5074 = vmatprep.subr.bf16.mxu1 %v5519_v15 }
  0xee   :  { %v4621_v41 = vpop.f32.mrb[0].mxu1 }
  0xef   :  { %v5741_v42 = vadd.f32 %v4621_v41, %v4300_v39  ;;  %v213_v43 = vpop.f32.mrb[1].mxu1 }
  0xf0   :  { %v5743_v44 = vadd.f32 %v4300_v39, %v213_v43 }
  0xf2   :  { %v231_v46 = vrot.slane %v5743_v44, %v5690_v25  ;;  %v224_v32 = vcombine.high %v5743_v44, %v5743_v44 }
  0xf4   :  { %v239_v7 = vcombine.high %v231_v46, %v231_v46  ;;  %v238_v33 = vrot.slane %v224_v32, %v5690_v25 }
  0xf6   :  { %v341_v49 = vpop.f32.mrb[2].mxu1 }
  0xf7   :  { %v345_v50 = vadd.f32 %v341_v49, %v231_v46  ;;  %v4632_v51 = vpop.f32.mrb[3].mxu1 }
  0xf9   :  { %v346_v52 = vmul.f32 %v345_v50, %v5753_v48 }
  0xfb   :  { %v4304_v53 = vmul.f32 -1.442695, %v346_v52 }
  0xfd   :  { %5302 = vpow2.f32 %v4304_v53 }
 0x107   :  { %v5303_v54 = vpop.eup %5302 }
 0x108   :  { %v350_v55 = vadd.f32 1.0, %v5303_v54 }
 0x10a   :  { %5304 = vrcp.f32 %v350_v55 }
 0x114   :  { %v5305_v56 = vpop.eup %5304 }
 0x115   :  { %v353_v57 = vmul.f32 2.0, %v5305_v56 }
 0x117   :  { %v4305_v58 = vadd.f32 -1.0, %v353_v57 }
 0x119   :  { %v357_v59 = vsel %vm5745_vm4, %v4305_v58, %v5305_v56 }
 0x11a   :  { %364 = vrot.lane.b32.xlu0 %v357_v59, %s5523_s29 }
 0x11e   :  { %359 = vrot.lane.b32.xlu0 %v271_v60, %s5524_s30  ;;  %v240_v60 = vcombine.high %v238_v33, %v238_v33 }
 0x18c   :  { %v365_v61 = vpop.permute.xlu0 %364 }
 0x18d   :  { %v367_v62 = vmul.f32 %v365_v61, %v357_v59 }
 0x18f   :  { %369 = vrot.lane.b32.xlu1 %v367_v62, %s5524_s30 }
 0x190   :  { %v360_v63 = vpop.permute.xlu0 %359 }
 0x191   :  { %v362_v0 = vmul.f32 %v360_v63, %v357_v59 }
 0x201   :  { %v370_v1 = vpop.permute.xlu1 %369 }
 0x202   :  { %v372_v2 = vadd.f32 %v370_v1, %v362_v0 }
 0x204   :  { %5306 = vtanh.f32 %v372_v2 }
 0x20e   :  { %v5307_v3 = vpop.eup %5306 }
 0x20f   :  { %375 = vrot.lane.b32.xlu1 %v5307_v3, %s5523_s29 }
 0x281   :  { %v376_v4 = vpop.permute.xlu1 %375 }
 0x282   :  { %v378_v5 = vmul.f32 %v376_v4, %v357_v59 }
 0x284   :  { %380 = vrot.lane.b32.xlu0 %v378_v5, %s5524_s30 }
 0x2f6   :  { %v381_v6 = vpop.permute.xlu0 %380 }
 0x2f7   :  { %384 = vst.msk [vmem:[#allocation2] sm:$0x3] %vm383_vm5, %v381_v6  ;;  %4642 = vmatmul.mubr.msk.f32.vlgmr.msra.gmra.mrb[0].mxu0 %vm142_vm1, %v381_v6 }
 0x2f8   :  { %5070 = vmatpush3.bf16.msra.mxu0 %v5692_v27  ;;  %4663 = vmatprep.mubr.msk.f32.mxu0 %vm5520_vm0, %v5521_v28 }
 0x2f9   :  { %5071 = vmatprep.subr.bf16.mxu0 %v5519_v15 }
 0x2fc   :  { %5073 = vmatpush3.bf16.msra.mxu0 %v5713_v37 }
 0x2fd   :  { %5080 = vmatprep.subr.bf16.mxu0 %v5519_v15 }
 0x3ca   :  { %v453_v8 = vpop.f32.mrb[0].mxu0 }
 0x3cb   :  { %v457_v9 = vadd.f32 %v453_v8, %v239_v7  ;;  %v4643_v10 = vpop.f32.mrb[1].mxu0 }
 0x3cd   :  { %v458_v11 = vmul.f32 %v457_v9, %v5753_v48 }
 0x3cf   :  { %v4307_v12 = vmul.f32 -1.442695, %v458_v11 }
 0x3d1   :  { %5308 = vpow2.f32 %v4307_v12 }
 0x3db   :  { %v5309_v13 = vpop.eup %5308 }
 0x3dc   :  { %v462_v14 = vadd.f32 1.0, %v5309_v13 }
 0x3de   :  { %5310 = vrcp.f32 %v462_v14 }
 0x3e8   :  { %v5311_v16 = vpop.eup %5310 }
 0x3e9   :  { %v465_v17 = vmul.f32 2.0, %v5311_v16 }
 0x3eb   :  { %v4308_v18 = vadd.f32 -1.0, %v465_v17 }
 0x3ed   :  { %v467_v19 = vsel %vm5745_vm4, %v4308_v18, %v5311_v16  ;;  %v248_v18 = vrot.slane %v5741_v42, %v5690_v25 }
 0x3ee   :  { %470 = vrot.lane.b32.xlu1 %v467_v19, %s5523_s29  ;;  %v468_v22 = vmul.f32 %v467_v19, %v372_v2 }
 0x460   :  { %v471_v20 = vpop.permute.xlu1 %470 }
 0x461   :  { %v473_v21 = vmul.f32 %v471_v20, %v467_v19 }
 0x463   :  { %475 = vrot.lane.b32.xlu0 %v473_v21, %s5524_s30 }
 0x4d5   :  { %v476_v23 = vpop.permute.xlu0 %475 }
 0x4d6   :  { %v478_v24 = vadd.f32 %v476_v23, %v468_v22 }
 0x4d8   :  { %5312 = vtanh.f32 %v478_v24 }
 0x4e2   :  { %v5313_v26 = vpop.eup %5312 }
 0x4e3   :  { %481 = vrot.lane.b32.xlu1 %v5313_v26, %s5523_s29 }
 0x555   :  { %v482_v29 = vpop.permute.xlu1 %481 }
 0x556   :  { %v484_v30 = vmul.f32 %v482_v29, %v467_v19 }
 0x558   :  { %486 = vrot.lane.b32.xlu0 %v484_v30, %s5524_s30 }
 0x5ca   :  { %v487_v31 = vpop.permute.xlu0 %486 }
 0x5cb   :  { %490 = vst.msk [vmem:[#allocation2 + $0x2] sm:$0x3] %vm383_vm5, %v487_v31  ;;  %4653 = vmatmul.mubr.msk.f32.vlgmr.msra.gmra.mrb[4].mxu1 %vm142_vm1, %v487_v31 }
 0x5cc   :  { %5076 = vmatpush3.bf16.msra.mxu1 %v5692_v27  ;;  %4674 = vmatprep.mubr.msk.f32.mxu1 %vm5520_vm0, %v5521_v28 }
 0x5cd   :  { %5077 = vmatprep.subr.bf16.mxu1 %v5519_v15 }
 0x5d0   :  { %5079 = vmatpush3.bf16.msra.mxu1 %v5713_v37 }
 0x5d1   :  { %5086 = vmatprep.subr.bf16.mxu1 %v5519_v15 }
 0x69e   :  { %v559_v34 = vpop.f32.mrb[4].mxu1 }
 0x69f   :  { %v563_v38 = vadd.f32 %v559_v34, %v238_v33  ;;  %v4654_v39 = vpop.f32.mrb[5].mxu1 }
 0x6a1   :  { %v564_v40 = vmul.f32 %v563_v38, %v5753_v48 }
 0x6a3   :  { %v4310_v41 = vmul.f32 -1.442695, %v564_v40 }
 0x6a5   :  { %5314 = vpow2.f32 %v4310_v41 }
 0x6af   :  { %v5315_v43 = vpop.eup %5314 }
 0x6b0   :  { %v568_v46 = vadd.f32 1.0, %v5315_v43 }
 0x6b2   :  { %5316 = vrcp.f32 %v568_v46 }
 0x6bc   :  { %v5317_v47 = vpop.eup %5316 }
 0x6bd   :  { %v571_v49 = vmul.f32 2.0, %v5317_v47 }
 0x6bf   :  { %v4311_v50 = vadd.f32 -1.0, %v571_v49  ;;  %v256_v49 = vcombine.high %v248_v18, %v248_v18 }
 0x6c1   :  { %v573_v51 = vsel %vm5745_vm4, %v4311_v50, %v5317_v47 }
 0x6c2   :  { %576 = vrot.lane.b32.xlu1 %v573_v51, %s5523_s29  ;;  %v574_v53 = vmul.f32 %v573_v51, %v478_v24 }
 0x734   :  { %v577_v44 = vpop.permute.xlu1 %576 }
 0x735   :  { %v579_v52 = vmul.f32 %v577_v44, %v573_v51 }
 0x737   :  { %581 = vrot.lane.b32.xlu0 %v579_v52, %s5524_s30 }
 0x7a9   :  { %v582_v54 = vpop.permute.xlu0 %581 }
 0x7aa   :  { %v584_v55 = vadd.f32 %v582_v54, %v574_v53 }
 0x7ac   :  { %5318 = vtanh.f32 %v584_v55 }
 0x7b6   :  { %v5319_v56 = vpop.eup %5318 }
 0x7b7   :  { %587 = vrot.lane.b32.xlu1 %v5319_v56, %s5523_s29 }
 0x829   :  { %v588_v57 = vpop.permute.xlu1 %587 }
 0x82a   :  { %v590_v58 = vmul.f32 %v588_v57, %v573_v51 }
 0x82c   :  { %592 = vrot.lane.b32.xlu0 %v590_v58, %s5524_s30 }
 0x89e   :  { %v593_v59 = vpop.permute.xlu0 %592 }
 0x89f   :  { %596 = vst.msk [vmem:[#allocation2 + $0x4] sm:$0x3] %vm383_vm5, %v593_v59  ;;  %4664 = vmatmul.mubr.msk.f32.vlgmr.msra.gmra.mrb[2].mxu0 %vm142_vm1, %v593_v59 }
 0x8a0   :  { %5082 = vmatpush3.bf16.msra.mxu0 %v5692_v27  ;;  %4685 = vmatprep.mubr.msk.f32.mxu0 %vm5520_vm0, %v5521_v28 }
 0x8a1   :  { %5083 = vmatprep.subr.bf16.mxu0 %v5519_v15 }
 0x8a4   :  { %5085 = vmatpush3.bf16.msra.mxu0 %v5713_v37 }
 0x8a5   :  { %5092 = vmatprep.subr.bf16.mxu0 %v5519_v15 }
 0x972   :  { %v665_v61 = vpop.f32.mrb[2].mxu0 }
 0x973   :  { %v669_v62 = vadd.f32 %v665_v61, %v240_v60  ;;  %v4665_v63 = vpop.f32.mrb[3].mxu0 }
 0x975   :  { %v670_v0 = vmul.f32 %v669_v62, %v5753_v48 }
 0x977   :  { %v4313_v1 = vmul.f32 -1.442695, %v670_v0 }
 0x979   :  { %5320 = vpow2.f32 %v4313_v1 }
 0x983   :  { %v5321_v2 = vpop.eup %5320 }
 0x984   :  { %v674_v3 = vadd.f32 1.0, %v5321_v2 }
 0x986   :  { %5322 = vrcp.f32 %v674_v3  ;;  %v241_v3 = vcombine.high %v5741_v42, %v5741_v42 }
 0x990   :  { %v5323_v4 = vpop.eup %5322 }
 0x991   :  { %v677_v5 = vmul.f32 2.0, %v5323_v4 }
 0x993   :  { %v4314_v6 = vadd.f32 -1.0, %v677_v5 }
 0x995   :  { %v679_v7 = vsel %vm5745_vm4, %v4314_v6, %v5323_v4  ;;  %v5852_v4 = vrot.slane %v241_v3, %v5690_v25 }
 0x996   :  { %682 = vrot.lane.b32.xlu1 %v679_v7, %s5523_s29  ;;  %v680_v10 = vmul.f32 %v679_v7, %v584_v55 }
 0xa08   :  { %v683_v8 = vpop.permute.xlu1 %682 }
 0xa09   :  { %v685_v9 = vmul.f32 %v683_v8, %v679_v7 }
 0xa0b   :  { %687 = vrot.lane.b32.xlu0 %v685_v9, %s5524_s30 }
 0xa7d   :  { %v688_v11 = vpop.permute.xlu0 %687 }
 0xa7e   :  { %v690_v12 = vadd.f32 %v688_v11, %v680_v10 }
 0xa80   :  { %5324 = vtanh.f32 %v690_v12 }
 0xa8a   :  { %v5325_v13 = vpop.eup %5324 }
 0xa8b   :  { %693 = vrot.lane.b32.xlu1 %v5325_v13, %s5523_s29 }
 0xafd   :  { %v694_v14 = vpop.permute.xlu1 %693 }
 0xafe   :  { %v696_v16 = vmul.f32 %v694_v14, %v679_v7 }
 0xb00   :  { %698 = vrot.lane.b32.xlu0 %v696_v16, %s5524_s30 }
 0xb72   :  { %v699_v17 = vpop.permute.xlu0 %698 }
 0xb73   :  { %702 = vst.msk [vmem:[#allocation2 + $0x6] sm:$0x3] %vm383_vm5, %v699_v17  ;;  %4675 = vmatmul.mubr.msk.f32.vlgmr.msra.gmra.mrb[6].mxu1 %vm142_vm1, %v699_v17 }
 0xb74   :  { %5088 = vmatpush3.bf16.msra.mxu1 %v5692_v27  ;;  %4696 = vmatprep.mubr.msk.f32.mxu1 %vm5520_vm0, %v5521_v28 }
 0xb75   :  { %5089 = vmatprep.subr.bf16.mxu1 %v5519_v15 }
 0xb78   :  { %5091 = vmatpush3.bf16.msra.mxu1 %v5713_v37 }
 0xc46   :  { %v771_v19 = vpop.f32.mrb[6].mxu1 }
 0xc47   :  { %v775_v20 = vadd.f32 %v771_v19, %v248_v18  ;;  %v4676_v21 = vpop.f32.mrb[7].mxu1 }
 0xc48   :  { %v1128_v21 = vld [vmem:[%s6572_s28 + $0x8] sm:$0xff] }
 0xc49   :  { %v776_v22 = vmul.f32 %v775_v20, %v5753_v48  ;;  %v1127_v20 = vld [vmem:[%s6572_s28] sm:$0xff] }
 0xc4b   :  { %v4316_v23 = vmul.f32 -1.442695, %v776_v22  ;;  %v1129_v22 = vld [vmem:[%s6572_s28 + $0x10] sm:$0xff] }
 0xc4d   :  { %5326 = vpow2.f32 %v4316_v23  ;;  %v5098_v23 = vpack.c.bf16 %v1128_v21, %v1127_v20 }
 0xc4f   :  { %5099 = vmatprep.subr.bf16.mxu1 %v5098_v23 }
 0xc57   :  { %v5327_v24 = vpop.eup %5326 }
 0xc58   :  { %v780_v26 = vadd.f32 1.0, %v5327_v24  ;;  %v1130_v24 = vld [vmem:[%s6572_s28 + $0x18] sm:$0xff] }
 0xc5a   :  { %5328 = vrcp.f32 %v780_v26  ;;  %v5102_v26 = vpack.c.bf16 %v1130_v24, %v1129_v22 }
 0xc64   :  { %v5329_v29 = vpop.eup %5328 }
 0xc65   :  { %v783_v30 = vmul.f32 2.0, %v5329_v29 }
 0xc67   :  { %v4317_v31 = vadd.f32 -1.0, %v783_v30  ;;  %v1257_v30 = vld [vmem:[%s6573_s0] sm:$0xff] }
 0xc69   :  { %v785_v32 = vsel %vm5745_vm4, %v4317_v31, %v5329_v29  ;;  %v1258_v31 = vld [vmem:[%s6573_s0 + $0x8] sm:$0xff] }
 0xc6a   :  { %788 = vrot.lane.b32.xlu1 %v785_v32, %s5523_s29  ;;  %v786_v38 = vmul.f32 %v785_v32, %v690_v12 }
 0xcdc   :  { %v789_v33 = vpop.permute.xlu1 %788 }
 0xcdd   :  { %v791_v34 = vmul.f32 %v789_v33, %v785_v32  ;;  %v1260_v33 = vld [vmem:[%s6573_s0 + $0x18] sm:$0xff] }
 0xcdf   :  { %793 = vrot.lane.b32.xlu0 %v791_v34, %s5524_s30 }
 0xd51   :  { %v794_v39 = vpop.permute.xlu0 %793 }
 0xd52   :  { %v796_v40 = vadd.f32 %v794_v39, %v786_v38 }
 0xd54   :  { %5330 = vtanh.f32 %v796_v40 }
 0xd5e   :  { %v5331_v41 = vpop.eup %5330 }
 0xd5f   :  { %799 = vrot.lane.b32.xlu1 %v5331_v41, %s5523_s29  ;;  %v4327_v41 = vld [vmem:[%s6535_s8] ss:$0 sm:$0xff] }
 0xdd1   :  { %v800_v43 = vpop.permute.xlu1 %799 }
 0xdd2   :  { %v802_v46 = vmul.f32 %v800_v43, %v785_v32  ;;  %v5887_v32 = vpack.c.bf16 %v1258_v31, %v1257_v30 }
 0xdd4   :  { %804 = vrot.lane.b32.xlu0 %v802_v46, %s5524_s30 }
 0xe46   :  { %v805_v47 = vpop.permute.xlu0 %804 }
 0xe47   :  { %808 = vst.msk [vmem:[#allocation2 + $0x8] sm:$0x3] %vm383_vm5, %v805_v47  ;;  %4686 = vmatmul.mubr.msk.f32.vlgmr.msra.gmra.mrb[4].mxu0 %vm142_vm1, %v805_v47 }
 0xe48   :  { %5094 = vmatpush3.bf16.msra.mxu0 %v5692_v27  ;;  %4707 = vmatprep.mubr.msk.f32.mxu0 %vm5520_vm0, %v5521_v28 }
 0xe49   :  { %5095 = vmatprep.subr.bf16.mxu0 %v5519_v15 }
 0xe4c   :  { %5097 = vmatpush3.bf16.msra.mxu0 %v5713_v37 }
 0xe4d   :  { %5106 = vmatprep.subr.bf16.mxu0 %v5519_v15 }
 0xf1a   :  { %v877_v50 = vpop.f32.mrb[4].mxu0 }
 0xf1b   :  { %v881_v51 = vadd.f32 %v877_v50, %v256_v49  ;;  %v4687_v44 = vpop.f32.mrb[5].mxu0  ;;  %v1261_v50 = vld [vmem:[%s6536_s9] sm:$0x3] }
 0xf1d   :  { %v882_v52 = vmul.f32 %v881_v51, %v5753_v48 }
 0xf1f   :  { %v4319_v53 = vmul.f32 -1.442695, %v882_v52 }
 0xf21   :  { %5332 = vpow2.f32 %v4319_v53 }
 0xf2b   :  { %v5333_v54 = vpop.eup %5332 }
 0xf2c   :  { %v886_v55 = vadd.f32 1.0, %v5333_v54 }
 0xf2e   :  { %5334 = vrcp.f32 %v886_v55 }
 0xf38   :  { %v5335_v27 = vpop.eup %5334 }
 0xf39   :  { %v889_v56 = vmul.f32 2.0, %v5335_v27 }
 0xf3b   :  { %v4320_v57 = vadd.f32 -1.0, %v889_v56 }
 0xf3d   :  { %v891_v58 = vsel %vm5745_vm4, %v4320_v57, %v5335_v27 }
 0xf3e   :  { %894 = vrot.lane.b32.xlu1 %v891_v58, %s5523_s29  ;;  %v892_v60 = vmul.f32 %v891_v58, %v796_v40  ;;  %v1262_v40 = vld [vmem:[%s6537_s10] sm:$0x3] }
 0xfb0   :  { %v895_v37 = vpop.permute.xlu1 %894 }
 0xfb1   :  { %v897_v59 = vmul.f32 %v895_v37, %v891_v58 }
 0xfb3   :  { %899 = vrot.lane.b32.xlu0 %v897_v59, %s5524_s30 }
0x1025   :  { %v900_v61 = vpop.permute.xlu0 %899 }
0x1026   :  { %v902_v62 = vadd.f32 %v900_v61, %v892_v60 }
0x1028   :  { %5336 = vtanh.f32 %v902_v62 }
0x1032   :  { %v5337_v63 = vpop.eup %5336 }
0x1033   :  { %905 = vrot.lane.b32.xlu1 %v5337_v63, %s5523_s29 }
0x10a5   :  { %v906_v0 = vpop.permute.xlu1 %905 }
0x10a6   :  { %v908_v1 = vmul.f32 %v906_v0, %v891_v58 }
0x10a8   :  { %910 = vrot.lane.b32.xlu0 %v908_v1, %s5524_s30 }
0x111a   :  { %v911_v2 = vpop.permute.xlu0 %910 }
0x111b   :  { %914 = vst.msk [vmem:[#allocation2 + $0xa] sm:$0x3] %vm383_vm5, %v911_v2  ;;  %4697 = vmatmul.mubr.msk.f32.vlgmr.msra.gmra.mrb[8].mxu1 %vm142_vm1, %v911_v2 }
0x111c   :  { %4718 = vmatprep.mubr.msk.f32.mxu1 %vm142_vm1, %v5708_v35  ;;  %5101 = vmatpush3.bf16.msra.mxu1 %v5098_v23 }
0x111d   :  { %5103 = vmatprep.subr.bf16.mxu1 %v5102_v26 }
0x1120   :  { %5105 = vmatpush3.bf16.msra.mxu1 %v5102_v26 }
0x1121   :  { %5112 = vmatprep.subr.bf16.mxu1 %v5519_v15 }
0x1123   :  { %4719 = vmatmul.mubr.msk.f32.vlgmr.msra.gmra.mrb[10].mxu1 %vm142_vm1, %v5711_v36  ;;  %v1259_v36 = vld [vmem:[%s6573_s0 + $0x10] sm:$0xff] }
0x1124   :  { %4740 = vmatprep.mubr.msk.f32.mxu1 %vm5520_vm0, %v5521_v28  ;;  %5114 = vmatpush3.bf16.msra.mxu1 %v5887_v32  ;;  %v5897_v34 = vpack.c.bf16 %v1260_v33, %v1259_v36 }
0x1125   :  { %5115 = vmatprep.subr.bf16.mxu1 %v5519_v15 }
0x1128   :  { %5117 = vmatpush3.bf16.msra.mxu1 %v5897_v34 }
0x1129   :  { %5124 = vmatprep.subr.bf16.mxu1 %v5519_v15 }
0x11ee   :  { %v983_v5 = vpop.f32.mrb[8].mxu1 }
0x11ef   :  { %v987_v6 = vadd.f32 %v983_v5, %v5852_v4  ;;  %v4698_v7 = vpop.f32.mrb[9].mxu1 }
0x11f1   :  { %v988_v8 = vmul.f32 %v987_v6, %v5753_v48 }
0x11f3   :  { %v4322_v9 = vmul.f32 -1.442695, %v988_v8 }
0x11f5   :  { %5338 = vpow2.f32 %v4322_v9 }
0x11f6   :  { %v4720_v43 = vpop.f32.mrb[10].mxu1 }
0x11f7   :  { %v1204_v46 = vpop.f32.mrb[11].mxu1  ;;  %v5929_v51 = vadd.f32 %v4720_v43, %v4327_v41 }
0x11f8   :  { %v5909_v47 = vadd.f32 %v4327_v41, %v1204_v46 }
0x11f9   :  { %v1232_v44 = vcombine.high %v5929_v51, %v5929_v51 }
0x11fb   :  { %v1246_v54 = vrot.slane %v1232_v44, %v5690_v25 }
0x11fd   :  { %v1248_v55 = vcombine.high %v1246_v54, %v1246_v54 }
0x11ff   :  { %v5339_v10 = vpop.eup %5338 }
0x1200   :  { %v992_v11 = vadd.f32 1.0, %v5339_v10 }
0x1202   :  { %5340 = vrcp.f32 %v992_v11 }
0x120c   :  { %v5341_v12 = vpop.eup %5340 }
0x120d   :  { %v995_v13 = vmul.f32 2.0, %v5341_v12 }
0x120f   :  { %v4323_v35 = vadd.f32 -1.0, %v995_v13 }
0x1211   :  { %v997_v42 = vsel %vm5745_vm4, %v4323_v35, %v5341_v12 }
0x1212   :  { %1000 = vrot.lane.b32.xlu1 %v997_v42, %s5523_s29  ;;  %v998_v17 = vmul.f32 %v997_v42, %v902_v62 }
0x1284   :  { %v1001_v14 = vpop.permute.xlu1 %1000 }
0x1285   :  { %v1003_v16 = vmul.f32 %v1001_v14, %v997_v42 }
0x1287   :  { %1005 = vrot.lane.b32.xlu0 %v1003_v16, %s5524_s30 }
0x12f9   :  { %v1006_v18 = vpop.permute.xlu0 %1005 }
0x12fa   :  { %v5860_v19 = vadd.f32 %v1006_v18, %v998_v17 }
0x12fc   :  { %5342 = vtanh.f32 %v5860_v19 }
0x1306   :  { %v5343_v29 = vpop.eup %5342 }
0x1307   :  { %1011 = vrot.lane.b32.xlu1 %v5343_v29, %s5523_s29 }
0x1379   :  { %v1012_v38 = vpop.permute.xlu1 %1011 }
0x137a   :  { %v1014_v39 = vmul.f32 %v1012_v38, %v997_v42 }
0x137c   :  { %1016 = vrot.lane.b32.xlu0 %v1014_v39, %s5524_s30  ;;  %v1239_v39 = vrot.slane %v5929_v51, %v5690_v25 }
0x1380   :  { %1348 = vrot.lane.b32.xlu0 %v1262_v40, %s5524_s30  ;;  %v1247_v40 = vcombine.high %v1239_v39, %v1239_v39 }
0x13ee   :  { %v1017_v49 = vpop.permute.xlu0 %1016 }
0x13ef   :  { %1020 = vst.msk [vmem:[#allocation2 + $0xc] sm:$0x3] %vm383_vm5, %v1017_v49  ;;  %4708 = vmatmul.mubr.msk.f32.vlgmr.msra.gmra.mrb[6].mxu0 %vm142_vm1, %v1017_v49 }
0x13f0   :  { %5108 = vmatpush3.bf16.msra.mxu0 %v5887_v32  ;;  %4729 = vmatprep.mubr.msk.f32.mxu0 %vm5520_vm0, %v5521_v28 }
0x13f1   :  { %5109 = vmatprep.subr.bf16.mxu0 %v5519_v15 }
0x13f2   :  { %v1349_v3 = vpop.permute.xlu0 %1348 }
0x13f4   :  { %5111 = vmatpush3.bf16.msra.mxu0 %v5897_v34 }
0x13f5   :  { %5118 = vmatprep.subr.bf16.mxu0 %v5519_v15 }
0x13f7   :  { %4730 = vmatmul.mubr.msk.f32.vlgmr.msra.gmra.mrb[8].mxu0 %vm142_vm1, %v1261_v50 }
0x13f8   :  { %5120 = vmatpush3.bf16.msra.mxu0 %v5887_v32  ;;  %4751 = vmatprep.mubr.msk.f32.mxu0 %vm5520_vm0, %v5521_v28 }
0x13f9   :  { %5121 = vmatprep.subr.bf16.mxu0 %v5519_v15 }
0x13fc   :  { %5123 = vmatpush3.bf16.msra.mxu0 %v5897_v34 }
0x13fd   :  { %5130 = vmatprep.subr.bf16.mxu0 %v5519_v15 }
0x14c2   :  { %v5933_v52 = vpop.f32.mrb[6].mxu0 }
0x14c3   :  { %v4709_v53 = vpop.f32.mrb[7].mxu0 }
0x14ca   :  { %v1332_v27 = vpop.f32.mrb[8].mxu0 }
0x14cb   :  { %v1336_v56 = vadd.f32 %v1332_v27, %v1248_v55  ;;  %v4731_v57 = vpop.f32.mrb[9].mxu0 }
0x14cd   :  { %v1337_v58 = vmul.f32 %v1336_v56, %v5753_v48 }
0x14cf   :  { %v4331_v37 = vmul.f32 -1.442695, %v1337_v58 }
0x14d1   :  { %5344 = vpow2.f32 %v4331_v37 }
0x14db   :  { %v5345_v59 = vpop.eup %5344 }
0x14dc   :  { %v1341_v60 = vadd.f32 1.0, %v5345_v59 }
0x14de   :  { %5346 = vrcp.f32 %v1341_v60 }
0x14e8   :  { %v5347_v61 = vpop.eup %5346 }
0x14e9   :  { %v1344_v62 = vmul.f32 2.0, %v5347_v61 }
0x14eb   :  { %v4332_v63 = vadd.f32 -1.0, %v1344_v62 }
0x14ed   :  { %v1346_v0 = vsel %vm5745_vm4, %v4332_v63, %v5347_v61 }
0x14ee   :  { %1353 = vrot.lane.b32.xlu1 %v1346_v0, %s5523_s29  ;;  %v1351_v5 = vmul.f32 %v1349_v3, %v1346_v0 }
0x1560   :  { %v1354_v1 = vpop.permute.xlu1 %1353 }
0x1561   :  { %v1356_v2 = vmul.f32 %v1354_v1, %v1346_v0 }
0x1563   :  { %1358 = vrot.lane.b32.xlu1 %v1356_v2, %s5524_s30 }
0x15d5   :  { %v1359_v6 = vpop.permute.xlu1 %1358 }
0x15d6   :  { %v1361_v7 = vadd.f32 %v1359_v6, %v1351_v5 }
0x15d8   :  { %5348 = vtanh.f32 %v1361_v7 }
0x15e2   :  { %v5349_v8 = vpop.eup %5348 }
0x15e3   :  { %1364 = vrot.lane.b32.xlu0 %v5349_v8, %s5523_s29 }
0x1655   :  { %v1365_v9 = vpop.permute.xlu0 %1364 }
0x1656   :  { %v1367_v10 = vmul.f32 %v1365_v9, %v1346_v0 }
0x1658   :  { %1369 = vrot.lane.b32.xlu1 %v1367_v10, %s5524_s30 }
0x16ca   :  { %v1370_v11 = vpop.permute.xlu1 %1369 }
0x16cb   :  { %1373 = vst.msk [vmem:[#allocation2 + $0x1e] sm:$0x3] %vm383_vm5, %v1370_v11  ;;  %4741 = vmatmul.mubr.msk.f32.vlgmr.msra.gmra.mrb[12].mxu1 %vm142_vm1, %v1370_v11 }
0x16cc   :  { %5126 = vmatpush3.bf16.msra.mxu1 %v5887_v32  ;;  %4762 = vmatprep.mubr.msk.f32.mxu1 %vm5520_vm0, %v5521_v28 }
0x16cd   :  { %5127 = vmatprep.subr.bf16.mxu1 %v5519_v15 }
0x16d0   :  { %5129 = vmatpush3.bf16.msra.mxu1 %v5897_v34 }
0x16d1   :  { %5136 = vmatprep.subr.bf16.mxu1 %v5519_v15 }
0x179e   :  { %v1442_v12 = vpop.f32.mrb[12].mxu1 }
0x179f   :  { %v1446_v13 = vadd.f32 %v1442_v12, %v1246_v54  ;;  %v4742_v35 = vpop.f32.mrb[13].mxu1 }
0x17a1   :  { %v1447_v42 = vmul.f32 %v1446_v13, %v5753_v48 }
0x17a3   :  { %v4334_v14 = vmul.f32 -1.442695, %v1447_v42 }
0x17a5   :  { %5350 = vpow2.f32 %v4334_v14 }
0x17af   :  { %v5351_v16 = vpop.eup %5350 }
0x17b0   :  { %v1451_v17 = vadd.f32 1.0, %v5351_v16 }
0x17b2   :  { %5352 = vrcp.f32 %v1451_v17 }
0x17bc   :  { %v5353_v18 = vpop.eup %5352 }
0x17bd   :  { %v1454_v20 = vmul.f32 2.0, %v5353_v18 }
0x17bf   :  { %v4335_v21 = vadd.f32 -1.0, %v1454_v20 }
0x17c1   :  { %v1456_v22 = vsel %vm5745_vm4, %v4335_v21, %v5353_v18  ;;  %v1215_v21 = vcombine.high %v5909_v47, %v5909_v47 }
0x17c2   :  { %1459 = vrot.lane.b32.xlu0 %v1456_v22, %s5523_s29  ;;  %v1457_v26 = vmul.f32 %v1456_v22, %v1361_v7 }
0x1834   :  { %v1460_v23 = vpop.permute.xlu0 %1459 }
0x1835   :  { %v1462_v24 = vmul.f32 %v1460_v23, %v1456_v22 }
0x1837   :  { %1464 = vrot.lane.b32.xlu1 %v1462_v24, %s5524_s30 }
0x18a9   :  { %v1465_v29 = vpop.permute.xlu1 %1464 }
0x18aa   :  { %v1467_v30 = vadd.f32 %v1465_v29, %v1457_v26 }
0x18ac   :  { %5354 = vtanh.f32 %v1467_v30 }
0x18b6   :  { %v5355_v31 = vpop.eup %5354 }
0x18b7   :  { %1470 = vrot.lane.b32.xlu0 %v5355_v31, %s5523_s29 }
0x1929   :  { %v1471_v36 = vpop.permute.xlu0 %1470 }
0x192a   :  { %v1473_v33 = vmul.f32 %v1471_v36, %v1456_v22  ;;  %v1229_v22 = vrot.slane %v1215_v21, %v5690_v25 }
0x192c   :  { %1475 = vrot.lane.b32.xlu1 %v1473_v33, %s5524_s30  ;;  %v1231_v23 = vcombine.high %v1229_v22, %v1229_v22 }
0x199e   :  { %v1476_v38 = vpop.permute.xlu1 %1475 }
0x199f   :  { %1479 = vst.msk [vmem:[#allocation2 + $0x1c] sm:$0x3] %vm383_vm5, %v1476_v38  ;;  %4752 = vmatmul.mubr.msk.f32.vlgmr.msra.gmra.mrb[10].mxu0 %vm142_vm1, %v1476_v38 }
0x19a0   :  { %5132 = vmatpush3.bf16.msra.mxu0 %v5887_v32  ;;  %4773 = vmatprep.mubr.msk.f32.mxu0 %vm5520_vm0, %v5521_v28 }
0x19a1   :  { %5133 = vmatprep.subr.bf16.mxu0 %v5519_v15 }
0x19a4   :  { %5135 = vmatpush3.bf16.msra.mxu0 %v5897_v34 }
0x19a5   :  { %5142 = vmatprep.subr.bf16.mxu0 %v5519_v15 }
0x1a72   :  { %v1548_v41 = vpop.f32.mrb[10].mxu0 }
0x1a73   :  { %v1552_v43 = vadd.f32 %v1548_v41, %v1247_v40  ;;  %v4753_v46 = vpop.f32.mrb[11].mxu0 }
0x1a75   :  { %v1553_v49 = vmul.f32 %v1552_v43, %v5753_v48 }
0x1a77   :  { %v4337_v50 = vmul.f32 -1.442695, %v1553_v49 }
0x1a79   :  { %5356 = vpow2.f32 %v4337_v50 }
0x1a83   :  { %v5357_v44 = vpop.eup %5356 }
0x1a84   :  { %v1557_v53 = vadd.f32 1.0, %v5357_v44 }
0x1a86   :  { %5358 = vrcp.f32 %v1557_v53 }
0x1a90   :  { %v5359_v54 = vpop.eup %5358 }
0x1a91   :  { %v1560_v55 = vmul.f32 2.0, %v5359_v54 }
0x1a93   :  { %v4338_v27 = vadd.f32 -1.0, %v1560_v55 }
0x1a95   :  { %v1562_v56 = vsel %vm5745_vm4, %v4338_v27, %v5359_v54 }
0x1a96   :  { %1565 = vrot.lane.b32.xlu0 %v1562_v56, %s5523_s29  ;;  %v1563_v58 = vmul.f32 %v1562_v56, %v1467_v30 }
0x1b08   :  { %v1566_v51 = vpop.permute.xlu0 %1565 }
0x1b09   :  { %v1568_v57 = vmul.f32 %v1566_v51, %v1562_v56 }
0x1b0b   :  { %1570 = vrot.lane.b32.xlu1 %v1568_v57, %s5524_s30 }
0x1b7d   :  { %v1571_v37 = vpop.permute.xlu1 %1570 }
0x1b7e   :  { %v1573_v59 = vadd.f32 %v1571_v37, %v1563_v58 }
0x1b80   :  { %5360 = vtanh.f32 %v1573_v59 }
0x1b8a   :  { %v5361_v60 = vpop.eup %5360 }
0x1b8b   :  { %1576 = vrot.lane.b32.xlu0 %v5361_v60, %s5523_s29 }
0x1bfd   :  { %v1577_v61 = vpop.permute.xlu0 %1576 }
0x1bfe   :  { %v1579_v62 = vmul.f32 %v1577_v61, %v1562_v56 }
0x1c00   :  { %1581 = vrot.lane.b32.xlu1 %v1579_v62, %s5524_s30 }
0x1c72   :  { %v1582_v63 = vpop.permute.xlu1 %1581 }
0x1c73   :  { %1585 = vst.msk [vmem:[#allocation2 + $0x1a] sm:$0x3] %vm383_vm5, %v1582_v63  ;;  %4763 = vmatmul.mubr.msk.f32.vlgmr.msra.gmra.mrb[14].mxu1 %vm142_vm1, %v1582_v63 }
0x1c74   :  { %5138 = vmatpush3.bf16.msra.mxu1 %v5887_v32  ;;  %4784 = vmatprep.mubr.msk.f32.mxu1 %vm5520_vm0, %v5521_v28 }
0x1c75   :  { %5139 = vmatprep.subr.bf16.mxu1 %v5519_v15 }
0x1c78   :  { %5141 = vmatpush3.bf16.msra.mxu1 %v5897_v34 }
0x1c79   :  { %5148 = vmatprep.subr.bf16.mxu1 %v5519_v15 }
0x1d46   :  { %v1654_v0 = vpop.f32.mrb[14].mxu1 }
0x1d47   :  { %v1658_v1 = vadd.f32 %v1654_v0, %v1239_v39  ;;  %v4764_v2 = vpop.f32.mrb[15].mxu1 }
0x1d49   :  { %v1659_v3 = vmul.f32 %v1658_v1, %v5753_v48 }
0x1d4b   :  { %v4340_v5 = vmul.f32 -1.442695, %v1659_v3 }
0x1d4d   :  { %5362 = vpow2.f32 %v4340_v5 }
0x1d57   :  { %v5363_v6 = vpop.eup %5362 }
0x1d58   :  { %v1663_v7 = vadd.f32 1.0, %v5363_v6 }
0x1d5a   :  { %5364 = vrcp.f32 %v1663_v7 }
0x1d64   :  { %v5365_v8 = vpop.eup %5364 }
0x1d65   :  { %v1666_v9 = vmul.f32 2.0, %v5365_v8 }
0x1d67   :  { %v4341_v10 = vadd.f32 -1.0, %v1666_v9  ;;  %v1222_v9 = vrot.slane %v5909_v47, %v5690_v25 }
0x1d69   :  { %v1668_v11 = vsel %vm5745_vm4, %v4341_v10, %v5365_v8  ;;  %v1230_v10 = vcombine.high %v1222_v9, %v1222_v9 }
0x1d6a   :  { %1671 = vrot.lane.b32.xlu0 %v1668_v11, %s5523_s29  ;;  %v1669_v35 = vmul.f32 %v1668_v11, %v1573_v59 }
0x1ddc   :  { %v1672_v12 = vpop.permute.xlu0 %1671 }
0x1ddd   :  { %v1674_v13 = vmul.f32 %v1672_v12, %v1668_v11 }
0x1ddf   :  { %1676 = vrot.lane.b32.xlu1 %v1674_v13, %s5524_s30 }
0x1e51   :  { %v1677_v42 = vpop.permute.xlu1 %1676 }
0x1e52   :  { %v1679_v14 = vadd.f32 %v1677_v42, %v1669_v35 }
0x1e54   :  { %5366 = vtanh.f32 %v1679_v14 }
0x1e5e   :  { %v5367_v16 = vpop.eup %5366 }
0x1e5f   :  { %1682 = vrot.lane.b32.xlu0 %v5367_v16, %s5523_s29 }
0x1ed1   :  { %v1683_v17 = vpop.permute.xlu0 %1682 }
0x1ed2   :  { %v1685_v18 = vmul.f32 %v1683_v17, %v1668_v11 }
0x1ed4   :  { %1687 = vrot.lane.b32.xlu1 %v1685_v18, %s5524_s30 }
0x1f46   :  { %v1688_v20 = vpop.permute.xlu1 %1687 }
0x1f47   :  { %1691 = vst.msk [vmem:[#allocation2 + $0x18] sm:$0x3] %vm383_vm5, %v1688_v20  ;;  %4774 = vmatmul.mubr.msk.f32.vlgmr.msra.gmra.mrb[12].mxu0 %vm142_vm1, %v1688_v20 }
0x1f48   :  { %5144 = vmatpush3.bf16.msra.mxu0 %v5887_v32  ;;  %4795 = vmatprep.mubr.msk.f32.mxu0 %vm5520_vm0, %v5521_v28 }
0x1f49   :  { %5145 = vmatprep.subr.bf16.mxu0 %v5519_v15 }
0x1f4c   :  { %5147 = vmatpush3.bf16.msra.mxu0 %v5897_v34 }
0x201a   :  { %v1760_v24 = vpop.f32.mrb[12].mxu0 }
0x201b   :  { %v1764_v26 = vadd.f32 %v1760_v24, %v1231_v23  ;;  %v4775_v29 = vpop.f32.mrb[13].mxu0 }
0x201d   :  { %v1765_v30 = vmul.f32 %v1764_v26, %v5753_v48 }
0x201f   :  { %v4343_v31 = vmul.f32 -1.442695, %v1765_v30  ;;  %v257_v30 = vcombine.high %v5852_v4, %v5852_v4 }
0x2021   :  { %5368 = vpow2.f32 %v4343_v31  ;;  %v1093_v31 = vadd.f32 %v5933_v52, %v257_v30 }
0x202b   :  { %v5369_v36 = vpop.eup %5368 }
0x202c   :  { %v1769_v33 = vadd.f32 1.0, %v5369_v36  ;;  %v1094_v36 = vmul.f32 %v1093_v31, %v5753_v48  ;;  %v2353_v31 = vld [vmem:[%s6539_s12] sm:$0xff] }
0x202e   :  { %5370 = vrcp.f32 %v1769_v33  ;;  %v4325_v33 = vmul.f32 -1.442695, %v1094_v36  ;;  %v2354_v36 = vld [vmem:[%s6539_s12 + $0x8] sm:$0xff] }
0x2038   :  { %v5371_v38 = vpop.eup %5370 }
0x2039   :  { %v1772_v39 = vmul.f32 2.0, %v5371_v38 }
0x203b   :  { %v4344_v40 = vadd.f32 -1.0, %v1772_v39 }
0x203d   :  { %v1774_v41 = vsel %vm5745_vm4, %v4344_v40, %v5371_v38 }
0x203e   :  { %1777 = vrot.lane.b32.xlu0 %v1774_v41, %s5523_s29  ;;  %v1775_v49 = vmul.f32 %v1774_v41, %v1679_v14 }
0x20b0   :  { %v1778_v43 = vpop.permute.xlu0 %1777 }
0x20b1   :  { %v1780_v46 = vmul.f32 %v1778_v43, %v1774_v41 }
0x20b3   :  { %1782 = vrot.lane.b32.xlu1 %v1780_v46, %s5524_s30 }
0x2125   :  { %v1783_v50 = vpop.permute.xlu1 %1782 }
0x2126   :  { %v1785_v44 = vadd.f32 %v1783_v50, %v1775_v49 }
0x2128   :  { %5372 = vtanh.f32 %v1785_v44 }
0x2132   :  { %v5373_v53 = vpop.eup %5372 }
0x2133   :  { %1788 = vrot.lane.b32.xlu0 %v5373_v53, %s5523_s29 }
0x21a5   :  { %v1789_v54 = vpop.permute.xlu0 %1788 }
0x21a6   :  { %v1791_v55 = vmul.f32 %v1789_v54, %v1774_v41 }
0x21a8   :  { %1793 = vrot.lane.b32.xlu1 %v1791_v55, %s5524_s30 }
0x221a   :  { %v1794_v27 = vpop.permute.xlu1 %1793 }
0x221b   :  { %1797 = vst.msk [vmem:[#allocation2 + $0x16] sm:$0x3] %vm383_vm5, %v1794_v27  ;;  %4785 = vmatmul.mubr.msk.f32.vlgmr.msra.gmra.mrb[16].mxu1 %vm142_vm1, %v1794_v27 }
0x221c   :  { %5150 = vmatpush3.bf16.msra.mxu1 %v5887_v32  ;;  %4806 = vmatprep.mubr.msk.f32.mxu1 %vm5520_vm0, %v5521_v28 }
0x221d   :  { %5151 = vmatprep.subr.bf16.mxu1 %v5519_v15 }
0x2220   :  { %5153 = vmatpush3.bf16.msra.mxu1 %v5897_v34 }
0x2221   :  { %5170 = vmatprep.subr.bf16.mxu1 %v5519_v15 }
0x22ee   :  { %v1866_v56 = vpop.f32.mrb[16].mxu1 }
0x22ef   :  { %v1870_v51 = vadd.f32 %v1866_v56, %v1229_v22  ;;  %v4786_v57 = vpop.f32.mrb[17].mxu1 }
0x22f1   :  { %v1871_v58 = vmul.f32 %v1870_v51, %v5753_v48 }
0x22f3   :  { %v4346_v37 = vmul.f32 -1.442695, %v1871_v58 }
0x22f5   :  { %5374 = vpow2.f32 %v4346_v37 }
0x22ff   :  { %v5375_v59 = vpop.eup %5374 }
0x2300   :  { %v1875_v60 = vadd.f32 1.0, %v5375_v59 }
0x2302   :  { %5376 = vrcp.f32 %v1875_v60 }
0x230c   :  { %v5377_v32 = vpop.eup %5376 }
0x230d   :  { %v1878_v61 = vmul.f32 2.0, %v5377_v32 }
0x230f   :  { %v4347_v62 = vadd.f32 -1.0, %v1878_v61 }
0x2311   :  { %v1880_v63 = vsel %vm5745_vm4, %v4347_v62, %v5377_v32 }
0x2312   :  { %1883 = vrot.lane.b32.xlu0 %v1880_v63, %s5523_s29  ;;  %v1881_v1 = vmul.f32 %v1880_v63, %v1785_v44 }
0x2384   :  { %v1884_v34 = vpop.permute.xlu0 %1883 }
0x2385   :  { %v1886_v0 = vmul.f32 %v1884_v34, %v1880_v63 }
0x2387   :  { %1888 = vrot.lane.b32.xlu1 %v1886_v0, %s5524_s30 }
0x23f9   :  { %v1889_v2 = vpop.permute.xlu1 %1888 }
0x23fa   :  { %v1891_v3 = vadd.f32 %v1889_v2, %v1881_v1  ;;  %v2127_v1 = vld [vmem:[#allocation2 + $0x16] sm:$0x3]  ;;  %v2129_v2 = vld [vmem:[#allocation2 + $0x1a] sm:$0x3] }
0x23fc   :  { %5378 = vtanh.f32 %v1891_v3 }
0x2406   :  { %v5379_v5 = vpop.eup %5378 }
0x2407   :  { %1894 = vrot.lane.b32.xlu0 %v5379_v5, %s5523_s29 }
0x2479   :  { %v1895_v6 = vpop.permute.xlu0 %1894 }
0x247a   :  { %v1897_v7 = vmul.f32 %v1895_v6, %v1880_v63 }
0x247c   :  { %1899 = vrot.lane.b32.xlu1 %v1897_v7, %s5524_s30 }
0x24ee   :  { %v1900_v8 = vpop.permute.xlu1 %1899 }
0x24ef   :  { %1903 = vst.msk [vmem:[#allocation2 + $0x14] sm:$0x3] %vm383_vm5, %v1900_v8  ;;  %4796 = vmatmul.mubr.msk.f32.vlgmr.msra.gmra.mrb[14].mxu0 %vm142_vm1, %v1900_v8 }
0x25c2   :  { %v1972_v11 = vpop.f32.mrb[14].mxu0 }
0x25c3   :  { %v1976_v12 = vadd.f32 %v1972_v11, %v1230_v10  ;;  %v4797_v13 = vpop.f32.mrb[15].mxu0 }
0x25c5   :  { %v1977_v35 = vmul.f32 %v1976_v12, %v5753_v48 }
0x25c7   :  { %v4349_v42 = vmul.f32 -1.442695, %v1977_v35  ;;  %v2172_v35 = vld [vmem:[%s6538_s11] sm:$0xff] }
0x25c9   :  { %5380 = vpow2.f32 %v4349_v42  ;;  %v2173_v42 = vld [vmem:[%s6538_s11 + $0x8] sm:$0xff] }
0x25d3   :  { %v5381_v14 = vpop.eup %5380 }
0x25d4   :  { %v1981_v16 = vadd.f32 1.0, %v5381_v14  ;;  %v2174_v14 = vld [vmem:[%s6538_s11 + $0x10] sm:$0xff] }
0x25d6   :  { %5382 = vrcp.f32 %v1981_v16  ;;  %v5154_v16 = vpack.c.bf16 %v2173_v42, %v2172_v35 }
0x25d8   :  { %5155 = vmatprep.subr.bf16.mxu0 %v5154_v16 }
0x25d9   :  { %5157 = vmatpush3.bf16.msra.mxu0 %v5154_v16 }
0x25e0   :  { %v5383_v17 = vpop.eup %5382 }
0x25e1   :  { %v1984_v18 = vmul.f32 2.0, %v5383_v17 }
0x25e3   :  { %v4350_v20 = vadd.f32 -1.0, %v1984_v18 }
0x25e5   :  { %v1986_v21 = vsel %vm5745_vm4, %v4350_v20, %v5383_v17  ;;  %v2175_v17 = vld [vmem:[%s6538_s11 + $0x18] sm:$0xff]  ;;  %v2126_v20 = vld [vmem:[#allocation2 + $0x14] sm:$0x3] }
0x25e6   :  { %1989 = vrot.lane.b32.xlu0 %v1986_v21, %s5523_s29  ;;  %v1987_v23 = vmul.f32 %v1986_v21, %v1891_v3  ;;  %v2131_v3 = vld [vmem:[#allocation2 + $0x1e] sm:$0x3]  ;;  %v5158_v18 = vpack.c.bf16 %v2175_v17, %v2174_v14  ;;  %v4354_v14 = vld [vmem:[%s6540_s13] ss:$0 sm:$0xff] }
0x25e8   :  { %5159 = vmatprep.subr.bf16.mxu0 %v5158_v18 }
0x25e9   :  { %5161 = vmatpush3.bf16.msra.mxu0 %v5158_v18 }
0x2658   :  { %v1990_v47 = vpop.permute.xlu0 %1989 }
0x2659   :  { %v1992_v22 = vmul.f32 %v1990_v47, %v1986_v21  ;;  %v2176_v47 = vld [vmem:[%s6538_s11 + $0x20] sm:$0xff] }
0x265b   :  { %1994 = vrot.lane.b32.xlu1 %v1992_v22, %s5524_s30  ;;  %v2177_v22 = vld [vmem:[%s6538_s11 + $0x28] sm:$0xff] }
0x26cd   :  { %v1995_v24 = vpop.permute.xlu1 %1994 }
0x26ce   :  { %v6031_v26 = vadd.f32 %v1995_v24, %v1987_v23  ;;  %v5162_v23 = vpack.c.bf16 %v2177_v22, %v2176_v47 }
0x26d0   :  { %5384 = vtanh.f32 %v6031_v26  ;;  %5163 = vmatprep.subr.bf16.mxu0 %v5162_v23 }
0x26d1   :  { %5386 = vpow2.f32 %v4325_v33  ;;  %5165 = vmatpush3.bf16.msra.mxu0 %v5162_v23  ;;  %v6097_v33 = vpack.c.bf16 %v2354_v36, %v2353_v31 }
0x26da   :  { %v5385_v29 = vpop.eup %5384 }
0x26db   :  { %2000 = vrot.lane.b32.xlu0 %v5385_v29, %s5523_s29  ;;  %v5387_v38 = vpop.eup %5386  ;;  %v2179_v29 = vld [vmem:[%s6538_s11 + $0x38] sm:$0xff] }
0x26dc   :  { %v1098_v39 = vadd.f32 1.0, %v5387_v38  ;;  %v2355_v38 = vld [vmem:[%s6539_s12 + $0x10] sm:$0xff] }
0x26de   :  { %5388 = vrcp.f32 %v1098_v39  ;;  %v2356_v39 = vld [vmem:[%s6539_s12 + $0x18] sm:$0xff]  ;;  %s5525_s12 = smov [#allocation3]  }
0x26e8   :  { %v5389_v40 = vpop.eup %5388 }
0x26e9   :  { %v1101_v41 = vmul.f32 2.0, %v5389_v40 }
0x26eb   :  { %v4326_v49 = vadd.f32 -1.0, %v1101_v41  ;;  %v2358_v41 = vld [vmem:[%s6542_s15] sm:$0x3] }
0x26ed   :  { %v1103_v50 = vsel %vm5745_vm4, %v4326_v49, %v5389_v40  ;;  %v6108_v40 = vpack.c.bf16 %v2356_v39, %v2355_v38  ;;  %v2130_v49 = vld [vmem:[#allocation2 + $0x1c] sm:$0x3] }
0x26ee   :  { %v1104_v53 = vmul.f32 %v1103_v50, %v5860_v19 }
0x274d   :  { %v2001_v43 = vpop.permute.xlu0 %2000 }
0x274e   :  { %v2003_v46 = vmul.f32 %v2001_v43, %v1986_v21  ;;  %v2128_v21 = vld [vmem:[#allocation2 + $0x18] sm:$0x3] }
0x2750   :  { %2005 = vrot.lane.b32.xlu1 %v2003_v46, %s5524_s30  ;;  %v2357_v46 = vld [vmem:[%s6541_s14] sm:$0x3]  ;;  %s4292_s14 = sshll.u32 %s5525_s12, 4  ;;  %s4293_s14 = int_to_ptr.vmem [resolvable:$true] %s4292_s14 }
0x2751   :  { %s5494_s13 = scalar_lea.vmem %s4293_s14, 32  ;;  %p5499_p1 = scmp.lt.s32.totalorder %s4293_s14, %s4293_s14 }
0x2752   :  { %p5495_p0 = scmp.ne.s32.totalorder %s4293_s14, %s5494_s13  ;;  %p5500_p2 = scmp.lt.s32.totalorder %s5494_s13, %s5494_s13 }
0x2754   :  { %1106 = vrot.lane.b32.xlu1 %v1103_v50, %s5523_s29  ;;  %p5501_p3 = por %p5500_p2, %p5499_p1 }
0x2756   :  { %p5502_p4 = pnand %p5501_p3, %p5495_p0 }
0x27c2   :  { %v2006_v4 = vpop.permute.xlu1 %2005 }
0x27c3   :  { %2009 = vst.msk [vmem:[#allocation2 + $0x12] sm:$0x3] %vm383_vm5, %v2006_v4  ;;  %4807 = vmatmul.mubr.msk.f32.vlgmr.msra.gmra.mrb[18].mxu1 %vm142_vm1, %v2006_v4 }
0x27c4   :  { %4836 = vmatprep.mubr.msk.f32.mxu1 %vm5520_vm0, %v5521_v28  ;;  %5172 = vmatpush3.bf16.msra.mxu1 %v6097_v33 }
0x27c5   :  { %5173 = vmatprep.subr.bf16.mxu1 %v5519_v15 }
0x27c6   :  { %v1107_v52 = vpop.permute.xlu1 %1106 }
0x27c7   :  { %v1109_v44 = vmul.f32 %v1107_v52, %v1103_v50 }
0x27c8   :  { %5175 = vmatpush3.bf16.msra.mxu1 %v6108_v40 }
0x27c9   :  { %1111 = vrot.lane.b32.xlu1 %v1109_v44, %s5524_s30  ;;  %5176 = vmatprep.subr.bf16.mxu1 %v5519_v15 }
0x27ca   :  { %v2125_v0 = vld [vmem:[#allocation2 + $0x12] sm:$0x3] }
0x27cb   :  { %4837 = vmatmul.mubr.msk.f32.vlgmr.msra.gmra.mrb[20].mxu1 %vm142_vm1, %v2357_v46 }
0x27cc   :  { %5178 = vmatpush3.bf16.msra.mxu1 %v6097_v33  ;;  %4847 = vmatprep.mubr.msk.f32.mxu1 %vm5520_vm0, %v5521_v28 }
0x27cd   :  { %5179 = vmatprep.subr.bf16.mxu1 %v5519_v15 }
0x27d0   :  { %5181 = vmatpush3.bf16.msra.mxu1 %v6108_v40 }
0x27d1   :  { %5188 = vmatprep.subr.bf16.mxu1 %v5519_v15 }
0x283b   :  { %v1112_v54 = vpop.permute.xlu1 %1111 }
0x283c   :  { %v1114_v55 = vadd.f32 %v1112_v54, %v1104_v53  ;;  %v2118_v53 = vld [vmem:[#allocation2 + $0x4] sm:$0x3] }
0x283e   :  { %5390 = vtanh.f32 %v1114_v55 }
0x2848   :  { %v5391_v27 = vpop.eup %5390 }
0x2849   :  { %1117 = vrot.lane.b32.xlu1 %v5391_v27, %s5523_s29  ;;  %v2119_v27 = vld [vmem:[#allocation2 + $0x6] sm:$0x3] }
0x2896   :  { %v2078_v56 = vpop.f32.mrb[18].mxu1 }
0x2897   :  { %v2082_v51 = vadd.f32 %v2078_v56, %v1222_v9  ;;  %v4808_v57 = vpop.f32.mrb[19].mxu1 }
0x2899   :  { %v2083_v58 = vmul.f32 %v2082_v51, %v5753_v48  ;;  %v2117_v51 = vld [vmem:[#allocation2 + $0x2] sm:$0x3] }
0x289b   :  { %v4352_v37 = vmul.f32 -1.442695, %v2083_v58  ;;  %v2120_v58 = vld [vmem:[#allocation2 + $0x8] sm:$0x3] }
0x289d   :  { %5392 = vpow2.f32 %v4352_v37 }
0x289e   :  { %v2428_v35 = vpop.f32.mrb[20].mxu1 }
0x289f   :  { %v4838_v42 = vpop.f32.mrb[21].mxu1 }
0x28a7   :  { %v5393_v59 = vpop.eup %5392 }
0x28a8   :  { %v2087_v60 = vadd.f32 1.0, %v5393_v59  ;;  %v2116_v59 = vld [vmem:[#allocation2] sm:$0x3] }
0x28aa   :  { %5394 = vrcp.f32 %v2087_v60 }
0x28b4   :  { %v5395_v32 = vpop.eup %5394 }
0x28b5   :  { %v2090_v61 = vmul.f32 2.0, %v5395_v32 }
0x28b7   :  { %v4353_v62 = vadd.f32 -1.0, %v2090_v61 }
0x28b9   :  { %v2092_v19 = vsel %vm5745_vm4, %v4353_v62, %v5395_v32  ;;  %v2121_v62 = vld [vmem:[#allocation2 + $0xa] sm:$0x3] }
0x28ba   :  { %2095 = vrot.lane.b32.xlu0 %v2092_v19, %s5523_s29  ;;  %v2093_v8 = vmul.f32 %v2092_v19, %v6031_v26  ;;  %v2178_v26 = vld [vmem:[%s6538_s11 + $0x30] sm:$0xff] }
0x28bb   :  { %v1118_v63 = vpop.permute.xlu1 %1117  ;;  %v5166_v30 = vpack.c.bf16 %v2179_v29, %v2178_v26 }
0x28bc   :  { %v1120_v34 = vmul.f32 %v1118_v63, %v1103_v50 }
0x28bd   :  { %5167 = vmatprep.subr.bf16.mxu0 %v5166_v30 }
0x28be   :  { %1122 = vrot.lane.b32.xlu1 %v1120_v34, %s5524_s30  ;;  %5169 = vmatpush3.bf16.msra.mxu0 %v5166_v30 }
0x28bf   :  { %5182 = vmatprep.subr.bf16.mxu0 %v5519_v15 }
0x28c2   :  { %2142 = vrot.lane.b32.xlu1 %v2125_v0, %s5524_s30 }
0x28c6   :  { %2146 = vrot.lane.b32.xlu1 %v2127_v1, %s5524_s30 }
0x28ca   :  { %2150 = vrot.lane.b32.xlu1 %v2129_v2, %s5524_s30 }
0x28ce   :  { %2154 = vrot.lane.b32.xlu1 %v2131_v3, %s5524_s30 }
0x28d2   :  { %2444 = vrot.lane.b32.xlu1 %v2358_v41, %s5524_s30 }
0x292c   :  { %v2096_v5 = vpop.permute.xlu0 %2095 }
0x292d   :  { %v2098_v6 = vmul.f32 %v2096_v5, %v2092_v19  ;;  %v2122_v5 = vld [vmem:[#allocation2 + $0xc] sm:$0x3] }
0x292f   :  { %2100 = vrot.lane.b32.xlu0 %v2098_v6, %s5524_s30 }
0x2930   :  { %v1123_v7 = vpop.permute.xlu1 %1122 }
0x2931   :  { %1126 = vst.msk [vmem:[#allocation2 + $0xe] sm:$0x3] %vm383_vm5, %v1123_v7 }
0x2934   :  { %v2143_v50 = vpop.permute.xlu1 %2142 }
0x2935   :  { %v2165_v60 = vsel %vm142_vm1, %v2117_v51, %v2143_v50 }
0x2938   :  { %v2147_v4 = vpop.permute.xlu1 %2146  ;;  %v2123_v0 = vld [vmem:[#allocation2 + $0xe] sm:$0x3] }
0x2939   :  { %v2167_v56 = vsel %vm142_vm1, %v2119_v27, %v2147_v4 }
0x293c   :  { %v2151_v44 = vpop.permute.xlu1 %2150 }
0x293d   :  { %v2169_v34 = vsel %vm142_vm1, %v2121_v62, %v2151_v44 }
0x29a1   :  { %v2101_v9 = vpop.permute.xlu0 %2100 }
0x29a2   :  { %v2103_v10 = vadd.f32 %v2101_v9, %v2093_v8 }
0x29a4   :  { %5396 = vtanh.f32 %v2103_v10 }
0x29ae   :  { %v5397_v11 = vpop.eup %5396 }
0x29af   :  { %2106 = vrot.lane.b32.xlu0 %v5397_v11, %s5523_s29 }
0x2a21   :  { %v2107_v12 = vpop.permute.xlu0 %2106 }
0x2a22   :  { %v2109_v13 = vmul.f32 %v2107_v12, %v2092_v19  ;;  %v2155_v19 = vpop.permute.xlu1 %2154 }
0x2a23   :  { %v2171_v7 = vsel %vm142_vm1, %v2123_v0, %v2155_v19 }
0x2a24   :  { %2111 = vrot.lane.b32.xlu0 %v2109_v13, %s5524_s30 }
0x2a26   :  { %v2445_v41 = vpop.permute.xlu1 %2444 }
0x2a28   :  { %2144 = vrot.lane.b32.xlu0 %v2126_v20, %s5524_s30 }
0x2a2c   :  { %2148 = vrot.lane.b32.xlu0 %v2128_v21, %s5524_s30 }
0x2a96   :  { %v2112_v24 = vpop.permute.xlu0 %2111 }
0x2a97   :  { %2115 = vst.msk [vmem:[#allocation2 + $0x10] sm:$0x3] %vm383_vm5, %v2112_v24 }
0x2a9a   :  { %v2145_v52 = vpop.permute.xlu0 %2144 }
0x2a9b   :  { %v2166_v55 = vsel %vm142_vm1, %v2118_v53, %v2145_v52 }
0x2a9c   :  { %v2196_v57 = vcombine.low %v2166_v55, %v2167_v56 }
0x2a9e   :  { %v2124_v43 = vld [vmem:[#allocation2 + $0x10] sm:$0x3]  ;;  %v2149_v54 = vpop.permute.xlu0 %2148  ;;  %v2210_v1 = vrot.slane %v2196_v57, %v5690_v25 }
0x2a9f   :  { %2140 = vrot.lane.b32.xlu0 %v2124_v43, %s5524_s30  ;;  %v2168_v32 = vsel %vm142_vm1, %v2120_v58, %v2149_v54 }
0x2aa0   :  { %v2212_v2 = vcombine.low %v2168_v32, %v2169_v34 }
0x2aa2   :  { %v2220_v11 = vrot.slane %v2212_v2, %v5690_v25 }
0x2aa3   :  { %2152 = vrot.lane.b32.xlu0 %v2130_v49, %s5524_s30 }
0x2b11   :  { %v2141_v37 = vpop.permute.xlu0 %2140 }
0x2b12   :  { %v2164_v61 = vsel %vm142_vm1, %v2116_v59, %v2141_v37 }
0x2b13   :  { %v2195_v63 = vcombine.low %v2164_v61, %v2165_v60 }
0x2b15   :  { %v2203_v3 = vrot.slane %v2195_v63, %v5690_v25  ;;  %v2153_v6 = vpop.permute.xlu0 %2152 }
0x2b16   :  { %v2170_v8 = vsel %vm142_vm1, %v2122_v5, %v2153_v6 }
0x2b17   :  { %v6138_v9 = vcombine.low %v2203_v3, %v2210_v1  ;;  %v2213_v10 = vcombine.low %v2170_v8, %v2171_v7 }
0x2b19   :  { %v2227_v12 = vrot.slane %v2213_v10, %v5690_v25  ;;  %4825 = vmatprep.mubr.msk.f32.mxu0 %vm2229_vm6, %v6138_v9 }
0x2b1b   :  { %v6144_v13 = vcombine.low %v2220_v11, %v2227_v12 }
0x2b1d   :  { %4826 = vmatmul.mubr.msk.f32.vlgmr.msra.gmra.mrb[16].mxu0 %vm2229_vm6, %v6144_v13 }
0x2b1e   :  { %5184 = vmatpush3.bf16.msra.mxu0 %v6097_v33  ;;  %4858 = vmatprep.mubr.msk.f32.mxu0 %vm5520_vm0, %v5521_v28 }
0x2b1f   :  { %5185 = vmatprep.subr.bf16.mxu0 %v5519_v15 }
0x2b22   :  { %5187 = vmatpush3.bf16.msra.mxu0 %v6108_v40 }
0x2b23   :  { %5194 = vmatprep.subr.bf16.mxu0 %v5519_v15 }
0x2bf0   :  { %v4827_v16 = vpop.f32.mrb[16].mxu0 }
0x2bf1   :  { %v6157_v17 = vadd.f32 %v4827_v16, %v4354_v14  ;;  %v2300_v18 = vpop.f32.mrb[17].mxu0 }
0x2bf2   :  { %v6159_v20 = vadd.f32 %v4354_v14, %v2300_v18 }
0x2bf4   :  { %v2318_v21 = vrot.slane %v6159_v20, %v5690_v25  ;;  %v2311_v5 = vcombine.high %v6159_v20, %v6159_v20 }
0x2bf6   :  { %v2432_v47 = vadd.f32 %v2428_v35, %v2318_v21  ;;  %v2326_v53 = vcombine.high %v2318_v21, %v2318_v21  ;;  %v2325_v6 = vrot.slane %v2311_v5, %v5690_v25 }
0x2bf8   :  { %v2433_v22 = vmul.f32 %v2432_v47, %v5753_v48 }
0x2bfa   :  { %v4358_v23 = vmul.f32 -1.442695, %v2433_v22 }
0x2bfc   :  { %5398 = vpow2.f32 %v4358_v23 }
0x2c06   :  { %v5399_v24 = vpop.eup %5398 }
0x2c07   :  { %v2437_v26 = vadd.f32 1.0, %v5399_v24 }
0x2c09   :  { %5400 = vrcp.f32 %v2437_v26 }
0x2c13   :  { %v5401_v29 = vpop.eup %5400 }
0x2c14   :  { %v2440_v30 = vmul.f32 2.0, %v5401_v29 }
0x2c16   :  { %v4359_v31 = vadd.f32 -1.0, %v2440_v30 }
0x2c18   :  { %v2442_v36 = vsel %vm5745_vm4, %v4359_v31, %v5401_v29 }
0x2c19   :  { %2449 = vrot.lane.b32.xlu0 %v2442_v36, %s5523_s29  ;;  %v2447_v43 = vmul.f32 %v2445_v41, %v2442_v36 }
0x2c8b   :  { %v2450_v38 = vpop.permute.xlu0 %2449 }
0x2c8c   :  { %v2452_v39 = vmul.f32 %v2450_v38, %v2442_v36 }
0x2c8e   :  { %2454 = vrot.lane.b32.xlu0 %v2452_v39, %s5524_s30 }
0x2d00   :  { %v2455_v46 = vpop.permute.xlu0 %2454 }
0x2d01   :  { %v2457_v49 = vadd.f32 %v2455_v46, %v2447_v43 }
0x2d03   :  { %5402 = vtanh.f32 %v2457_v49 }
0x2d0d   :  { %v5403_v50 = vpop.eup %5402 }
0x2d0e   :  { %2460 = vrot.lane.b32.xlu1 %v5403_v50, %s5523_s29 }
0x2d80   :  { %v2461_v4 = vpop.permute.xlu1 %2460 }
0x2d81   :  { %v2463_v52 = vmul.f32 %v2461_v4, %v2442_v36  ;;  %v2327_v36 = vcombine.high %v2325_v6, %v2325_v6 }
0x2d83   :  { %2465 = vrot.lane.b32.xlu0 %v2463_v52, %s5524_s30 }
0x2df5   :  { %v2466_v44 = vpop.permute.xlu0 %2465 }
0x2df6   :  { %2468 = vst.msk [vmem:[#allocation2] sm:$0x3] %vm383_vm5, %v2466_v44  ;;  %4848 = vmatmul.mubr.msk.f32.vlgmr.msra.gmra.mrb[22].mxu1 %vm142_vm1, %v2466_v44 }
0x2df7   :  { %5190 = vmatpush3.bf16.msra.mxu1 %v6097_v33  ;;  %4869 = vmatprep.mubr.msk.f32.mxu1 %vm5520_vm0, %v5521_v28 }
0x2df8   :  { %5191 = vmatprep.subr.bf16.mxu1 %v5519_v15 }
0x2dfb   :  { %5193 = vmatpush3.bf16.msra.mxu1 %v6108_v40 }
0x2dfc   :  { %5200 = vmatprep.subr.bf16.mxu1 %v5519_v15 }
0x2ec9   :  { %v2537_v54 = vpop.f32.mrb[22].mxu1 }
0x2eca   :  { %v2541_v55 = vadd.f32 %v2537_v54, %v2326_v53  ;;  %v4849_v27 = vpop.f32.mrb[23].mxu1 }
0x2ecc   :  { %v2542_v56 = vmul.f32 %v2541_v55, %v5753_v48 }
0x2ece   :  { %v4361_v51 = vmul.f32 -1.442695, %v2542_v56 }
0x2ed0   :  { %5404 = vpow2.f32 %v4361_v51 }
0x2eda   :  { %v5405_v57 = vpop.eup %5404 }
0x2edb   :  { %v2546_v58 = vadd.f32 1.0, %v5405_v57 }
0x2edd   :  { %5406 = vrcp.f32 %v2546_v58 }
0x2ee7   :  { %v5407_v37 = vpop.eup %5406 }
0x2ee8   :  { %v2549_v59 = vmul.f32 2.0, %v5407_v37 }
0x2eea   :  { %v4362_v60 = vadd.f32 -1.0, %v2549_v59 }
0x2eec   :  { %v2551_v32 = vsel %vm5745_vm4, %v4362_v60, %v5407_v37  ;;  %v2335_v60 = vrot.slane %v6157_v17, %v5690_v25 }
0x2eed   :  { %2554 = vrot.lane.b32.xlu1 %v2551_v32, %s5523_s29  ;;  %v2552_v19 = vmul.f32 %v2551_v32, %v2457_v49 }
0x2f5f   :  { %v2555_v61 = vpop.permute.xlu1 %2554 }
0x2f60   :  { %v2557_v62 = vmul.f32 %v2555_v61, %v2551_v32 }
0x2f62   :  { %2559 = vrot.lane.b32.xlu0 %v2557_v62, %s5524_s30 }
0x2fd4   :  { %v2560_v63 = vpop.permute.xlu0 %2559 }
0x2fd5   :  { %v2562_v34 = vadd.f32 %v2560_v63, %v2552_v19 }
0x2fd7   :  { %5408 = vtanh.f32 %v2562_v34 }
0x2fe1   :  { %v5409_v0 = vpop.eup %5408 }
0x2fe2   :  { %2565 = vrot.lane.b32.xlu1 %v5409_v0, %s5523_s29 }
0x3054   :  { %v2566_v1 = vpop.permute.xlu1 %2565 }
0x3055   :  { %v2568_v2 = vmul.f32 %v2566_v1, %v2551_v32 }
0x3057   :  { %2570 = vrot.lane.b32.xlu0 %v2568_v2, %s5524_s30 }
0x30c9   :  { %v2571_v3 = vpop.permute.xlu0 %2570 }
0x30ca   :  { %2573 = vst.msk [vmem:[#allocation2 + $0x2] sm:$0x3] %vm383_vm5, %v2571_v3  ;;  %4859 = vmatmul.mubr.msk.f32.vlgmr.msra.gmra.mrb[18].mxu0 %vm142_vm1, %v2571_v3 }
0x30cb   :  { %5196 = vmatpush3.bf16.msra.mxu0 %v6097_v33  ;;  %4880 = vmatprep.mubr.msk.f32.mxu0 %vm5520_vm0, %v5521_v28 }
0x30cc   :  { %5197 = vmatprep.subr.bf16.mxu0 %v5519_v15 }
0x30cf   :  { %5199 = vmatpush3.bf16.msra.mxu0 %v6108_v40 }
0x30d0   :  { %5206 = vmatprep.subr.bf16.mxu0 %v5519_v15 }
0x319d   :  { %v2642_v7 = vpop.f32.mrb[18].mxu0 }
0x319e   :  { %v2646_v8 = vadd.f32 %v2642_v7, %v2325_v6  ;;  %v4860_v10 = vpop.f32.mrb[19].mxu0 }
0x31a0   :  { %v2647_v11 = vmul.f32 %v2646_v8, %v5753_v48 }
0x31a2   :  { %v4364_v12 = vmul.f32 -1.442695, %v2647_v11 }
0x31a4   :  { %5410 = vpow2.f32 %v4364_v12 }
0x31ae   :  { %v5411_v35 = vpop.eup %5410 }
0x31af   :  { %v2651_v42 = vadd.f32 1.0, %v5411_v35 }
0x31b1   :  { %5412 = vrcp.f32 %v2651_v42 }
0x31bb   :  { %v5413_v14 = vpop.eup %5412 }
0x31bc   :  { %v2654_v16 = vmul.f32 2.0, %v5413_v14 }
0x31be   :  { %v4365_v18 = vadd.f32 -1.0, %v2654_v16  ;;  %v2343_v16 = vcombine.high %v2335_v60, %v2335_v60 }
0x31c0   :  { %v2656_v21 = vsel %vm5745_vm4, %v4365_v18, %v5413_v14 }
0x31c1   :  { %2659 = vrot.lane.b32.xlu1 %v2656_v21, %s5523_s29  ;;  %v2657_v22 = vmul.f32 %v2656_v21, %v2562_v34 }
0x3233   :  { %v2660_v20 = vpop.permute.xlu1 %2659 }
0x3234   :  { %v2662_v47 = vmul.f32 %v2660_v20, %v2656_v21 }
0x3236   :  { %2664 = vrot.lane.b32.xlu0 %v2662_v47, %s5524_s30 }
0x32a8   :  { %v2665_v23 = vpop.permute.xlu0 %2664 }
0x32a9   :  { %v2667_v24 = vadd.f32 %v2665_v23, %v2657_v22 }
0x32ab   :  { %5414 = vtanh.f32 %v2667_v24 }
0x32b5   :  { %v5415_v26 = vpop.eup %5414 }
0x32b6   :  { %2670 = vrot.lane.b32.xlu1 %v5415_v26, %s5523_s29 }
0x3328   :  { %v2671_v29 = vpop.permute.xlu1 %2670 }
0x3329   :  { %v2673_v30 = vmul.f32 %v2671_v29, %v2656_v21 }
0x332b   :  { %2675 = vrot.lane.b32.xlu0 %v2673_v30, %s5524_s30 }
0x339d   :  { %v2676_v31 = vpop.permute.xlu0 %2675 }
0x339e   :  { %2678 = vst.msk [vmem:[#allocation2 + $0x4] sm:$0x3] %vm383_vm5, %v2676_v31  ;;  %4870 = vmatmul.mubr.msk.f32.vlgmr.msra.gmra.mrb[24].mxu1 %vm142_vm1, %v2676_v31 }
0x339f   :  { %5202 = vmatpush3.bf16.msra.mxu1 %v6097_v33  ;;  %4891 = vmatprep.mubr.msk.f32.mxu1 %vm5520_vm0, %v5521_v28 }
0x33a0   :  { %5203 = vmatprep.subr.bf16.mxu1 %v5519_v15 }
0x33a3   :  { %5205 = vmatpush3.bf16.msra.mxu1 %v6108_v40 }
0x33a4   :  { %5212 = vmatprep.subr.bf16.mxu1 %v5519_v15 }
0x3471   :  { %v2747_v38 = vpop.f32.mrb[24].mxu1 }
0x3472   :  { %v2751_v39 = vadd.f32 %v2747_v38, %v2327_v36  ;;  %v4871_v41 = vpop.f32.mrb[25].mxu1 }
0x3473   :  { %v3204_v41 = vld [vmem:[%s6543_s16] sm:$0xff] }
0x3474   :  { %v2752_v43 = vmul.f32 %v2751_v39, %v5753_v48 }
0x3476   :  { %v4367_v46 = vmul.f32 -1.442695, %v2752_v43  ;;  %v3205_v43 = vld [vmem:[%s6543_s16 + $0x8] sm:$0xff] }
0x3478   :  { %5416 = vpow2.f32 %v4367_v46  ;;  %v5218_v46 = vpack.c.bf16 %v3205_v43, %v3204_v41 }
0x3482   :  { %v5417_v49 = vpop.eup %5416 }
0x3483   :  { %v2756_v50 = vadd.f32 1.0, %v5417_v49 }
0x3485   :  { %5418 = vrcp.f32 %v2756_v50 }
0x348f   :  { %v5419_v4 = vpop.eup %5418 }
0x3490   :  { %v2759_v52 = vmul.f32 2.0, %v5419_v4 }
0x3492   :  { %v4368_v44 = vadd.f32 -1.0, %v2759_v52  ;;  %v3206_v52 = vld [vmem:[%s6543_s16 + $0x10] sm:$0xff] }
0x3494   :  { %v2761_v53 = vsel %vm5745_vm4, %v4368_v44, %v5419_v4  ;;  %v3207_v44 = vld [vmem:[%s6543_s16 + $0x18] sm:$0xff] }
0x3495   :  { %2764 = vrot.lane.b32.xlu1 %v2761_v53, %s5523_s29  ;;  %v2762_v27 = vmul.f32 %v2761_v53, %v2667_v24 }
0x3507   :  { %v2765_v54 = vpop.permute.xlu1 %2764 }
0x3508   :  { %v2767_v55 = vmul.f32 %v2765_v54, %v2761_v53 }
0x350a   :  { %2769 = vrot.lane.b32.xlu0 %v2767_v55, %s5524_s30  ;;  %v3208_v55 = vld [vmem:[%s6543_s16 + $0x20] sm:$0xff] }
0x357c   :  { %v2770_v56 = vpop.permute.xlu0 %2769 }
0x357d   :  { %v2772_v51 = vadd.f32 %v2770_v56, %v2762_v27  ;;  %v3209_v27 = vld [vmem:[%s6543_s16 + $0x28] sm:$0xff] }
0x357e   :  { %v5226_v56 = vpack.c.bf16 %v3209_v27, %v3208_v55 }
0x357f   :  { %5420 = vtanh.f32 %v2772_v51 }
0x3589   :  { %v5421_v57 = vpop.eup %5420 }
0x358a   :  { %2775 = vrot.lane.b32.xlu1 %v5421_v57, %s5523_s29  ;;  %v3211_v57 = vld [vmem:[%s6543_s16 + $0x38] sm:$0xff] }
0x35fc   :  { %v2776_v58 = vpop.permute.xlu1 %2775 }
0x35fd   :  { %v2778_v37 = vmul.f32 %v2776_v58, %v2761_v53  ;;  %v5222_v53 = vpack.c.bf16 %v3207_v44, %v3206_v52 }
0x35ff   :  { %2780 = vrot.lane.b32.xlu0 %v2778_v37, %s5524_s30 }
0x3671   :  { %v2781_v59 = vpop.permute.xlu0 %2780 }
0x3672   :  { %2783 = vst.msk [vmem:[#allocation2 + $0x6] sm:$0x3] %vm383_vm5, %v2781_v59  ;;  %4881 = vmatmul.mubr.msk.f32.vlgmr.msra.gmra.mrb[20].mxu0 %vm142_vm1, %v2781_v59 }
0x3673   :  { %5208 = vmatpush3.bf16.msra.mxu0 %v6097_v33  ;;  %4902 = vmatprep.mubr.msk.f32.mxu0 %vm5520_vm0, %v5521_v28 }
0x3674   :  { %5209 = vmatprep.subr.bf16.mxu0 %v5519_v15 }
0x3677   :  { %5211 = vmatpush3.bf16.msra.mxu0 %v6108_v40 }
0x3678   :  { %5219 = vmatprep.subr.bf16.mxu0 %v5218_v46 }
0x3745   :  { %v2852_v32 = vpop.f32.mrb[20].mxu0 }
0x3746   :  { %v2856_v61 = vadd.f32 %v2852_v32, %v2335_v60  ;;  %v4882_v62 = vpop.f32.mrb[21].mxu0 }
0x3748   :  { %v2857_v19 = vmul.f32 %v2856_v61, %v5753_v48 }
0x374a   :  { %v4370_v63 = vmul.f32 -1.442695, %v2857_v19 }
0x374c   :  { %5422 = vpow2.f32 %v4370_v63 }
0x3756   :  { %v5423_v34 = vpop.eup %5422 }
0x3757   :  { %v2861_v0 = vadd.f32 1.0, %v5423_v34 }
0x3759   :  { %5424 = vrcp.f32 %v2861_v0 }
0x3763   :  { %v5425_v1 = vpop.eup %5424 }
0x3764   :  { %v2864_v2 = vmul.f32 2.0, %v5425_v1 }
0x3766   :  { %v4371_v3 = vadd.f32 -1.0, %v2864_v2 }
0x3768   :  { %v2866_v5 = vsel %vm5745_vm4, %v4371_v3, %v5425_v1 }
0x3769   :  { %2869 = vrot.lane.b32.xlu1 %v2866_v5, %s5523_s29  ;;  %v2867_v8 = vmul.f32 %v2866_v5, %v2772_v51  ;;  %v3210_v51 = vld [vmem:[%s6543_s16 + $0x30] sm:$0xff] }
0x376a   :  { %v5230_v58 = vpack.c.bf16 %v3211_v57, %v3210_v51 }
0x37db   :  { %v2870_v6 = vpop.permute.xlu1 %2869 }
0x37dc   :  { %v2872_v7 = vmul.f32 %v2870_v6, %v2866_v5 }
0x37de   :  { %2874 = vrot.lane.b32.xlu0 %v2872_v7, %s5524_s30 }
0x3850   :  { %v2875_v10 = vpop.permute.xlu0 %2874 }
0x3851   :  { %v2877_v11 = vadd.f32 %v2875_v10, %v2867_v8 }
0x3853   :  { %5426 = vtanh.f32 %v2877_v11 }
0x385d   :  { %v5427_v12 = vpop.eup %5426 }
0x385e   :  { %2880 = vrot.lane.b32.xlu1 %v5427_v12, %s5523_s29 }
0x38d0   :  { %v2881_v35 = vpop.permute.xlu1 %2880 }
0x38d1   :  { %v2883_v42 = vmul.f32 %v2881_v35, %v2866_v5  ;;  %v3338_v35 = vld [vmem:[%s6544_s17] sm:$0xff] }
0x38d3   :  { %2885 = vrot.lane.b32.xlu0 %v2883_v42, %s5524_s30  ;;  %v3339_v42 = vld [vmem:[%s6544_s17 + $0x8] sm:$0xff] }
0x3945   :  { %v2886_v14 = vpop.permute.xlu0 %2885 }
0x3946   :  { %2888 = vst.msk [vmem:[#allocation2 + $0x8] sm:$0x3] %vm383_vm5, %v2886_v14  ;;  %4892 = vmatmul.mubr.msk.f32.vlgmr.msra.gmra.mrb[26].mxu1 %vm142_vm1, %v2886_v14  ;;  %v6308_v14 = vpack.c.bf16 %v3339_v42, %v3338_v35 }
0x3947   :  { %5214 = vmatpush3.bf16.msra.mxu1 %v6097_v33  ;;  %4913 = vmatprep.mubr.msk.f32.mxu1 %vm5520_vm0, %v5521_v28 }
0x3948   :  { %5215 = vmatprep.subr.bf16.mxu1 %v5519_v15 }
0x394b   :  { %5217 = vmatpush3.bf16.msra.mxu1 %v6108_v40 }
0x394c   :  { %5234 = vmatprep.subr.bf16.mxu1 %v5519_v15 }
0x3a19   :  { %v2957_v18 = vpop.f32.mrb[26].mxu1 }
0x3a1a   :  { %v2961_v21 = vadd.f32 %v2957_v18, %v2343_v16  ;;  %v4893_v20 = vpop.f32.mrb[27].mxu1  ;;  %v3340_v16 = vld [vmem:[%s6544_s17 + $0x10] sm:$0xff]  ;;  %v3341_v18 = vld [vmem:[%s6544_s17 + $0x18] sm:$0xff] }
0x3a1c   :  { %v2962_v47 = vmul.f32 %v2961_v21, %v5753_v48  ;;  %v6318_v21 = vpack.c.bf16 %v3341_v18, %v3340_v16 }
0x3a1e   :  { %v4373_v22 = vmul.f32 -1.442695, %v2962_v47 }
0x3a20   :  { %5428 = vpow2.f32 %v4373_v22  ;;  %v3343_v22 = vld [vmem:[%s6547_s20] sm:$0x3] }
0x3a2a   :  { %v5429_v23 = vpop.eup %5428 }
0x3a2b   :  { %v2966_v24 = vadd.f32 1.0, %v5429_v23 }
0x3a2d   :  { %5430 = vrcp.f32 %v2966_v24  ;;  %v3342_v24 = vld [vmem:[%s6546_s19] sm:$0x3] }
0x3a37   :  { %v5431_v33 = vpop.eup %5430 }
0x3a38   :  { %v2969_v26 = vmul.f32 2.0, %v5431_v33 }
0x3a3a   :  { %v4374_v29 = vadd.f32 -1.0, %v2969_v26 }
0x3a3c   :  { %v2971_v30 = vsel %vm5745_vm4, %v4374_v29, %v5431_v33 }
0x3a3d   :  { %2974 = vrot.lane.b32.xlu1 %v2971_v30, %s5523_s29  ;;  %v2972_v36 = vmul.f32 %v2971_v30, %v2877_v11 }
0x3aaf   :  { %v2975_v40 = vpop.permute.xlu1 %2974 }
0x3ab0   :  { %v2977_v31 = vmul.f32 %v2975_v40, %v2971_v30 }
0x3ab2   :  { %2979 = vrot.lane.b32.xlu0 %v2977_v31, %s5524_s30 }
0x3b24   :  { %v2980_v38 = vpop.permute.xlu0 %2979 }
0x3b25   :  { %v2982_v39 = vadd.f32 %v2980_v38, %v2972_v36 }
0x3b27   :  { %5432 = vtanh.f32 %v2982_v39 }
0x3b31   :  { %v5433_v49 = vpop.eup %5432 }
0x3b32   :  { %2985 = vrot.lane.b32.xlu1 %v5433_v49, %s5523_s29 }
0x3ba4   :  { %v2986_v50 = vpop.permute.xlu1 %2985 }
0x3ba5   :  { %v2988_v4 = vmul.f32 %v2986_v50, %v2971_v30 }
0x3ba7   :  { %2990 = vrot.lane.b32.xlu0 %v2988_v4, %s5524_s30 }
0x3c19   :  { %v2991_v54 = vpop.permute.xlu0 %2990 }
0x3c1a   :  { %2993 = vst.msk [vmem:[#allocation2 + $0xa] sm:$0x3] %vm383_vm5, %v2991_v54  ;;  %4903 = vmatmul.mubr.msk.f32.vlgmr.msra.gmra.mrb[22].mxu0 %vm142_vm1, %v2991_v54 }
0x3c1b   :  { %5221 = vmatpush3.bf16.msra.mxu0 %v5218_v46  ;;  %4932 = vmatprep.mubr.msk.f32.mxu0 %vm2229_vm6, %v6138_v9  ;;  %v2328_v9 = vcombine.high %v6157_v17, %v6157_v17 }
0x3c1c   :  { %5223 = vmatprep.subr.bf16.mxu0 %v5222_v53 }
0x3c1d   :  { %v6285_v37 = vrot.slane %v2328_v9, %v5690_v25 }
0x3c1f   :  { %5225 = vmatpush3.bf16.msra.mxu0 %v5222_v53 }
0x3c20   :  { %5227 = vmatprep.subr.bf16.mxu0 %v5226_v56 }
0x3c23   :  { %5229 = vmatpush3.bf16.msra.mxu0 %v5226_v56 }
0x3c24   :  { %5231 = vmatprep.subr.bf16.mxu0 %v5230_v58 }
0x3c27   :  { %5233 = vmatpush3.bf16.msra.mxu0 %v5230_v58 }
0x3c28   :  { %5246 = vmatprep.subr.bf16.mxu0 %v5519_v15 }
0x3c2a   :  { %4933 = vmatmul.mubr.msk.f32.vlgmr.msra.gmra.mrb[24].mxu0 %vm2229_vm6, %v6144_v13  ;;  %v4381_v13 = vld [vmem:[%s6545_s18] ss:$0 sm:$0xff] }
0x3c2b   :  { %4965 = vmatprep.mubr.msk.f32.mxu0 %vm5520_vm0, %v5521_v28  ;;  %5248 = vmatpush3.bf16.msra.mxu0 %v6308_v14 }
0x3c2c   :  { %5249 = vmatprep.subr.bf16.mxu0 %v5519_v15 }
0x3c2f   :  { %5251 = vmatpush3.bf16.msra.mxu0 %v6318_v21 }
0x3c30   :  { %5258 = vmatprep.subr.bf16.mxu0 %v5519_v15 }
0x3ced   :  { %v3062_v59 = vpop.f32.mrb[22].mxu0 }
0x3cee   :  { %v3066_v60 = vadd.f32 %v3062_v59, %v6285_v37  ;;  %v4904_v32 = vpop.f32.mrb[23].mxu0 }
0x3cf0   :  { %v3067_v61 = vmul.f32 %v3066_v60, %v5753_v48 }
0x3cf2   :  { %v4376_v62 = vmul.f32 -1.442695, %v3067_v61 }
0x3cf4   :  { %5434 = vpow2.f32 %v4376_v62 }
0x3cfd   :  { %v4934_v19 = vpop.f32.mrb[24].mxu0 }
0x3cfe   :  { %v5435_v63 = vpop.eup %5434  ;;  %v3285_v34 = vpop.f32.mrb[25].mxu0  ;;  %v6345_v33 = vadd.f32 %v4934_v19, %v4381_v13 }
0x3cff   :  { %v3071_v0 = vadd.f32 1.0, %v5435_v63  ;;  %v6292_v17 = vadd.f32 %v4381_v13, %v3285_v34 }
0x3d00   :  { %v3313_v26 = vcombine.high %v6345_v33, %v6345_v33  ;;  %v3320_v16 = vrot.slane %v6345_v33, %v5690_v25 }
0x3d01   :  { %5436 = vrcp.f32 %v3071_v0 }
0x3d02   :  { %v3327_v40 = vrot.slane %v3313_v26, %v5690_v25  ;;  %v3328_v18 = vcombine.high %v3320_v16, %v3320_v16 }
0x3d04   :  { %v3329_v31 = vcombine.high %v3327_v40, %v3327_v40 }
0x3d0b   :  { %v5437_v1 = vpop.eup %5436 }
0x3d0c   :  { %v3074_v2 = vmul.f32 2.0, %v5437_v1 }
0x3d0e   :  { %v4377_v3 = vadd.f32 -1.0, %v3074_v2 }
0x3d10   :  { %v3076_v5 = vsel %vm5745_vm4, %v4377_v3, %v5437_v1 }
0x3d11   :  { %3079 = vrot.lane.b32.xlu1 %v3076_v5, %s5523_s29  ;;  %v3077_v8 = vmul.f32 %v3076_v5, %v2982_v39 }
0x3d83   :  { %v3080_v6 = vpop.permute.xlu1 %3079 }
0x3d84   :  { %v3082_v7 = vmul.f32 %v3080_v6, %v3076_v5 }
0x3d86   :  { %3084 = vrot.lane.b32.xlu0 %v3082_v7, %s5524_s30 }
0x3df8   :  { %v3085_v10 = vpop.permute.xlu0 %3084 }
0x3df9   :  { %v6298_v11 = vadd.f32 %v3085_v10, %v3077_v8 }
0x3dfb   :  { %5438 = vtanh.f32 %v6298_v11 }
0x3e05   :  { %v5439_v12 = vpop.eup %5438 }
0x3e06   :  { %3090 = vrot.lane.b32.xlu1 %v5439_v12, %s5523_s29 }
0x3e78   :  { %v3091_v20 = vpop.permute.xlu1 %3090 }
0x3e79   :  { %v3093_v47 = vmul.f32 %v3091_v20, %v3076_v5 }
0x3e7b   :  { %3095 = vrot.lane.b32.xlu0 %v3093_v47, %s5524_s30 }
0x3e7f   :  { %3429 = vrot.lane.b32.xlu0 %v3343_v22, %s5524_s30 }
0x3eed   :  { %v3096_v23 = vpop.permute.xlu0 %3095 }
0x3eee   :  { %3098 = vst.msk [vmem:[#allocation2 + $0xc] sm:$0x3] %vm383_vm5, %v3096_v23  ;;  %4914 = vmatmul.mubr.msk.f32.vlgmr.msra.gmra.mrb[28].mxu1 %vm142_vm1, %v3096_v23 }
0x3eef   :  { %5236 = vmatpush3.bf16.msra.mxu1 %v6308_v14  ;;  %4943 = vmatprep.mubr.msk.f32.mxu1 %vm5520_vm0, %v5521_v28 }
0x3ef0   :  { %5237 = vmatprep.subr.bf16.mxu1 %v5519_v15 }
0x3ef1   :  { %v3430_v55 = vpop.permute.xlu0 %3429 }
0x3ef3   :  { %5239 = vmatpush3.bf16.msra.mxu1 %v6318_v21 }
0x3ef4   :  { %5240 = vmatprep.subr.bf16.mxu1 %v5519_v15 }
0x3ef6   :  { %4944 = vmatmul.mubr.msk.f32.vlgmr.msra.gmra.mrb[30].mxu1 %vm142_vm1, %v3342_v24 }
0x3ef7   :  { %5242 = vmatpush3.bf16.msra.mxu1 %v6308_v14  ;;  %4954 = vmatprep.mubr.msk.f32.mxu1 %vm5520_vm0, %v5521_v28 }
0x3ef8   :  { %5243 = vmatprep.subr.bf16.mxu1 %v5519_v15 }
0x3efb   :  { %5245 = vmatpush3.bf16.msra.mxu1 %v6318_v21 }
0x3efc   :  { %5252 = vmatprep.subr.bf16.mxu1 %v5519_v15 }
0x3fc1   :  { %v6349_v29 = vpop.f32.mrb[28].mxu1 }
0x3fc2   :  { %v4915_v30 = vpop.f32.mrb[29].mxu1 }
0x3fc9   :  { %v3413_v36 = vpop.f32.mrb[30].mxu1 }
0x3fca   :  { %v3417_v38 = vadd.f32 %v3413_v36, %v3329_v31  ;;  %v4945_v39 = vpop.f32.mrb[31].mxu1 }
0x3fcc   :  { %v3418_v41 = vmul.f32 %v3417_v38, %v5753_v48 }
0x3fce   :  { %v4385_v43 = vmul.f32 -1.442695, %v3418_v41 }
0x3fd0   :  { %5440 = vpow2.f32 %v4385_v43 }
0x3fda   :  { %v5441_v46 = vpop.eup %5440 }
0x3fdb   :  { %v3422_v49 = vadd.f32 1.0, %v5441_v46 }
0x3fdd   :  { %5442 = vrcp.f32 %v3422_v49 }
0x3fe7   :  { %v5443_v50 = vpop.eup %5442 }
0x3fe8   :  { %v3425_v4 = vmul.f32 2.0, %v5443_v50 }
0x3fea   :  { %v4386_v52 = vadd.f32 -1.0, %v3425_v4 }
0x3fec   :  { %v3427_v44 = vsel %vm5745_vm4, %v4386_v52, %v5443_v50 }
0x3fed   :  { %3434 = vrot.lane.b32.xlu1 %v3427_v44, %s5523_s29  ;;  %v3432_v27 = vmul.f32 %v3430_v55, %v3427_v44 }
0x405f   :  { %v3435_v53 = vpop.permute.xlu1 %3434 }
0x4060   :  { %v3437_v54 = vmul.f32 %v3435_v53, %v3427_v44 }
0x4062   :  { %3439 = vrot.lane.b32.xlu1 %v3437_v54, %s5524_s30 }
0x40d4   :  { %v3440_v56 = vpop.permute.xlu1 %3439 }
0x40d5   :  { %v3442_v51 = vadd.f32 %v3440_v56, %v3432_v27 }
0x40d7   :  { %5444 = vtanh.f32 %v3442_v51 }
0x40e1   :  { %v5445_v57 = vpop.eup %5444 }
0x40e2   :  { %3445 = vrot.lane.b32.xlu0 %v5445_v57, %s5523_s29 }
0x4154   :  { %v3446_v58 = vpop.permute.xlu0 %3445 }
0x4155   :  { %v3448_v9 = vmul.f32 %v3446_v58, %v3427_v44 }
0x4157   :  { %3450 = vrot.lane.b32.xlu1 %v3448_v9, %s5524_s30 }
0x41c9   :  { %v3451_v59 = vpop.permute.xlu1 %3450 }
0x41ca   :  { %3453 = vst.msk [vmem:[#allocation2 + $0x1e] sm:$0x3] %vm383_vm5, %v3451_v59  ;;  %4955 = vmatmul.mubr.msk.f32.vlgmr.msra.gmra.mrb[32].mxu1 %vm142_vm1, %v3451_v59 }
0x41cb   :  { %5254 = vmatpush3.bf16.msra.mxu1 %v6308_v14  ;;  %4976 = vmatprep.mubr.msk.f32.mxu1 %vm5520_vm0, %v5521_v28 }
0x41cc   :  { %5255 = vmatprep.subr.bf16.mxu1 %v5519_v15 }
0x41cf   :  { %5257 = vmatpush3.bf16.msra.mxu1 %v6318_v21 }
0x41d0   :  { %5264 = vmatprep.subr.bf16.mxu1 %v5519_v15 }
0x429d   :  { %v3522_v60 = vpop.f32.mrb[32].mxu1 }
0x429e   :  { %v3526_v32 = vadd.f32 %v3522_v60, %v3327_v40  ;;  %v4956_v61 = vpop.f32.mrb[33].mxu1 }
0x42a0   :  { %v3527_v62 = vmul.f32 %v3526_v32, %v5753_v48 }
0x42a2   :  { %v4388_v13 = vmul.f32 -1.442695, %v3527_v62 }
0x42a4   :  { %5446 = vpow2.f32 %v4388_v13 }
0x42ae   :  { %v5447_v19 = vpop.eup %5446 }
0x42af   :  { %v3531_v63 = vadd.f32 1.0, %v5447_v19 }
0x42b1   :  { %5448 = vrcp.f32 %v3531_v63 }
0x42bb   :  { %v5449_v34 = vpop.eup %5448 }
0x42bc   :  { %v3534_v0 = vmul.f32 2.0, %v5449_v34 }
0x42be   :  { %v4389_v1 = vadd.f32 -1.0, %v3534_v0 }
0x42c0   :  { %v3536_v2 = vsel %vm5745_vm4, %v4389_v1, %v5449_v34  ;;  %v3296_v1 = vcombine.high %v6292_v17, %v6292_v17 }
0x42c1   :  { %3539 = vrot.lane.b32.xlu0 %v3536_v2, %s5523_s29  ;;  %v3537_v6 = vmul.f32 %v3536_v2, %v3442_v51 }
0x4333   :  { %v3540_v3 = vpop.permute.xlu0 %3539 }
0x4334   :  { %v3542_v5 = vmul.f32 %v3540_v3, %v3536_v2 }
0x4336   :  { %3544 = vrot.lane.b32.xlu1 %v3542_v5, %s5524_s30 }
0x43a8   :  { %v3545_v7 = vpop.permute.xlu1 %3544 }
0x43a9   :  { %v3547_v8 = vadd.f32 %v3545_v7, %v3537_v6 }
0x43ab   :  { %5450 = vtanh.f32 %v3547_v8 }
0x43b5   :  { %v5451_v10 = vpop.eup %5450 }
0x43b6   :  { %3550 = vrot.lane.b32.xlu0 %v5451_v10, %s5523_s29 }
0x4428   :  { %v3551_v12 = vpop.permute.xlu0 %3550 }
0x4429   :  { %v3553_v35 = vmul.f32 %v3551_v12, %v3536_v2  ;;  %v3310_v2 = vrot.slane %v3296_v1, %v5690_v25  ;;  %v2344_v1 = vcombine.high %v6285_v37, %v6285_v37 }
0x442b   :  { %3555 = vrot.lane.b32.xlu1 %v3553_v35, %s5524_s30  ;;  %v3312_v3 = vcombine.high %v3310_v2, %v3310_v2 }
0x449d   :  { %v3556_v42 = vpop.permute.xlu1 %3555 }
0x449e   :  { %3558 = vst.msk [vmem:[#allocation2 + $0x1c] sm:$0x3] %vm383_vm5, %v3556_v42  ;;  %4966 = vmatmul.mubr.msk.f32.vlgmr.msra.gmra.mrb[26].mxu0 %vm142_vm1, %v3556_v42 }
0x449f   :  { %5260 = vmatpush3.bf16.msra.mxu0 %v6308_v14  ;;  %4987 = vmatprep.mubr.msk.f32.mxu0 %vm5520_vm0, %v5521_v28 }
0x44a0   :  { %5261 = vmatprep.subr.bf16.mxu0 %v5519_v15 }
0x44a3   :  { %5263 = vmatpush3.bf16.msra.mxu0 %v6318_v21 }
0x44a4   :  { %5270 = vmatprep.subr.bf16.mxu0 %v5519_v15 }
0x4571   :  { %v3627_v20 = vpop.f32.mrb[26].mxu0 }
0x4572   :  { %v3631_v47 = vadd.f32 %v3627_v20, %v3328_v18  ;;  %v4967_v22 = vpop.f32.mrb[27].mxu0 }
0x4574   :  { %v3632_v23 = vmul.f32 %v3631_v47, %v5753_v48 }
0x4576   :  { %v4391_v24 = vmul.f32 -1.442695, %v3632_v23 }
0x4578   :  { %5452 = vpow2.f32 %v4391_v24 }
0x4582   :  { %v5453_v26 = vpop.eup %5452 }
0x4583   :  { %v3636_v30 = vadd.f32 1.0, %v5453_v26 }
0x4585   :  { %5454 = vrcp.f32 %v3636_v30 }
0x458f   :  { %v5455_v40 = vpop.eup %5454 }
0x4590   :  { %v3639_v31 = vmul.f32 2.0, %v5455_v40 }
0x4592   :  { %v4392_v36 = vadd.f32 -1.0, %v3639_v31 }
0x4594   :  { %v3641_v38 = vsel %vm5745_vm4, %v4392_v36, %v5455_v40 }
0x4595   :  { %3644 = vrot.lane.b32.xlu0 %v3641_v38, %s5523_s29  ;;  %v3642_v41 = vmul.f32 %v3641_v38, %v3547_v8 }
0x4607   :  { %v3645_v33 = vpop.permute.xlu0 %3644 }
0x4608   :  { %v3647_v39 = vmul.f32 %v3645_v33, %v3641_v38 }
0x460a   :  { %3649 = vrot.lane.b32.xlu1 %v3647_v39, %s5524_s30 }
0x467c   :  { %v3650_v43 = vpop.permute.xlu1 %3649 }
0x467d   :  { %v3652_v46 = vadd.f32 %v3650_v43, %v3642_v41 }
0x467f   :  { %5456 = vtanh.f32 %v3652_v46 }
0x4689   :  { %v5457_v49 = vpop.eup %5456 }
0x468a   :  { %3655 = vrot.lane.b32.xlu0 %v5457_v49, %s5523_s29 }
0x46fc   :  { %v3656_v50 = vpop.permute.xlu0 %3655 }
0x46fd   :  { %v3658_v4 = vmul.f32 %v3656_v50, %v3641_v38 }
0x46ff   :  { %3660 = vrot.lane.b32.xlu1 %v3658_v4, %s5524_s30 }
0x4771   :  { %v3661_v52 = vpop.permute.xlu1 %3660 }
0x4772   :  { %3663 = vst.msk [vmem:[#allocation2 + $0x1a] sm:$0x3] %vm383_vm5, %v3661_v52  ;;  %4977 = vmatmul.mubr.msk.f32.vlgmr.msra.gmra.mrb[34].mxu1 %vm142_vm1, %v3661_v52 }
0x4773   :  { %5266 = vmatpush3.bf16.msra.mxu1 %v6308_v14  ;;  %4998 = vmatprep.mubr.msk.f32.mxu1 %vm5520_vm0, %v5521_v28 }
0x4774   :  { %5267 = vmatprep.subr.bf16.mxu1 %v5519_v15 }
0x4777   :  { %5269 = vmatpush3.bf16.msra.mxu1 %v6318_v21 }
0x4778   :  { %5276 = vmatprep.subr.bf16.mxu1 %v5519_v15 }
0x4845   :  { %v3732_v44 = vpop.f32.mrb[34].mxu1 }
0x4846   :  { %v3736_v53 = vadd.f32 %v3732_v44, %v3320_v16  ;;  %v4978_v54 = vpop.f32.mrb[35].mxu1 }
0x4848   :  { %v3737_v55 = vmul.f32 %v3736_v53, %v5753_v48 }
0x484a   :  { %v4394_v27 = vmul.f32 -1.442695, %v3737_v55 }
0x484c   :  { %5458 = vpow2.f32 %v4394_v27 }
0x4856   :  { %v5459_v56 = vpop.eup %5458 }
0x4857   :  { %v3741_v51 = vadd.f32 1.0, %v5459_v56 }
0x4859   :  { %5460 = vrcp.f32 %v3741_v51 }
0x4863   :  { %v5461_v57 = vpop.eup %5460 }
0x4864   :  { %v3744_v58 = vmul.f32 2.0, %v5461_v57 }
0x4866   :  { %v4395_v9 = vadd.f32 -1.0, %v3744_v58  ;;  %v6444_v58 = vrot.slane %v6292_v17, %v5690_v25 }
0x4868   :  { %v3746_v59 = vsel %vm5745_vm4, %v4395_v9, %v5461_v57  ;;  %v3311_v9 = vcombine.high %v6444_v58, %v6444_v58 }
0x4869   :  { %3749 = vrot.lane.b32.xlu0 %v3746_v59, %s5523_s29  ;;  %v3747_v61 = vmul.f32 %v3746_v59, %v3652_v46 }
0x48db   :  { %v3750_v60 = vpop.permute.xlu0 %3749 }
0x48dc   :  { %v3752_v32 = vmul.f32 %v3750_v60, %v3746_v59 }
0x48de   :  { %3754 = vrot.lane.b32.xlu1 %v3752_v32, %s5524_s30 }
0x4950   :  { %v3755_v62 = vpop.permute.xlu1 %3754 }
0x4951   :  { %v3757_v13 = vadd.f32 %v3755_v62, %v3747_v61 }
0x4953   :  { %5462 = vtanh.f32 %v3757_v13 }
0x495d   :  { %v5463_v19 = vpop.eup %5462 }
0x495e   :  { %3760 = vrot.lane.b32.xlu0 %v5463_v19, %s5523_s29 }
0x49d0   :  { %v3761_v63 = vpop.permute.xlu0 %3760 }
0x49d1   :  { %v3763_v34 = vmul.f32 %v3761_v63, %v3746_v59 }
0x49d3   :  { %3765 = vrot.lane.b32.xlu1 %v3763_v34, %s5524_s30 }
0x4a45   :  { %v3766_v0 = vpop.permute.xlu1 %3765 }
0x4a46   :  { %3768 = vst.msk [vmem:[#allocation2 + $0x18] sm:$0x3] %vm383_vm5, %v3766_v0  ;;  %4988 = vmatmul.mubr.msk.f32.vlgmr.msra.gmra.mrb[28].mxu0 %vm142_vm1, %v3766_v0 }
0x4a47   :  { %5272 = vmatpush3.bf16.msra.mxu0 %v6308_v14  ;;  %5009 = vmatprep.mubr.msk.f32.mxu0 %vm5520_vm0, %v5521_v28 }
0x4a48   :  { %5273 = vmatprep.subr.bf16.mxu0 %v5519_v15 }
0x4a4b   :  { %5275 = vmatpush3.bf16.msra.mxu0 %v6318_v21 }
0x4a4c   :  { %5282 = vmatprep.subr.bf16.mxu0 %v5519_v15 }
0x4b19   :  { %v3837_v5 = vpop.f32.mrb[28].mxu0 }
0x4b1a   :  { %v3841_v6 = vadd.f32 %v3837_v5, %v3312_v3  ;;  %v4989_v7 = vpop.f32.mrb[29].mxu0 }
0x4b1c   :  { %v3842_v8 = vmul.f32 %v3841_v6, %v5753_v48 }
0x4b1e   :  { %v4397_v10 = vmul.f32 -1.442695, %v3842_v8 }
0x4b20   :  { %5464 = vpow2.f32 %v4397_v10 }
0x4b2a   :  { %v5465_v12 = vpop.eup %5464 }
0x4b2b   :  { %v3846_v35 = vadd.f32 1.0, %v5465_v12 }
0x4b2d   :  { %5466 = vrcp.f32 %v3846_v35 }
0x4b37   :  { %v5467_v42 = vpop.eup %5466 }
0x4b38   :  { %v3849_v16 = vmul.f32 2.0, %v5467_v42 }
0x4b3a   :  { %v4398_v18 = vadd.f32 -1.0, %v3849_v16 }
0x4b3c   :  { %v3851_v20 = vsel %vm5745_vm4, %v4398_v18, %v5467_v42 }
0x4b3d   :  { %3854 = vrot.lane.b32.xlu0 %v3851_v20, %s5523_s29  ;;  %v3852_v23 = vmul.f32 %v3851_v20, %v3757_v13 }
0x4baf   :  { %v3855_v47 = vpop.permute.xlu0 %3854 }
0x4bb0   :  { %v3857_v22 = vmul.f32 %v3855_v47, %v3851_v20 }
0x4bb2   :  { %3859 = vrot.lane.b32.xlu1 %v3857_v22, %s5524_s30 }
0x4c24   :  { %v3860_v24 = vpop.permute.xlu1 %3859 }
0x4c25   :  { %v3862_v26 = vadd.f32 %v3860_v24, %v3852_v23 }
0x4c27   :  { %5468 = vtanh.f32 %v3862_v26 }
0x4c31   :  { %v5469_v30 = vpop.eup %5468 }
0x4c32   :  { %3865 = vrot.lane.b32.xlu0 %v5469_v30, %s5523_s29 }
0x4ca4   :  { %v3866_v40 = vpop.permute.xlu0 %3865 }
0x4ca5   :  { %v3868_v31 = vmul.f32 %v3866_v40, %v3851_v20 }
0x4ca7   :  { %3870 = vrot.lane.b32.xlu1 %v3868_v31, %s5524_s30  ;;  %v4190_v31 = vld [vmem:[#allocation2 + $0x1e] sm:$0x3] }
0x4d19   :  { %v3871_v36 = vpop.permute.xlu1 %3870 }
0x4d1a   :  { %3873 = vst.msk [vmem:[#allocation2 + $0x16] sm:$0x3] %vm383_vm5, %v3871_v36  ;;  %4999 = vmatmul.mubr.msk.f32.vlgmr.msra.gmra.mrb[36].mxu1 %vm142_vm1, %v3871_v36  ;;  %v4196_v36 = vld [vmem:[%s6548_s21] sm:$0xff] }
0x4d1b   :  { %5278 = vmatpush3.bf16.msra.mxu1 %v6308_v14  ;;  %5020 = vmatprep.mubr.msk.f32.mxu1 %vm5520_vm0, %v5521_v28 }
0x4d1c   :  { %5279 = vmatprep.subr.bf16.mxu1 %v5519_v15 }
0x4d1f   :  { %5281 = vmatpush3.bf16.msra.mxu1 %v6318_v21 }
0x4ded   :  { %v3942_v38 = vpop.f32.mrb[36].mxu1 }
0x4dee   :  { %v3946_v33 = vadd.f32 %v3942_v38, %v3310_v2  ;;  %v5000_v39 = vpop.f32.mrb[37].mxu1  ;;  %v3171_v2 = vadd.f32 %v6349_v29, %v2344_v1  ;;  %v4197_v38 = vld [vmem:[%s6548_s21 + $0x8] sm:$0xff] }
0x4def   :  { %v4199_v39 = vld [vmem:[%s6548_s21 + $0x18] sm:$0xff] }
0x4df0   :  { %v3947_v41 = vmul.f32 %v3946_v33, %v5753_v48  ;;  %v3172_v3 = vmul.f32 %v3171_v2, %v5753_v48  ;;  %v5283_v33 = vpack.c.bf16 %v4197_v38, %v4196_v36 }
0x4df2   :  { %v4400_v43 = vmul.f32 -1.442695, %v3947_v41  ;;  %v4379_v5 = vmul.f32 -1.442695, %v3172_v3 }
0x4df4   :  { %5470 = vpow2.f32 %v4400_v43  ;;  %v4200_v43 = vld [vmem:[%s6548_s21 + $0x20] sm:$0xff] }
0x4dfe   :  { %v5471_v46 = vpop.eup %5470 }
0x4dff   :  { %v3951_v49 = vadd.f32 1.0, %v5471_v46  ;;  %v4201_v46 = vld [vmem:[%s6548_s21 + $0x28] sm:$0xff] }
0x4e01   :  { %5472 = vrcp.f32 %v3951_v49  ;;  %v5289_v49 = vpack.c.bf16 %v4201_v46, %v4200_v43 }
0x4e0b   :  { %v5473_v50 = vpop.eup %5472 }
0x4e0c   :  { %v3954_v4 = vmul.f32 2.0, %v5473_v50 }
0x4e0e   :  { %v4401_v14 = vadd.f32 -1.0, %v3954_v4  ;;  %v4203_v4 = vld [vmem:[%s6548_s21 + $0x38] sm:$0xff] }
0x4e10   :  { %v3956_v52 = vsel %vm5745_vm4, %v4401_v14, %v5473_v50  ;;  %v4202_v50 = vld [vmem:[%s6548_s21 + $0x30] sm:$0xff] }
0x4e11   :  { %3959 = vrot.lane.b32.xlu0 %v3956_v52, %s5523_s29  ;;  %v3957_v53 = vmul.f32 %v3956_v52, %v3862_v26  ;;  %v5292_v14 = vpack.c.bf16 %v4203_v4, %v4202_v50 }
0x4e83   :  { %v3960_v44 = vpop.permute.xlu0 %3959 }
0x4e84   :  { %v3962_v21 = vmul.f32 %v3960_v44, %v3956_v52 }
0x4e86   :  { %3964 = vrot.lane.b32.xlu1 %v3962_v21, %s5524_s30 }
0x4ef8   :  { %v3965_v54 = vpop.permute.xlu1 %3964 }
0x4ef9   :  { %v3967_v55 = vadd.f32 %v3965_v54, %v3957_v53 }
0x4efb   :  { %5474 = vtanh.f32 %v3967_v55 }
0x4f05   :  { %v5475_v27 = vpop.eup %5474 }
0x4f06   :  { %3970 = vrot.lane.b32.xlu0 %v5475_v27, %s5523_s29 }
0x4f78   :  { %v3971_v56 = vpop.permute.xlu0 %3970 }
0x4f79   :  { %v3973_v51 = vmul.f32 %v3971_v56, %v3956_v52 }
0x4f7b   :  { %3975 = vrot.lane.b32.xlu1 %v3973_v51, %s5524_s30 }
0x4fed   :  { %v3976_v57 = vpop.permute.xlu1 %3975 }
0x4fee   :  { %3978 = vst.msk [vmem:[#allocation2 + $0x14] sm:$0x3] %vm383_vm5, %v3976_v57  ;;  %5010 = vmatmul.mubr.msk.f32.vlgmr.msra.gmra.mrb[30].mxu0 %vm142_vm1, %v3976_v57 }
0x4fef   :  { %5039 = vmatprep.mubr.msk.f32.mxu0 %vm5520_vm0, %v5521_v28  ;;  %5284 = vmatpush3.bf16.msra.mxu0 %v5283_v33 }
0x4ff0   :  { %5285 = vmatprep.subr.bf16.mxu0 %v5519_v15 }
0x50c1   :  { %v4047_v59 = vpop.f32.mrb[30].mxu0 }
0x50c2   :  { %v4051_v60 = vadd.f32 %v4047_v59, %v3311_v9  ;;  %v5011_v32 = vpop.f32.mrb[31].mxu0 }
0x50c4   :  { %v4052_v61 = vmul.f32 %v4051_v60, %v5753_v48 }
0x50c6   :  { %v4403_v62 = vmul.f32 -1.442695, %v4052_v61 }
0x50c8   :  { %5476 = vpow2.f32 %v4403_v62 }
0x50d2   :  { %v5477_v13 = vpop.eup %5476 }
0x50d3   :  { %v4056_v19 = vadd.f32 1.0, %v5477_v13 }
0x50d5   :  { %5478 = vrcp.f32 %v4056_v19 }
0x50d6   :  { %5480 = vpow2.f32 %v4379_v5 }
0x50df   :  { %v5479_v63 = vpop.eup %5478 }
0x50e0   :  { %v4059_v34 = vmul.f32 2.0, %v5479_v63  ;;  %v5481_v6 = vpop.eup %5480 }
0x50e1   :  { %v3176_v7 = vadd.f32 1.0, %v5481_v6 }
0x50e2   :  { %v4404_v28 = vadd.f32 -1.0, %v4059_v34 }
0x50e3   :  { %5482 = vrcp.f32 %v3176_v7 }
0x50e4   :  { %v4061_v25 = vsel %vm5745_vm4, %v4404_v28, %v5479_v63 }
0x50e5   :  { %4064 = vrot.lane.b32.xlu0 %v4061_v25, %s5523_s29  ;;  %v4062_v8 = vmul.f32 %v4061_v25, %v3967_v55 }
0x50ed   :  { %v5483_v35 = vpop.eup %5482 }
0x50ee   :  { %v3179_v42 = vmul.f32 2.0, %v5483_v35 }
0x50f0   :  { %v4380_v18 = vadd.f32 -1.0, %v3179_v42 }
0x50f2   :  { %v3181_v37 = vsel %vm5745_vm4, %v4380_v18, %v5483_v35 }
0x50f3   :  { %v3182_v24 = vmul.f32 %v3181_v37, %v6298_v11  ;;  %v4198_v11 = vld [vmem:[%s6548_s21 + $0x10] sm:$0xff] }
0x50f4   :  { %v5286_v41 = vpack.c.bf16 %v4199_v39, %v4198_v11 }
0x50f6   :  { %5287 = vmatpush3.bf16.msra.mxu0 %v5286_v41 }
0x50f7   :  { %5288 = vmatprep.subr.bf16.mxu0 %v5519_v15 }
0x50fa   :  { %5290 = vmatpush3.bf16.msra.mxu0 %v5289_v49 }
0x50fb   :  { %5291 = vmatprep.subr.bf16.mxu0 %v5519_v15 }
0x50fe   :  { %5293 = vmatpush3.bf16.msra.mxu0 %v5292_v14 }
0x5157   :  { %v4065_v17 = vpop.permute.xlu0 %4064 }
0x5158   :  { %v4067_v0 = vmul.f32 %v4065_v17, %v4061_v25 }
0x515a   :  { %4069 = vrot.lane.b32.xlu1 %v4067_v0, %s5524_s30 }
0x51cc   :  { %v4070_v10 = vpop.permute.xlu1 %4069 }
0x51cd   :  { %v6457_v12 = vadd.f32 %v4070_v10, %v4062_v8 }
0x51cf   :  { %5484 = vtanh.f32 %v6457_v12 }
0x51d9   :  { %v5485_v16 = vpop.eup %5484 }
0x51da   :  { %4075 = vrot.lane.b32.xlu0 %v5485_v16, %s5523_s29 }
0x51de   :  { %3184 = vrot.lane.b32.xlu0 %v3181_v37, %s5523_s29 }
0x524c   :  { %v4076_v29 = vpop.permute.xlu0 %4075 }
0x524d   :  { %v4078_v20 = vmul.f32 %v4076_v29, %v4061_v25 }
0x524f   :  { %4080 = vrot.lane.b32.xlu1 %v4078_v20, %s5524_s30 }
0x5250   :  { %v3185_v47 = vpop.permute.xlu0 %3184 }
0x5251   :  { %v3187_v22 = vmul.f32 %v3185_v47, %v3181_v37 }
0x5253   :  { %3189 = vrot.lane.b32.xlu1 %v3187_v22, %s5524_s30 }
0x52c1   :  { %v4081_v23 = vpop.permute.xlu1 %4080 }
0x52c2   :  { %4083 = vst.msk [vmem:[#allocation2 + $0x12] sm:$0x3] %vm383_vm5, %v4081_v23  ;;  %5021 = vmatmul.mubr.msk.f32.vlgmr.msra.gmra.mrb[38].mxu1 %vm142_vm1, %v4081_v23 }
0x52c5   :  { %v3190_v26 = vpop.permute.xlu1 %3189 }
0x52c6   :  { %v3192_v30 = vadd.f32 %v3190_v26, %v3182_v24 }
0x52c8   :  { %5486 = vtanh.f32 %v3192_v30 }
0x52d2   :  { %v5487_v40 = vpop.eup %5486 }
0x52d3   :  { %3195 = vrot.lane.b32.xlu0 %v5487_v40, %s5523_s29 }
0x52d7   :  { %4192 = vrot.lane.b32.xlu0 %v4190_v31, %s5524_s30 }
0x5345   :  { %v3196_v52 = vpop.permute.xlu0 %3195 }
0x5346   :  { %v3198_v44 = vmul.f32 %v3196_v52, %v3181_v37 }
0x5348   :  { %3200 = vrot.lane.b32.xlu1 %v3198_v44, %s5524_s30 }
0x5395   :  { %v4152_v21 = vpop.f32.mrb[38].mxu1 }
0x5396   :  { %v4156_v53 = vadd.f32 %v4152_v21, %v6444_v58  ;;  %v5022_v54 = vpop.f32.mrb[39].mxu1  ;;  %v4193_v58 = vpop.permute.xlu0 %4192 }
0x5398   :  { %v4157_v55 = vmul.f32 %v4156_v53, %v5753_v48 }
0x539a   :  { %v4406_v27 = vmul.f32 -1.442695, %v4157_v55 }
0x539c   :  { %5488 = vpow2.f32 %v4406_v27 }
0x53a6   :  { %v5489_v56 = vpop.eup %5488 }
0x53a7   :  { %v4161_v51 = vadd.f32 1.0, %v5489_v56 }
0x53a9   :  { %5490 = vrcp.f32 %v4161_v51 }
0x53b3   :  { %v5491_v57 = vpop.eup %5490 }
0x53b4   :  { %v4164_v9 = vmul.f32 2.0, %v5491_v57 }
0x53b6   :  { %v4407_v59 = vadd.f32 -1.0, %v4164_v9 }
0x53b8   :  { %v4166_v15 = vsel %vm5745_vm4, %v4407_v59, %v5491_v57 }
0x53b9   :  { %4169 = vrot.lane.b32.xlu1 %v4166_v15, %s5523_s29  ;;  %v4167_v34 = vmul.f32 %v4166_v15, %v6457_v12 }
0x53ba   :  { %v3201_v60 = vpop.permute.xlu1 %3200 }
0x53bb   :  { %3203 = vst.msk [vmem:[#allocation2 + $0xe] sm:$0x3] %vm383_vm5, %v3201_v60 }
0x53c2   :  { %v4189_v32 = vld [vmem:[#allocation2 + $0xe] sm:$0x3] }
0x53c3   :  { %v4195_v48 = vsel %vm142_vm1, %v4189_v32, %v4193_v58 }
0x53c4   :  { %5040 = vmatmul.mubr.msk.f32.vlgmr.msra.gmra.mrb[32].mxu0 %vm2229_vm6, %v4195_v48 }
0x542b   :  { %v4170_v61 = vpop.permute.xlu1 %4169 }
0x542c   :  { %v4172_v62 = vmul.f32 %v4170_v61, %v4166_v15 }
0x542e   :  { %4174 = vrot.lane.b32.xlu0 %v4172_v62, %s5524_s30 }
0x5497   :  { %v4280_v13 = vpop.f32.mrb[32].mxu0 }
0x5498   :  { %v4281_v19 = vadd.f32 %v4408_v45, %v4280_v13  ;;  %v5041_v63 = vpop.f32.mrb[33].mxu0 }
0x549a   :  { %4285 = vst.msk [vmem:[#allocation3] sm:$0x3] %vm4284_vm7, %v4281_v19 }
0x54a0   :  { %v4175_v28 = vpop.permute.xlu0 %4174 }
0x54a1   :  { %v4177_v25 = vadd.f32 %v4175_v28, %v4167_v34 }
0x54a3   :  { %5492 = vtanh.f32 %v4177_v25 }
0x54ad   :  { %v5493_v17 = vpop.eup %5492 }
0x54ae   :  { %4180 = vrot.lane.b32.xlu1 %v5493_v17, %s5523_s29 }
0x54af   :  { %5505 = shalt.err (!%p5502_p4)
}
0x54b0   :  { %s5506_s2 = scalar_lea.hbm %s6550_s23, 32 }
0x54b1   :  { %p5507_p5 = scmp.ne.s32.totalorder %s6550_s23, %s5506_s2  ;;  %p5510_p6 = scmp.lt.u32.totalorder %s5506_s2, %s6550_s23 }
0x54b3   :  { %p5512_p7 = pnand %p5510_p6, %p5507_p5 }
0x54b5   :  { %5515 = shalt.err (!%p5512_p7)
}
0x54b6   :  { %4295 = dma.vmem_to_hbm [thread:$0]  %s4293_s14, 32, %s6550_s23, [#allocation4]  }
0x5520   :  { %v4181_v0 = vpop.permute.xlu1 %4180 }
0x5521   :  { %v4183_v1 = vmul.f32 %v4181_v0, %v4166_v15 }
0x5523   :  { %4185 = vrot.lane.b32.xlu0 %v4183_v1, %s5524_s30 }
0x5595   :  { %v4186_v2 = vpop.permute.xlu0 %4185 }
0x5596   :  { %4188 = vst.msk [vmem:[#allocation2 + $0x10] sm:$0x3] %vm383_vm5, %v4186_v2 }
0x5597   :  { %5516 = dma.done.wait [#allocation4], 32  }
0x5598   :  { %5517 = vsyncadd [#allocation4], 4294967264 }
0x5599   :  { %4299 = vsyncpa [#allocation4], 1 }

</bundles_post_ra>
